<compile_context>
chip_gen: v7x
topology: tpu7x:2x2x1
jax: 0.10.0
libtpu: 0.0.40
codegen_flags: <defaults>
</compile_context>

<pallas_src>
import functools
import numpy as np

import jax
import jax.numpy as jnp
from jax.experimental import pallas as pl
from jax.experimental.pallas import tpu as pltpu

INCORPORATE = 7


# ----------------------------------------------------------------------------
# Per-generation VMEM budget (v5e/v6e: 128 MiB physical, v7x: 64 MiB)
# ----------------------------------------------------------------------------
def _default_vmem_limit():
    cap = 64 * 1024 * 1024
    try:
        cap = int(getattr(pltpu.get_tpu_info(), "vmem_capacity_bytes", cap))
    except Exception:
        pass
    # leave headroom for compiler-internal scratch; never request > 100 MiB
    return int(max(32 << 20, min(cap - (8 << 20), 100 << 20)))


_VMEM_LIMIT = _default_vmem_limit()


def _pick_tile_m(M, per_row_bytes, resident_bytes, tm_target=8192):
    """Largest row tile whose double-buffered working set fits ~half of VMEM."""
    budget = max(1 << 20, (_VMEM_LIMIT // 2) - 2 * resident_bytes)
    tm = budget // max(2 * per_row_bytes, 1)        # x2: double buffering
    tm = int(min(M, tm_target, max(8, tm)))
    if tm >= M:
        return M                                    # single (possibly ragged) block
    return max(8, (tm // 8) * 8)                    # second-minor multiple of 8


# ----------------------------------------------------------------------------
# Generic row-tiled pallas_call: row-tiled activations + grid-resident weights
# ----------------------------------------------------------------------------
def _row_tiled_call(kernel, row_inputs, resident_inputs, out_cols, out_dtype,
                    *, flops):
    M = row_inputs[0].shape[0]
    per_row = sum(r.shape[1] * r.dtype.itemsize for r in row_inputs)
    per_row += out_cols * jnp.dtype(out_dtype).itemsize
    resident_bytes = sum(int(np.prod(r.shape)) * r.dtype.itemsize
                         for r in resident_inputs)
    tm = _pick_tile_m(M, per_row, resident_bytes)

    in_specs = [pl.BlockSpec((tm, r.shape[1]), lambda i: (i, 0))
                for r in row_inputs]
    in_specs += [pl.BlockSpec(r.shape, lambda i, nd=r.ndim: (0,) * nd)
                 for r in resident_inputs]
    out_specs = pl.BlockSpec((tm, out_cols), lambda i: (i, 0))

    bytes_accessed = int(M * per_row + resident_bytes)
    return pl.pallas_call(
        kernel,
        out_shape=jax.ShapeDtypeStruct((M, out_cols), out_dtype),
        grid_spec=pltpu.PrefetchScalarGridSpec(
            num_scalar_prefetch=0,
            grid=(pl.cdiv(M, tm),),
            in_specs=in_specs,
            out_specs=out_specs,
        ),
        compiler_params=pltpu.CompilerParams(
            dimension_semantics=("parallel",),   # megacore sharding on v7x
            vmem_limit_bytes=_VMEM_LIMIT,
        ),
        cost_estimate=pl.CostEstimate(flops=int(flops), transcendentals=0,
                                      bytes_accessed=bytes_accessed),
    )(*row_inputs, *resident_inputs)


# ----------------------------------------------------------------------------
# Kernels
# ----------------------------------------------------------------------------
def _matmul_bias_relu_kernel(x_ref, w_ref, b_ref, o_ref, *, relu):
    acc = jnp.dot(x_ref[...], w_ref[...], preferred_element_type=jnp.float32)
    acc = acc + b_ref[...]
    if relu:
        acc = jnp.maximum(acc, 0.0)
    o_ref[...] = acc.astype(o_ref.dtype)


def _conv34_kernel(x_ref, w3_ref, b3_ref, w4_ref, b4_ref, o_ref):
    # conv3 (3x3, im2col'd) ...
    h = jnp.dot(x_ref[...], w3_ref[...], preferred_element_type=jnp.float32)
    h = jnp.maximum(h + b3_ref[...], 0.0)
    # ... fused with conv4 (1x1 conv == plain matmul epilogue)
    o = jnp.dot(h.astype(jnp.bfloat16), w4_ref[...],
                preferred_element_type=jnp.float32)
    o = jnp.maximum(o + b4_ref[...], 0.0)
    o_ref[...] = o.astype(o_ref.dtype)


def _fc_tail_kernel(x_ref, inf_ref, act_ref,
                    wx_ref, wi_ref, b2_ref,
                    wh_ref, wa_ref, b1_ref,
                    wq_ref, bq_ref, o_ref):
    # layer2: relu(x @ Wx + inform @ Winf + b2)   (split-K instead of concat)
    h = jnp.dot(x_ref[...], wx_ref[...], preferred_element_type=jnp.float32)
    h += jnp.dot(inf_ref[...].astype(jnp.bfloat16), wi_ref[...],
                 preferred_element_type=jnp.float32)
    h = jnp.maximum(h + b2_ref[...], 0.0)
    # q[0]: relu(h @ Wh + act @ Wa + b1)          (split-K instead of concat)
    g = jnp.dot(h.astype(jnp.bfloat16), wh_ref[...],
                preferred_element_type=jnp.float32)
    g += jnp.dot(act_ref[...].astype(jnp.bfloat16), wa_ref[...],
                 preferred_element_type=jnp.float32)
    g = jnp.maximum(g + b1_ref[...], 0.0)
    # q[2]: g @ Wq + bq   (Wq zero-padded to 128 lanes -> unmasked store)
    q = jnp.dot(g.astype(jnp.bfloat16), wq_ref[...],
                preferred_element_type=jnp.float32)
    o_ref[...] = (q + bq_ref[...]).astype(o_ref.dtype)


# ----------------------------------------------------------------------------
# Wrappers
# ----------------------------------------------------------------------------
def conv_matmul(cols2d, w_kn, b_1n, *, relu=True, out_dtype=jnp.bfloat16):
    M, K = cols2d.shape
    K2, N = w_kn.shape
    assert K == K2
    return _row_tiled_call(
        functools.partial(_matmul_bias_relu_kernel, relu=relu),
        [cols2d], [w_kn, b_1n], N, out_dtype,
        flops=2 * M * K * N)


def conv34_matmul(cols2d, w3, b3, w4, b4, *, out_dtype=jnp.bfloat16):
    M, K = cols2d.shape
    N3, N4 = w3.shape[1], w4.shape[1]
    return _row_tiled_call(
        _conv34_kernel, [cols2d], [w3, b3, w4, b4], N4, out_dtype,
        flops=2 * M * (K * N3 + N3 * N4))


def fc_tail(x800, inform, act, fp, *, out_dtype=jnp.float32):
    B = x800.shape[0]
    hid = fp["l2_wx"].shape[1]
    npad = fp["q2_w"].shape[1]
    flops = 2 * B * (x800.shape[1] * hid + inform.shape[1] * hid
                     + hid * hid + act.shape[1] * hid + hid * npad)
    return _row_tiled_call(
        _fc_tail_kernel,
        [x800, inform, act],
        [fp["l2_wx"], fp["l2_wi"], fp["l2_b"],
         fp["q1_wh"], fp["q1_wa"], fp["q1_b"],
         fp["q2_w"], fp["q2_b"]],
        npad, out_dtype, flops=flops)


# ----------------------------------------------------------------------------
# im2col glue (plain JAX; K ordered (IC, kh, kw) to match PyTorch weights)
# ----------------------------------------------------------------------------
def _im2col(x_nhwc, kh, kw, stride):
    B, H, W, C = x_nhwc.shape
    Ho = (H - kh) // stride + 1
    Wo = (W - kw) // stride + 1
    cols = [
        x_nhwc[:, i:i + stride * Ho:stride, j:j + stride * Wo:stride, :]
        for i in range(kh) for j in range(kw)
    ]
    cols = jnp.stack(cols, axis=-1).reshape(B, Ho, Wo, C * kh * kw)
    return cols, Ho, Wo


# ----------------------------------------------------------------------------
# Deterministic parameter init (PyTorch-style orthogonal_, gain=sqrt(2), bias 0)
# ----------------------------------------------------------------------------
def _orthogonal(key, rows, cols, gain):
    n = max(rows, cols)
    a = jax.random.normal(key, (n, n), jnp.float32)
    q, r = jnp.linalg.qr(a)
    q = q * jnp.sign(jnp.diag(r))[None, :]
    return gain * q[:rows, :cols]


def init_params(key, num_inputs, act_dim, hidden_size):
    gain = float(np.sqrt(2.0))  # nn.init.calculate_gain('relu')
    ks = jax.random.split(key, 7)

    def conv_w(k, oc, ic, kh, kw):
        return _orthogonal(k, oc, ic * kh * kw, gain).reshape(oc, ic, kh, kw)

    def lin_w(k, out_f, in_f):
        # PyTorch Linear weight is (out, in); we store (in, out) for x @ W
        return _orthogonal(k, out_f, in_f, gain).T

    p = {}
    p["c1_w"] = conv_w(ks[0], 16, num_inputs, 8, 8); p["c1_b"] = jnp.zeros((16,))
    p["c2_w"] = conv_w(ks[1], 32, 16, 4, 4);         p["c2_b"] = jnp.zeros((32,))
    p["c3_w"] = conv_w(ks[2], 64, 32, 3, 3);         p["c3_b"] = jnp.zeros((64,))
    p["c4_w"] = conv_w(ks[3], 32, 64, 1, 1);         p["c4_b"] = jnp.zeros((32,))
    p["l2_w"] = lin_w(ks[4], hidden_size, INCORPORATE + 800)
    p["l2_b"] = jnp.zeros((hidden_size,))
    p["q1_w"] = lin_w(ks[5], hidden_size, hidden_size + act_dim)
    p["q1_b"] = jnp.zeros((hidden_size,))
    p["q2_w"] = lin_w(ks[6], 1, hidden_size)
    p["q2_b"] = jnp.zeros((1,))
    return p


def prepare_params(params, hidden_size):
    """One-time conversion of PyTorch-layout params into kernel-friendly
    operands (bf16, (K,OC) layout, 1/255 folded, split-K, padded q2)."""
    def conv_w(w_oihw, scale=1.0):
        oc = w_oihw.shape[0]
        return (w_oihw.reshape(oc, -1).T * scale).astype(jnp.bfloat16)

    def bias(b):
        return b.astype(jnp.float32).reshape(1, -1)

    hid = hidden_size
    fp = {}
    # img/255 folded into conv1 weights (bias unchanged: scaling is pre-conv)
    fp["c1_w"] = conv_w(params["c1_w"], 1.0 / 255.0); fp["c1_b"] = bias(params["c1_b"])
    fp["c2_w"] = conv_w(params["c2_w"]);              fp["c2_b"] = bias(params["c2_b"])
    fp["c3_w"] = conv_w(params["c3_w"]);              fp["c3_b"] = bias(params["c3_b"])
    fp["c4_w"] = conv_w(params["c4_w"]);              fp["c4_b"] = bias(params["c4_b"])
    # layer2: split K = 800 (image features) + INCORPORATE (inform)
    l2 = params["l2_w"].astype(jnp.bfloat16)
    fp["l2_wx"], fp["l2_wi"] = l2[:800], l2[800:]
    fp["l2_b"] = bias(params["l2_b"])
    # q[0]: split K = hid (features) + act_dim
    q1 = params["q1_w"].astype(jnp.bfloat16)
    fp["q1_wh"], fp["q1_wa"] = q1[:hid], q1[hid:]
    fp["q1_b"] = bias(params["q1_b"])
    # q[2]: (hid, 1) padded to 128 output lanes for an unmasked, lane-dense store
    wq = jnp.zeros((hid, 128), jnp.float32).at[:, 0].set(params["q2_w"][:, 0])
    fp["q2_w"] = wq.astype(jnp.bfloat16)
    fp["q2_b"] = jnp.zeros((1, 128), jnp.float32).at[0, 0].set(params["q2_b"][0])
    return fp


# ----------------------------------------------------------------------------
# Qfunc.forward (continuous-action branch; activation() == ReLU)
# ----------------------------------------------------------------------------
@jax.jit
def qfunc_forward(fp, img_nchw, inform, act):
    # NCHW -> NHWC; bf16 activations (img/255 already folded into conv1 weights)
    x = jnp.transpose(img_nchw, (0, 2, 3, 1)).astype(jnp.bfloat16)
    B = x.shape[0]

    # layer1: conv stack (im2col + row-tiled Pallas matmul; conv3+conv4 fused)
    cols, Ho, Wo = _im2col(x, 8, 8, 4)
    x = conv_matmul(cols.reshape(B * Ho * Wo, -1),
                    fp["c1_w"], fp["c1_b"]).reshape(B, Ho, Wo, -1)
    cols, Ho, Wo = _im2col(x, 4, 4, 2)
    x = conv_matmul(cols.reshape(B * Ho * Wo, -1),
                    fp["c2_w"], fp["c2_b"]).reshape(B, Ho, Wo, -1)
    cols, Ho, Wo = _im2col(x, 3, 3, 2)
    x = conv34_matmul(cols.reshape(B * Ho * Wo, -1),
                      fp["c3_w"], fp["c3_b"],
                      fp["c4_w"], fp["c4_b"]).reshape(B, Ho, Wo, -1)

    # Flatten in PyTorch NCHW (channel-major) order -> (B, 800)
    x = jnp.transpose(x, (0, 3, 1, 2)).reshape(B, -1)

    # layer2 + q: single fused FC-tail kernel (concats replaced by split-K)
    q = fc_tail(x, inform.astype(jnp.float32), act.astype(jnp.float32), fp)
    return q[:, 0]                                               # (B,)


if __name__ == "__main__":
    B, C, H, W = 2, 4, 100, 100     # 100x100 required by the hard-coded 800
    act_dim = 3
    hidden_size = 64

    key = jax.random.PRNGKey(0)
    k_img, k_inf, k_act, k_par = jax.random.split(key, 4)

    img = jax.random.uniform(k_img, (B, C, H, W), jnp.float32, 0.0, 255.0)
    inform = jax.random.normal(k_inf, (B, INCORPORATE), jnp.float32)
    act = jax.random.normal(k_act, (B, act_dim), jnp.float32)

    params = init_params(k_par, C, act_dim, hidden_size)
    fast_params = prepare_params(params, hidden_size)

    q = qfunc_forward(fast_params, img, inform, act)
    jax.block_until_ready(q)
    assert q.shape == (B,), q.shape
    assert bool(jnp.all(jnp.isfinite(q)))
    print("KERNEL_OK")
</pallas_src>

<mosaic_0001>
module attributes {stable_mosaic.version = 11 : i64} {
  func.func @_matmul_bias_relu_kernel(%arg0: i32, %arg1: memref<1152x256xbf16, #tpu.memory_space<vmem>>, %arg2: memref<256x16xbf16, #tpu.memory_space<vmem>>, %arg3: memref<1x16xf32, #tpu.memory_space<vmem>>, %arg4: memref<1152x16xbf16, #tpu.memory_space<vmem>>) attributes {dimension_semantics = [#tpu.dimension_semantics<parallel>], iteration_bounds = array<i64: 1>, scalar_prefetch = 0 : i64, scratch_operands = 0 : i64, tpu.core_type = #tpu.core_type<tc>, window_params = [{transform_indices = @transform_0, window_bounds = array<i64: 1152, 256>}, {pipeline_mode = #tpu.pipeline_mode<synchronous>, transform_indices = @transform_1, window_bounds = array<i64: 256, 16>}, {pipeline_mode = #tpu.pipeline_mode<synchronous>, transform_indices = @transform_2, window_bounds = array<i64: 1, 16>}, {transform_indices = @transform_3, window_bounds = array<i64: 1152, 16>}]} {
    %c0 = arith.constant 0 : index
    %c0_0 = arith.constant 0 : index
    %0 = vector.load %arg1[%c0, %c0_0] : memref<1152x256xbf16, #tpu.memory_space<vmem>>, vector<1152x256xbf16>
    %c0_1 = arith.constant 0 : index
    %c0_2 = arith.constant 0 : index
    %1 = vector.load %arg2[%c0_1, %c0_2] : memref<256x16xbf16, #tpu.memory_space<vmem>>, vector<256x16xbf16>
    %cst = arith.constant dense<0.000000e+00> : vector<1152x16xf32>
    %2 = tpu.matmul %0, %1, %cst {dimension_numbers = #tpu.dot_dimension_numbers<[1], [0], [0], [1], [0, 0, 1, 1], [], []>} : vector<1152x256xbf16>, vector<256x16xbf16>, vector<1152x16xf32> -> vector<1152x16xf32>
    %c0_3 = arith.constant 0 : index
    %c0_4 = arith.constant 0 : index
    %3 = vector.load %arg3[%c0_3, %c0_4] : memref<1x16xf32, #tpu.memory_space<vmem>>, vector<1x16xf32>
    %4 = vector.broadcast %3 : vector<1x16xf32> to vector<1152x16xf32>
    %5 = arith.addf %2, %4 : vector<1152x16xf32>
    %cst_5 = arith.constant 0.000000e+00 : f32
    %6 = vector.broadcast %cst_5 : f32 to vector<1152x16xf32>
    %7 = arith.maximumf %5, %6 : vector<1152x16xf32>
    %8 = arith.truncf %7 : vector<1152x16xf32> to vector<1152x16xbf16>
    %c0_6 = arith.constant 0 : index
    %c0_7 = arith.constant 0 : index
    %9 = vector.load %arg4[%c0_6, %c0_7] : memref<1152x16xbf16, #tpu.memory_space<vmem>>, vector<1152x16xbf16>
    tpu.vector_store %arg4[%c0_6, %c0_7], %8 {strides = array<i32>} : memref<1152x16xbf16, #tpu.memory_space<vmem>>, vector<1152x16xbf16>,
    return
  }
  func.func @transform_0(%arg0: i32) -> (i32, i32) {
    %c0_i32 = arith.constant 0 : i32
    %c0_i32_0 = arith.constant 0 : i32
    return %arg0, %c0_i32 : i32, i32
  }
  func.func @transform_1(%arg0: i32) -> (i32, i32) {
    %c0_i32 = arith.constant 0 : i32
    %c0_i32_0 = arith.constant 0 : i32
    %c0_i32_1 = arith.constant 0 : i32
    return %c0_i32, %c0_i32_0 : i32, i32
  }
  func.func @transform_2(%arg0: i32) -> (i32, i32) {
    %c0_i32 = arith.constant 0 : i32
    %c0_i32_0 = arith.constant 0 : i32
    %c0_i32_1 = arith.constant 0 : i32
    return %c0_i32, %c0_i32_0 : i32, i32
  }
  func.func @transform_3(%arg0: i32) -> (i32, i32) {
    %c0_i32 = arith.constant 0 : i32
    %c0_i32_0 = arith.constant 0 : i32
    return %arg0, %c0_i32 : i32, i32
  }
}

module attributes {stable_mosaic.version = 11 : i64} {
  func.func @_matmul_bias_relu_kernel(%arg0: i32, %arg1: memref<242x256xbf16, #tpu.memory_space<vmem>>, %arg2: memref<256x32xbf16, #tpu.memory_space<vmem>>, %arg3: memref<1x32xf32, #tpu.memory_space<vmem>>, %arg4: memref<242x32xbf16, #tpu.memory_space<vmem>>) attributes {dimension_semantics = [#tpu.dimension_semantics<parallel>], iteration_bounds = array<i64: 1>, scalar_prefetch = 0 : i64, scratch_operands = 0 : i64, tpu.core_type = #tpu.core_type<tc>, window_params = [{transform_indices = @transform_0, window_bounds = array<i64: 242, 256>}, {pipeline_mode = #tpu.pipeline_mode<synchronous>, transform_indices = @transform_1, window_bounds = array<i64: 256, 32>}, {pipeline_mode = #tpu.pipeline_mode<synchronous>, transform_indices = @transform_2, window_bounds = array<i64: 1, 32>}, {transform_indices = @transform_3, window_bounds = array<i64: 242, 32>}]} {
    %c0 = arith.constant 0 : index
    %c0_0 = arith.constant 0 : index
    %0 = vector.load %arg1[%c0, %c0_0] : memref<242x256xbf16, #tpu.memory_space<vmem>>, vector<242x256xbf16>
    %c0_1 = arith.constant 0 : index
    %c0_2 = arith.constant 0 : index
    %1 = vector.load %arg2[%c0_1, %c0_2] : memref<256x32xbf16, #tpu.memory_space<vmem>>, vector<256x32xbf16>
    %cst = arith.constant dense<0.000000e+00> : vector<242x32xf32>
    %2 = tpu.matmul %0, %1, %cst {dimension_numbers = #tpu.dot_dimension_numbers<[1], [0], [0], [1], [0, 0, 1, 1], [], []>} : vector<242x256xbf16>, vector<256x32xbf16>, vector<242x32xf32> -> vector<242x32xf32>
    %c0_3 = arith.constant 0 : index
    %c0_4 = arith.constant 0 : index
    %3 = vector.load %arg3[%c0_3, %c0_4] : memref<1x32xf32, #tpu.memory_space<vmem>>, vector<1x32xf32>
    %4 = vector.broadcast %3 : vector<1x32xf32> to vector<242x32xf32>
    %5 = arith.addf %2, %4 : vector<242x32xf32>
    %cst_5 = arith.constant 0.000000e+00 : f32
    %6 = vector.broadcast %cst_5 : f32 to vector<242x32xf32>
    %7 = arith.maximumf %5, %6 : vector<242x32xf32>
    %8 = arith.truncf %7 : vector<242x32xf32> to vector<242x32xbf16>
    %c0_6 = arith.constant 0 : index
    %c0_7 = arith.constant 0 : index
    %9 = vector.load %arg4[%c0_6, %c0_7] : memref<242x32xbf16, #tpu.memory_space<vmem>>, vector<242x32xbf16>
    tpu.vector_store %arg4[%c0_6, %c0_7], %8 {strides = array<i32>} : memref<242x32xbf16, #tpu.memory_space<vmem>>, vector<242x32xbf16>,
    return
  }
  func.func @transform_0(%arg0: i32) -> (i32, i32) {
    %c0_i32 = arith.constant 0 : i32
    %c0_i32_0 = arith.constant 0 : i32
    return %arg0, %c0_i32 : i32, i32
  }
  func.func @transform_1(%arg0: i32) -> (i32, i32) {
    %c0_i32 = arith.constant 0 : i32
    %c0_i32_0 = arith.constant 0 : i32
    %c0_i32_1 = arith.constant 0 : i32
    return %c0_i32, %c0_i32_0 : i32, i32
  }
  func.func @transform_2(%arg0: i32) -> (i32, i32) {
    %c0_i32 = arith.constant 0 : i32
    %c0_i32_0 = arith.constant 0 : i32
    %c0_i32_1 = arith.constant 0 : i32
    return %c0_i32, %c0_i32_0 : i32, i32
  }
  func.func @transform_3(%arg0: i32) -> (i32, i32) {
    %c0_i32 = arith.constant 0 : i32
    %c0_i32_0 = arith.constant 0 : i32
    return %arg0, %c0_i32 : i32, i32
  }
}

module attributes {stable_mosaic.version = 11 : i64} {
  func.func @_conv34_kernel(%arg0: i32, %arg1: memref<50x288xbf16, #tpu.memory_space<vmem>>, %arg2: memref<288x64xbf16, #tpu.memory_space<vmem>>, %arg3: memref<1x64xf32, #tpu.memory_space<vmem>>, %arg4: memref<64x32xbf16, #tpu.memory_space<vmem>>, %arg5: memref<1x32xf32, #tpu.memory_space<vmem>>, %arg6: memref<50x32xbf16, #tpu.memory_space<vmem>>) attributes {dimension_semantics = [#tpu.dimension_semantics<parallel>], iteration_bounds = array<i64: 1>, scalar_prefetch = 0 : i64, scratch_operands = 0 : i64, tpu.core_type = #tpu.core_type<tc>, window_params = [{transform_indices = @transform_0, window_bounds = array<i64: 50, 288>}, {pipeline_mode = #tpu.pipeline_mode<synchronous>, transform_indices = @transform_1, window_bounds = array<i64: 288, 64>}, {pipeline_mode = #tpu.pipeline_mode<synchronous>, transform_indices = @transform_2, window_bounds = array<i64: 1, 64>}, {pipeline_mode = #tpu.pipeline_mode<synchronous>, transform_indices = @transform_3, window_bounds = array<i64: 64, 32>}, {pipeline_mode = #tpu.pipeline_mode<synchronous>, transform_indices = @transform_4, window_bounds = array<i64: 1, 32>}, {transform_indices = @transform_5, window_bounds = array<i64: 50, 32>}]} {
    %c0 = arith.constant 0 : index
    %c0_0 = arith.constant 0 : index
    %0 = vector.load %arg1[%c0, %c0_0] : memref<50x288xbf16, #tpu.memory_space<vmem>>, vector<50x288xbf16>
    %c0_1 = arith.constant 0 : index
    %c0_2 = arith.constant 0 : index
    %1 = vector.load %arg2[%c0_1, %c0_2] : memref<288x64xbf16, #tpu.memory_space<vmem>>, vector<288x64xbf16>
    %cst = arith.constant dense<0.000000e+00> : vector<50x64xf32>
    %2 = tpu.matmul %0, %1, %cst {dimension_numbers = #tpu.dot_dimension_numbers<[1], [0], [0], [1], [0, 0, 1, 1], [], []>} : vector<50x288xbf16>, vector<288x64xbf16>, vector<50x64xf32> -> vector<50x64xf32>
    %c0_3 = arith.constant 0 : index
    %c0_4 = arith.constant 0 : index
    %3 = vector.load %arg3[%c0_3, %c0_4] : memref<1x64xf32, #tpu.memory_space<vmem>>, vector<1x64xf32>
    %4 = vector.broadcast %3 : vector<1x64xf32> to vector<50x64xf32>
    %5 = arith.addf %2, %4 : vector<50x64xf32>
    %cst_5 = arith.constant 0.000000e+00 : f32
    %6 = vector.broadcast %cst_5 : f32 to vector<50x64xf32>
    %7 = arith.maximumf %5, %6 : vector<50x64xf32>
    %8 = arith.truncf %7 : vector<50x64xf32> to vector<50x64xbf16>
    %c0_6 = arith.constant 0 : index
    %c0_7 = arith.constant 0 : index
    %9 = vector.load %arg4[%c0_6, %c0_7] : memref<64x32xbf16, #tpu.memory_space<vmem>>, vector<64x32xbf16>
    %cst_8 = arith.constant dense<0.000000e+00> : vector<50x32xf32>
    %10 = tpu.matmul %8, %9, %cst_8 {dimension_numbers = #tpu.dot_dimension_numbers<[1], [0], [0], [1], [0, 0, 1, 1], [], []>} : vector<50x64xbf16>, vector<64x32xbf16>, vector<50x32xf32> -> vector<50x32xf32>
    %c0_9 = arith.constant 0 : index
    %c0_10 = arith.constant 0 : index
    %11 = vector.load %arg5[%c0_9, %c0_10] : memref<1x32xf32, #tpu.memory_space<vmem>>, vector<1x32xf32>
    %12 = vector.broadcast %11 : vector<1x32xf32> to vector<50x32xf32>
    %13 = arith.addf %10, %12 : vector<50x32xf32>
    %cst_11 = arith.constant 0.000000e+00 : f32
    %14 = vector.broadcast %cst_11 : f32 to vector<50x32xf32>
    %15 = arith.maximumf %13, %14 : vector<50x32xf32>
    %16 = arith.truncf %15 : vector<50x32xf32> to vector<50x32xbf16>
    %c0_12 = arith.constant 0 : index
    %c0_13 = arith.constant 0 : index
    %17 = vector.load %arg6[%c0_12, %c0_13] : memref<50x32xbf16, #tpu.memory_space<vmem>>, vector<50x32xbf16>
    tpu.vector_store %arg6[%c0_12, %c0_13], %16 {strides = array<i32>} : memref<50x32xbf16, #tpu.memory_space<vmem>>, vector<50x32xbf16>,
    return
  }
  func.func @transform_0(%arg0: i32) -> (i32, i32) {
    %c0_i32 = arith.constant 0 : i32
    %c0_i32_0 = arith.constant 0 : i32
    return %arg0, %c0_i32 : i32, i32
  }
  func.func @transform_1(%arg0: i32) -> (i32, i32) {
    %c0_i32 = arith.constant 0 : i32
    %c0_i32_0 = arith.constant 0 : i32
    %c0_i32_1 = arith.constant 0 : i32
    return %c0_i32, %c0_i32_0 : i32, i32
  }
  func.func @transform_2(%arg0: i32) -> (i32, i32) {
    %c0_i32 = arith.constant 0 : i32
    %c0_i32_0 = arith.constant 0 : i32
    %c0_i32_1 = arith.constant 0 : i32
    return %c0_i32, %c0_i32_0 : i32, i32
  }
  func.func @transform_3(%arg0: i32) -> (i32, i32) {
    %c0_i32 = arith.constant 0 : i32
    %c0_i32_0 = arith.constant 0 : i32
    %c0_i32_1 = arith.constant 0 : i32
    return %c0_i32, %c0_i32_0 : i32, i32
  }
  func.func @transform_4(%arg0: i32) -> (i32, i32) {
    %c0_i32 = arith.constant 0 : i32
    %c0_i32_0 = arith.constant 0 : i32
    %c0_i32_1 = arith.constant 0 : i32
    return %c0_i32, %c0_i32_0 : i32, i32
  }
  func.func @transform_5(%arg0: i32) -> (i32, i32) {
    %c0_i32 = arith.constant 0 : i32
    %c0_i32_0 = arith.constant 0 : i32
    return %arg0, %c0_i32 : i32, i32
  }
}

module attributes {stable_mosaic.version = 11 : i64} {
  func.func @_fc_tail_kernel(%arg0: i32, %arg1: memref<2x800xbf16, #tpu.memory_space<vmem>>, %arg2: memref<2x7xf32, #tpu.memory_space<vmem>>, %arg3: memref<2x3xf32, #tpu.memory_space<vmem>>, %arg4: memref<800x64xbf16, #tpu.memory_space<vmem>>, %arg5: memref<7x64xbf16, #tpu.memory_space<vmem>>, %arg6: memref<1x64xf32, #tpu.memory_space<vmem>>, %arg7: memref<64x64xbf16, #tpu.memory_space<vmem>>, %arg8: memref<3x64xbf16, #tpu.memory_space<vmem>>, %arg9: memref<1x64xf32, #tpu.memory_space<vmem>>, %arg10: memref<64x128xbf16, #tpu.memory_space<vmem>>, %arg11: memref<1x128xf32, #tpu.memory_space<vmem>>, %arg12: memref<2x128xf32, #tpu.memory_space<vmem>>) attributes {dimension_semantics = [#tpu.dimension_semantics<parallel>], iteration_bounds = array<i64: 1>, scalar_prefetch = 0 : i64, scratch_operands = 0 : i64, tpu.core_type = #tpu.core_type<tc>, window_params = [{transform_indices = @transform_0, window_bounds = array<i64: 2, 800>}, {transform_indices = @transform_1, window_bounds = array<i64: 2, 7>}, {transform_indices = @transform_2, window_bounds = array<i64: 2, 3>}, {pipeline_mode = #tpu.pipeline_mode<synchronous>, transform_indices = @transform_3, window_bounds = array<i64: 800, 64>}, {pipeline_mode = #tpu.pipeline_mode<synchronous>, transform_indices = @transform_4, window_bounds = array<i64: 7, 64>}, {pipeline_mode = #tpu.pipeline_mode<synchronous>, transform_indices = @transform_5, window_bounds = array<i64: 1, 64>}, {pipeline_mode = #tpu.pipeline_mode<synchronous>, transform_indices = @transform_6, window_bounds = array<i64: 64, 64>}, {pipeline_mode = #tpu.pipeline_mode<synchronous>, transform_indices = @transform_7, window_bounds = array<i64: 3, 64>}, {pipeline_mode = #tpu.pipeline_mode<synchronous>, transform_indices = @transform_8, window_bounds = array<i64: 1, 64>}, {pipeline_mode = #tpu.pipeline_mode<synchronous>, transform_indices = @transform_9, window_bounds = array<i64: 64, 128>}, {pipeline_mode = #tpu.pipeline_mode<synchronous>, transform_indices = @transform_10, window_bounds = array<i64: 1, 128>}, {transform_indices = @transform_11, window_bounds = array<i64: 2, 128>}]} {
    %c0 = arith.constant 0 : index
    %c0_0 = arith.constant 0 : index
    %0 = vector.load %arg1[%c0, %c0_0] : memref<2x800xbf16, #tpu.memory_space<vmem>>, vector<2x800xbf16>
    %c0_1 = arith.constant 0 : index
    %c0_2 = arith.constant 0 : index
    %1 = vector.load %arg4[%c0_1, %c0_2] : memref<800x64xbf16, #tpu.memory_space<vmem>>, vector<800x64xbf16>
    %cst = arith.constant dense<0.000000e+00> : vector<2x64xf32>
    %2 = tpu.matmul %0, %1, %cst {dimension_numbers = #tpu.dot_dimension_numbers<[1], [0], [0], [1], [0, 0, 1, 1], [], []>} : vector<2x800xbf16>, vector<800x64xbf16>, vector<2x64xf32> -> vector<2x64xf32>
    %c0_3 = arith.constant 0 : index
    %c0_4 = arith.constant 0 : index
    %3 = vector.load %arg2[%c0_3, %c0_4] : memref<2x7xf32, #tpu.memory_space<vmem>>, vector<2x7xf32>
    %4 = arith.truncf %3 : vector<2x7xf32> to vector<2x7xbf16>
    %c0_5 = arith.constant 0 : index
    %c0_6 = arith.constant 0 : index
    %5 = vector.load %arg5[%c0_5, %c0_6] : memref<7x64xbf16, #tpu.memory_space<vmem>>, vector<7x64xbf16>
    %cst_7 = arith.constant dense<0.000000e+00> : vector<2x64xf32>
    %6 = tpu.matmul %4, %5, %cst_7 {dimension_numbers = #tpu.dot_dimension_numbers<[1], [0], [0], [1], [0, 0, 1, 1], [], []>} : vector<2x7xbf16>, vector<7x64xbf16>, vector<2x64xf32> -> vector<2x64xf32>
    %7 = arith.addf %2, %6 : vector<2x64xf32>
    %c0_8 = arith.constant 0 : index
    %c0_9 = arith.constant 0 : index
    %8 = vector.load %arg6[%c0_8, %c0_9] : memref<1x64xf32, #tpu.memory_space<vmem>>, vector<1x64xf32>
    %9 = vector.broadcast %8 : vector<1x64xf32> to vector<2x64xf32>
    %10 = arith.addf %7, %9 : vector<2x64xf32>
    %cst_10 = arith.constant 0.000000e+00 : f32
    %11 = vector.broadcast %cst_10 : f32 to vector<2x64xf32>
    %12 = arith.maximumf %10, %11 : vector<2x64xf32>
    %13 = arith.truncf %12 : vector<2x64xf32> to vector<2x64xbf16>
    %c0_11 = arith.constant 0 : index
    %c0_12 = arith.constant 0 : index
    %14 = vector.load %arg7[%c0_11, %c0_12] : memref<64x64xbf16, #tpu.memory_space<vmem>>, vector<64x64xbf16>
    %cst_13 = arith.constant dense<0.000000e+00> : vector<2x64xf32>
    %15 = tpu.matmul %13, %14, %cst_13 {dimension_numbers = #tpu.dot_dimension_numbers<[1], [0], [0], [1], [0, 0, 1, 1], [], []>} : vector<2x64xbf16>, vector<64x64xbf16>, vector<2x64xf32> -> vector<2x64xf32>
    %c0_14 = arith.constant 0 : index
    %c0_15 = arith.constant 0 : index
    %16 = vector.load %arg3[%c0_14, %c0_15] : memref<2x3xf32, #tpu.memory_space<vmem>>, vector<2x3xf32>
    %17 = arith.truncf %16 : vector<2x3xf32> to vector<2x3xbf16>
    %c0_16 = arith.constant 0 : index
    %c0_17 = arith.constant 0 : index
    %18 = vector.load %arg8[%c0_16, %c0_17] : memref<3x64xbf16, #tpu.memory_space<vmem>>, vector<3x64xbf16>
    %cst_18 = arith.constant dense<0.000000e+00> : vector<2x64xf32>
    %19 = tpu.matmul %17, %18, %cst_18 {dimension_numbers = #tpu.dot_dimension_numbers<[1], [0], [0], [1], [0, 0, 1, 1], [], []>} : vector<2x3xbf16>, vector<3x64xbf16>, vector<2x64xf32> -> vector<2x64xf32>
    %20 = arith.addf %15, %19 : vector<2x64xf32>
    %c0_19 = arith.constant 0 : index
    %c0_20 = arith.constant 0 : index
    %21 = vector.load %arg9[%c0_19, %c0_20] : memref<1x64xf32, #tpu.memory_space<vmem>>, vector<1x64xf32>
    %22 = vector.broadcast %21 : vector<1x64xf32> to vector<2x64xf32>
    %23 = arith.addf %20, %22 : vector<2x64xf32>
    %cst_21 = arith.constant 0.000000e+00 : f32
    %24 = vector.broadcast %cst_21 : f32 to vector<2x64xf32>
    %25 = arith.maximumf %23, %24 : vector<2x64xf32>
    %26 = arith.truncf %25 : vector<2x64xf32> to vector<2x64xbf16>
    %c0_22 = arith.constant 0 : index
    %c0_23 = arith.constant 0 : index
    %27 = vector.load %arg10[%c0_22, %c0_23] : memref<64x128xbf16, #tpu.memory_space<vmem>>, vector<64x128xbf16>
    %cst_24 = arith.constant dense<0.000000e+00> : vector<2x128xf32>
    %28 = tpu.matmul %26, %27, %cst_24 {dimension_numbers = #tpu.dot_dimension_numbers<[1], [0], [0], [1], [0, 0, 1, 1], [], []>} : vector<2x64xbf16>, vector<64x128xbf16>, vector<2x128xf32> -> vector<2x128xf32>
    %c0_25 = arith.constant 0 : index
    %c0_26 = arith.constant 0 : index
    %29 = vector.load %arg11[%c0_25, %c0_26] : memref<1x128xf32, #tpu.memory_space<vmem>>, vector<1x128xf32>
    %30 = vector.broadcast %29 : vector<1x128xf32> to vector<2x128xf32>
    %31 = arith.addf %28, %30 : vector<2x128xf32>
    %c0_27 = arith.constant 0 : index
    %c0_28 = arith.constant 0 : index
    %32 = vector.load %arg12[%c0_27, %c0_28] : memref<2x128xf32, #tpu.memory_space<vmem>>, vector<2x128xf32>
    tpu.vector_store %arg12[%c0_27, %c0_28], %31 {strides = array<i32>} : memref<2x128xf32, #tpu.memory_space<vmem>>, vector<2x128xf32>,
    return
  }
  func.func @transform_0(%arg0: i32) -> (i32, i32) {
    %c0_i32 = arith.constant 0 : i32
    %c0_i32_0 = arith.constant 0 : i32
    return %arg0, %c0_i32 : i32, i32
  }
  func.func @transform_1(%arg0: i32) -> (i32, i32) {
    %c0_i32 = arith.constant 0 : i32
    %c0_i32_0 = arith.constant 0 : i32
    return %arg0, %c0_i32 : i32, i32
  }
  func.func @transform_2(%arg0: i32) -> (i32, i32) {
    %c0_i32 = arith.constant 0 : i32
    %c0_i32_0 = arith.constant 0 : i32
    return %arg0, %c0_i32 : i32, i32
  }
  func.func @transform_3(%arg0: i32) -> (i32, i32) {
    %c0_i32 = arith.constant 0 : i32
    %c0_i32_0 = arith.constant 0 : i32
    %c0_i32_1 = arith.constant 0 : i32
    return %c0_i32, %c0_i32_0 : i32, i32
  }
  func.func @transform_4(%arg0: i32) -> (i32, i32) {
    %c0_i32 = arith.constant 0 : i32
    %c0_i32_0 = arith.constant 0 : i32
    %c0_i32_1 = arith.constant 0 : i32
    return %c0_i32, %c0_i32_0 : i32, i32
  }
  func.func @transform_5(%arg0: i32) -> (i32, i32) {
    %c0_i32 = arith.constant 0 : i32
    %c0_i32_0 = arith.constant 0 : i32
    %c0_i32_1 = arith.constant 0 : i32
    return %c0_i32, %c0_i32_0 : i32, i32
  }
  func.func @transform_6(%arg0: i32) -> (i32, i32) {
    %c0_i32 = arith.constant 0 : i32
    %c0_i32_0 = arith.constant 0 : i32
    %c0_i32_1 = arith.constant 0 : i32
    return %c0_i32, %c0_i32_0 : i32, i32
  }
  func.func @transform_7(%arg0: i32) -> (i32, i32) {
    %c0_i32 = arith.constant 0 : i32
    %c0_i32_0 = arith.constant 0 : i32
    %c0_i32_1 = arith.constant 0 : i32
    return %c0_i32, %c0_i32_0 : i32, i32
  }
  func.func @transform_8(%arg0: i32) -> (i32, i32) {
    %c0_i32 = arith.constant 0 : i32
    %c0_i32_0 = arith.constant 0 : i32
    %c0_i32_1 = arith.constant 0 : i32
    return %c0_i32, %c0_i32_0 : i32, i32
  }
  func.func @transform_9(%arg0: i32) -> (i32, i32) {
    %c0_i32 = arith.constant 0 : i32
    %c0_i32_0 = arith.constant 0 : i32
    %c0_i32_1 = arith.constant 0 : i32
    return %c0_i32, %c0_i32_0 : i32, i32
  }
  func.func @transform_10(%arg0: i32) -> (i32, i32) {
    %c0_i32 = arith.constant 0 : i32
    %c0_i32_0 = arith.constant 0 : i32
    %c0_i32_1 = arith.constant 0 : i32
    return %c0_i32, %c0_i32_0 : i32, i32
  }
  func.func @transform_11(%arg0: i32) -> (i32, i32) {
    %c0_i32 = arith.constant 0 : i32
    %c0_i32_0 = arith.constant 0 : i32
    return %arg0, %c0_i32 : i32, i32
  }
}

</mosaic_0001>

<bundles_post_ra>
// kernel: qfunc_forward.4
= control target key start
LH: loop header
LB: loop body
LE: loop exit
PB: predicated region body
PF: predicated region fallthrough
CT: control target
= control target key end

     0   :  { %v3207_v0 = vmov 0   ;;  %vm2343_vm0 = vcmask 125952   ;;  %s4470_s1 = inlined_call_operand.vmem [shape: bf16[256,16], index: 1, kind: input, shape index: {}]   ;;  %s4471_s0 = inlined_call_operand.vmem [shape: bf16[1152,256], index: 0, kind: input, shape index: {}]   ;;  %s4472_s2 = inlined_call_operand.vmem [shape: f32[1,16], index: 2, kind: input, shape index: {}]   ;;  %s4473_s3 = inlined_call_operand.vmem [shape: bf16[1152,16], index: 3, kind: output, shape index: {}]  }
   0x1   :  { %1014 = vmatprep.subr.bf16.mxu0 %v3207_v0  ;;  %2941 = vmatprep.subr.bf16.mxu1 %v3207_v0  ;;  %v2974_v1 = vld [vmem:[%s4470_s1] sm:$0xff]   ;;  %v2975_v2 = vld [vmem:[%s4470_s1 + $0x8] sm:$0xff]   ;;  %v2976_v3 = vld [vmem:[%s4470_s1 + $0x10] sm:$0xff]  }
   0x2   :  { %1015 = vmatpush1.bf16.msra.mxu0 %v2974_v1  ;;  %2957 = vmatpush1.bf16.msra.mxu1 %v2974_v1  ;;  %v2977_v4 = vld [vmem:[%s4470_s1 + $0x18] sm:$0xff]   ;;  %v2978_v5 = vld [vmem:[%s4470_s1 + $0x20] sm:$0xff]   ;;  %v2979_v7 = vld [vmem:[%s4470_s1 + $0x28] sm:$0xff]  }
   0x3   :  { %1016 = vmatprep.subr.bf16.mxu0 %v3207_v0  ;;  %2942 = vmatprep.subr.bf16.mxu1 %v3207_v0  ;;  %v2992_v6 = vld [vmem:[%s4471_s0 + $0x4] ss:$8 sps:$4 sm:$0xff]   ;;  %v2980_v9 = vld [vmem:[%s4470_s1 + $0x30] sm:$0xff]   ;;  %v2981_v10 = vld [vmem:[%s4470_s1 + $0x38] sm:$0xff]  }
   0x4   :  { %v2995_v8 = vld [vmem:[%s4471_s0 + $0x244] ss:$8 sps:$4 sm:$0xff]   ;;  %1046 = vmatprep.mubr.bf16.mxu0 %v2992_v6  ;;  %v2984_v13 = vld [vmem:[%s4470_s1 + $0x50] sm:$0xff]   ;;  %v2985_v14 = vld [vmem:[%s4470_s1 + $0x58] sm:$0xff]  }
   0x5   :  { %1334 = vmatprep.mubr.bf16.mxu1 %v2995_v8  ;;  %v2982_v11 = vld [vmem:[%s4470_s1 + $0x40] sm:$0xff]   ;;  %v2983_v12 = vld [vmem:[%s4470_s1 + $0x48] sm:$0xff]   ;;  %v2988_v17 = vld [vmem:[%s4470_s1 + $0x70] sm:$0xff]  }
   0x6   :  { %1017 = vmatpush1.bf16.msra.mxu0 %v2975_v2  ;;  %2958 = vmatpush1.bf16.msra.mxu1 %v2975_v2  ;;  %v2986_v15 = vld [vmem:[%s4470_s1 + $0x60] sm:$0xff]   ;;  %v2987_v16 = vld [vmem:[%s4470_s1 + $0x68] sm:$0xff]   ;;  %v2989_v18 = vld [vmem:[%s4470_s1 + $0x78] sm:$0xff]  }
   0x7   :  { %1018 = vmatprep.subr.bf16.mxu0 %v3207_v0  ;;  %2943 = vmatprep.subr.bf16.mxu1 %v3207_v0  ;;  %v2990_v19 = vld [vmem:[%s4471_s0] ss:$8 sps:$4 sm:$0xff]   ;;  %v2996_v21 = vld [vmem:[%s4471_s0 + $0x14] ss:$8 sps:$4 sm:$0xff]   ;;  %v3000_v23 = vld [vmem:[%s4471_s0 + $0x10] ss:$8 sps:$4 sm:$0xff]  }
   0x8   :  { %v2993_v20 = vld [vmem:[%s4471_s0 + $0x240] ss:$8 sps:$4 sm:$0xff]   ;;  %v2998_v22 = vld [vmem:[%s4471_s0 + $0x254] ss:$8 sps:$4 sm:$0xff]   ;;  %v3001_v24 = vld [vmem:[%s4471_s0 + $0x250] ss:$8 sps:$4 sm:$0xff]  }
   0x9   :  { %v3002_v25 = vld [vmem:[%s4471_s0 + $0x24] ss:$8 sps:$4 sm:$0xff]   ;;  %v3006_v27 = vld [vmem:[%s4471_s0 + $0x20] ss:$8 sps:$4 sm:$0xff]   ;;  %v3008_v29 = vld [vmem:[%s4471_s0 + $0x34] ss:$8 sps:$4 sm:$0xff]  }
   0xa   :  { %1019 = vmatpush1.bf16.msra.mxu0 %v2976_v3  ;;  %2959 = vmatpush1.bf16.msra.mxu1 %v2976_v3  ;;  %v3004_v26 = vld [vmem:[%s4471_s0 + $0x264] ss:$8 sps:$4 sm:$0xff]   ;;  %v3007_v28 = vld [vmem:[%s4471_s0 + $0x260] ss:$8 sps:$4 sm:$0xff]   ;;  %v3010_v30 = vld [vmem:[%s4471_s0 + $0x274] ss:$8 sps:$4 sm:$0xff]  }
   0xb   :  { %1020 = vmatprep.subr.bf16.mxu0 %v3207_v0  ;;  %2944 = vmatprep.subr.bf16.mxu1 %v3207_v0  ;;  %v3012_v31 = vld [vmem:[%s4471_s0 + $0x30] ss:$8 sps:$4 sm:$0xff]   ;;  %v3014_v33 = vld [vmem:[%s4471_s0 + $0x44] ss:$8 sps:$4 sm:$0xff]   ;;  %v3018_v35 = vld [vmem:[%s4471_s0 + $0x40] ss:$8 sps:$4 sm:$0xff]  }
   0xc   :  { %v3013_v32 = vld [vmem:[%s4471_s0 + $0x270] ss:$8 sps:$4 sm:$0xff]   ;;  %v3016_v34 = vld [vmem:[%s4471_s0 + $0x284] ss:$8 sps:$4 sm:$0xff]   ;;  %v3019_v36 = vld [vmem:[%s4471_s0 + $0x280] ss:$8 sps:$4 sm:$0xff]  }
   0xd   :  { %v3020_v37 = vld [vmem:[%s4471_s0 + $0x54] ss:$8 sps:$4 sm:$0xff]   ;;  %v3024_v39 = vld [vmem:[%s4471_s0 + $0x50] ss:$8 sps:$4 sm:$0xff]   ;;  %v3026_v41 = vld [vmem:[%s4471_s0 + $0x64] ss:$8 sps:$4 sm:$0xff]  }
   0xe   :  { %1021 = vmatpush1.bf16.msra.mxu0 %v2977_v4  ;;  %2960 = vmatpush1.bf16.msra.mxu1 %v2977_v4  ;;  %v3022_v38 = vld [vmem:[%s4471_s0 + $0x294] ss:$8 sps:$4 sm:$0xff]   ;;  %v3025_v40 = vld [vmem:[%s4471_s0 + $0x290] ss:$8 sps:$4 sm:$0xff]   ;;  %v3028_v42 = vld [vmem:[%s4471_s0 + $0x2a4] ss:$8 sps:$4 sm:$0xff]  }
   0xf   :  { %1022 = vmatprep.subr.bf16.mxu0 %v3207_v0  ;;  %2945 = vmatprep.subr.bf16.mxu1 %v3207_v0  ;;  %v3030_v43 = vld [vmem:[%s4471_s0 + $0x60] ss:$8 sps:$4 sm:$0xff]   ;;  %v3032_v45 = vld [vmem:[%s4471_s0 + $0x74] ss:$8 sps:$4 sm:$0xff]   ;;  %v3036_v47 = vld [vmem:[%s4471_s0 + $0x70] ss:$8 sps:$4 sm:$0xff]  }
  0x10   :  { %v3031_v44 = vld [vmem:[%s4471_s0 + $0x2a0] ss:$8 sps:$4 sm:$0xff]   ;;  %v3034_v46 = vld [vmem:[%s4471_s0 + $0x2b4] ss:$8 sps:$4 sm:$0xff]   ;;  %v3037_v48 = vld [vmem:[%s4471_s0 + $0x2b0] ss:$8 sps:$4 sm:$0xff]  }
  0x11   :  { %v3038_v49 = vld [vmem:[%s4471_s0 + $0x84] ss:$8 sps:$4 sm:$0xff]   ;;  %v3042_v51 = vld [vmem:[%s4471_s0 + $0x80] ss:$8 sps:$4 sm:$0xff]   ;;  %v3044_v53 = vld [vmem:[%s4471_s0 + $0x94] ss:$8 sps:$4 sm:$0xff]  }
  0x12   :  { %1023 = vmatpush1.bf16.msra.mxu0 %v2978_v5  ;;  %2961 = vmatpush1.bf16.msra.mxu1 %v2978_v5  ;;  %v3040_v50 = vld [vmem:[%s4471_s0 + $0x2c4] ss:$8 sps:$4 sm:$0xff]   ;;  %v3043_v52 = vld [vmem:[%s4471_s0 + $0x2c0] ss:$8 sps:$4 sm:$0xff]   ;;  %v3046_v54 = vld [vmem:[%s4471_s0 + $0x2d4] ss:$8 sps:$4 sm:$0xff]  }
  0x13   :  { %1024 = vmatprep.subr.bf16.mxu0 %v3207_v0  ;;  %2946 = vmatprep.subr.bf16.mxu1 %v3207_v0  ;;  %v3048_v55 = vld [vmem:[%s4471_s0 + $0x90] ss:$8 sps:$4 sm:$0xff]   ;;  %v3050_v57 = vld [vmem:[%s4471_s0 + $0xa4] ss:$8 sps:$4 sm:$0xff]   ;;  %v3054_v59 = vld [vmem:[%s4471_s0 + $0xa0] ss:$8 sps:$4 sm:$0xff]  }
  0x14   :  { %v3049_v56 = vld [vmem:[%s4471_s0 + $0x2d0] ss:$8 sps:$4 sm:$0xff]   ;;  %v3052_v58 = vld [vmem:[%s4471_s0 + $0x2e4] ss:$8 sps:$4 sm:$0xff]   ;;  %v3055_v60 = vld [vmem:[%s4471_s0 + $0x2e0] ss:$8 sps:$4 sm:$0xff]  }
  0x15   :  { %v3056_v61 = vld [vmem:[%s4471_s0 + $0xb4] ss:$8 sps:$4 sm:$0xff]   ;;  %v3060_v63 = vld [vmem:[%s4471_s0 + $0xb0] ss:$8 sps:$4 sm:$0xff]   ;;  %v3062_v1 = vld [vmem:[%s4471_s0 + $0xc4] ss:$8 sps:$4 sm:$0xff]  }
  0x16   :  { %1025 = vmatpush1.bf16.msra.mxu0 %v2979_v7  ;;  %2962 = vmatpush1.bf16.msra.mxu1 %v2979_v7  ;;  %v3058_v62 = vld [vmem:[%s4471_s0 + $0x2f4] ss:$8 sps:$4 sm:$0xff]   ;;  %v3064_v2 = vld [vmem:[%s4471_s0 + $0x304] ss:$8 sps:$4 sm:$0xff]   ;;  %v3066_v3 = vld [vmem:[%s4471_s0 + $0xc0] ss:$8 sps:$4 sm:$0xff]  }
  0x17   :  { %1026 = vmatprep.subr.bf16.mxu0 %v3207_v0  ;;  %2947 = vmatprep.subr.bf16.mxu1 %v3207_v0  ;;  %v3067_v4 = vld [vmem:[%s4471_s0 + $0x300] ss:$8 sps:$4 sm:$0xff]   ;;  %v3068_v5 = vld [vmem:[%s4471_s0 + $0xd4] ss:$8 sps:$4 sm:$0xff]   ;;  %v3072_v7 = vld [vmem:[%s4471_s0 + $0xd0] ss:$8 sps:$4 sm:$0xff]  }
  0x18   :  { %v3070_v6 = vld [vmem:[%s4471_s0 + $0x314] ss:$8 sps:$4 sm:$0xff]   ;;  %v3073_v8 = vld [vmem:[%s4471_s0 + $0x310] ss:$8 sps:$4 sm:$0xff]  }
  0x1a   :  { %1027 = vmatpush1.bf16.msra.mxu0 %v2980_v9  ;;  %2963 = vmatpush1.bf16.msra.mxu1 %v2980_v9  ;;  %v3074_v9 = vld [vmem:[%s4471_s0 + $0xe4] ss:$8 sps:$4 sm:$0xff]  }
  0x1b   :  { %1028 = vmatprep.subr.bf16.mxu0 %v3207_v0  ;;  %2948 = vmatprep.subr.bf16.mxu1 %v3207_v0 }
  0x1e   :  { %1029 = vmatpush1.bf16.msra.mxu0 %v2981_v10  ;;  %2964 = vmatpush1.bf16.msra.mxu1 %v2981_v10  ;;  %v3076_v10 = vld [vmem:[%s4471_s0 + $0x324] ss:$8 sps:$4 sm:$0xff]  }
  0x1f   :  { %1030 = vmatprep.subr.bf16.mxu0 %v3207_v0  ;;  %2949 = vmatprep.subr.bf16.mxu1 %v3207_v0 }
  0x22   :  { %1031 = vmatpush1.bf16.msra.mxu0 %v2982_v11  ;;  %2965 = vmatpush1.bf16.msra.mxu1 %v2982_v11  ;;  %v3078_v11 = vld [vmem:[%s4471_s0 + $0xe0] ss:$8 sps:$4 sm:$0xff]  }
  0x23   :  { %1032 = vmatprep.subr.bf16.mxu0 %v3207_v0  ;;  %2950 = vmatprep.subr.bf16.mxu1 %v3207_v0 }
  0x26   :  { %1033 = vmatpush1.bf16.msra.mxu0 %v2983_v12  ;;  %2966 = vmatpush1.bf16.msra.mxu1 %v2983_v12  ;;  %v3079_v12 = vld [vmem:[%s4471_s0 + $0x320] ss:$8 sps:$4 sm:$0xff]  }
  0x27   :  { %1034 = vmatprep.subr.bf16.mxu0 %v3207_v0  ;;  %2951 = vmatprep.subr.bf16.mxu1 %v3207_v0 }
  0x2a   :  { %1035 = vmatpush1.bf16.msra.mxu0 %v2984_v13  ;;  %2967 = vmatpush1.bf16.msra.mxu1 %v2984_v13  ;;  %v3080_v13 = vld [vmem:[%s4471_s0 + $0xf4] ss:$8 sps:$4 sm:$0xff]  }
  0x2b   :  { %1036 = vmatprep.subr.bf16.mxu0 %v3207_v0  ;;  %2952 = vmatprep.subr.bf16.mxu1 %v3207_v0 }
  0x2e   :  { %1037 = vmatpush1.bf16.msra.mxu0 %v2985_v14  ;;  %2968 = vmatpush1.bf16.msra.mxu1 %v2985_v14  ;;  %v3082_v14 = vld [vmem:[%s4471_s0 + $0x334] ss:$8 sps:$4 sm:$0xff]  }
  0x2f   :  { %1038 = vmatprep.subr.bf16.mxu0 %v3207_v0  ;;  %2953 = vmatprep.subr.bf16.mxu1 %v3207_v0 }
  0x32   :  { %1039 = vmatpush1.bf16.msra.mxu0 %v2986_v15  ;;  %2969 = vmatpush1.bf16.msra.mxu1 %v2986_v15  ;;  %v3084_v15 = vld [vmem:[%s4471_s0 + $0xf0] ss:$8 sps:$4 sm:$0xff]  }
  0x33   :  { %1040 = vmatprep.subr.bf16.mxu0 %v3207_v0  ;;  %2954 = vmatprep.subr.bf16.mxu1 %v3207_v0 }
  0x36   :  { %1041 = vmatpush1.bf16.msra.mxu0 %v2987_v16  ;;  %2970 = vmatpush1.bf16.msra.mxu1 %v2987_v16  ;;  %v3085_v16 = vld [vmem:[%s4471_s0 + $0x330] ss:$8 sps:$4 sm:$0xff]  }
  0x37   :  { %1042 = vmatprep.subr.bf16.mxu0 %v3207_v0  ;;  %2955 = vmatprep.subr.bf16.mxu1 %v3207_v0 }
  0x3a   :  { %1043 = vmatpush1.bf16.msra.mxu0 %v2988_v17  ;;  %2971 = vmatpush1.bf16.msra.mxu1 %v2988_v17  ;;  %v3086_v17 = vld [vmem:[%s4471_s0 + $0x104] ss:$8 sps:$4 sm:$0xff]  }
  0x3b   :  { %1044 = vmatprep.subr.bf16.mxu0 %v3207_v0  ;;  %2956 = vmatprep.subr.bf16.mxu1 %v3207_v0  ;;  %v3061_v0 = vld [vmem:[%s4471_s0 + $0x2f0] ss:$8 sps:$4 sm:$0xff]  }
  0x3e   :  { %1045 = vmatpush1.bf16.msra.mxu0 %v2989_v18  ;;  %2972 = vmatpush1.bf16.msra.mxu1 %v2989_v18  ;;  %v3088_v18 = vld [vmem:[%s4471_s0 + $0x344] ss:$8 sps:$4 sm:$0xff]  }
  0x41   :  { %1047 = vmatmul.mubr.bf16.vlgmr.msra.gmra.mrb[0].mxu0 %v2990_v19  ;;  %1335 = vmatmul.mubr.bf16.vlgmr.msra.gmra.mrb[0].mxu1 %v2993_v20  ;;  %v3090_v19 = vld [vmem:[%s4471_s0 + $0x100] ss:$8 sps:$4 sm:$0xff]  }
  0x42   :  { %1054 = vmatprep.mubr.bf16.mxu0 %v2996_v21  ;;  %1342 = vmatprep.mubr.bf16.mxu1 %v2998_v22  ;;  %v3091_v20 = vld [vmem:[%s4471_s0 + $0x340] ss:$8 sps:$4 sm:$0xff]   ;;  %v3092_v21 = vld [vmem:[%s4471_s0 + $0x114] ss:$8 sps:$4 sm:$0xff]  }
  0x43   :  { %v3094_v22 = vld [vmem:[%s4471_s0 + $0x354] ss:$8 sps:$4 sm:$0xff]  }
  0x49   :  { %1055 = vmatmul.mubr.bf16.gmra.mrb[4].mxu0 %v3000_v23  ;;  %1343 = vmatmul.mubr.bf16.gmra.mrb[4].mxu1 %v3001_v24  ;;  %v3096_v23 = vld [vmem:[%s4471_s0 + $0x110] ss:$8 sps:$4 sm:$0xff]  }
  0x4a   :  { %1062 = vmatprep.mubr.bf16.mxu0 %v3002_v25  ;;  %1350 = vmatprep.mubr.bf16.mxu1 %v3004_v26  ;;  %v3097_v24 = vld [vmem:[%s4471_s0 + $0x350] ss:$8 sps:$4 sm:$0xff]   ;;  %v3098_v25 = vld [vmem:[%s4471_s0 + $0x124] ss:$8 sps:$4 sm:$0xff]  }
  0x4b   :  { %v3100_v26 = vld [vmem:[%s4471_s0 + $0x364] ss:$8 sps:$4 sm:$0xff]  }
  0x51   :  { %1063 = vmatmul.mubr.bf16.gmra.mrb[8].mxu0 %v3006_v27  ;;  %1351 = vmatmul.mubr.bf16.gmra.mrb[8].mxu1 %v3007_v28  ;;  %v3102_v27 = vld [vmem:[%s4471_s0 + $0x120] ss:$8 sps:$4 sm:$0xff]  }
  0x52   :  { %1070 = vmatprep.mubr.bf16.mxu0 %v3008_v29  ;;  %1358 = vmatprep.mubr.bf16.mxu1 %v3010_v30  ;;  %v3103_v28 = vld [vmem:[%s4471_s0 + $0x360] ss:$8 sps:$4 sm:$0xff]   ;;  %v3104_v29 = vld [vmem:[%s4471_s0 + $0x134] ss:$8 sps:$4 sm:$0xff]  }
  0x53   :  { %v3106_v30 = vld [vmem:[%s4471_s0 + $0x374] ss:$8 sps:$4 sm:$0xff]  }
  0x59   :  { %1071 = vmatmul.mubr.bf16.gmra.mrb[12].mxu0 %v3012_v31  ;;  %1359 = vmatmul.mubr.bf16.gmra.mrb[12].mxu1 %v3013_v32  ;;  %v3108_v31 = vld [vmem:[%s4471_s0 + $0x130] ss:$8 sps:$4 sm:$0xff]  }
  0x5a   :  { %1078 = vmatprep.mubr.bf16.mxu0 %v3014_v33  ;;  %1366 = vmatprep.mubr.bf16.mxu1 %v3016_v34  ;;  %v3109_v32 = vld [vmem:[%s4471_s0 + $0x370] ss:$8 sps:$4 sm:$0xff]   ;;  %v3110_v33 = vld [vmem:[%s4471_s0 + $0x144] ss:$8 sps:$4 sm:$0xff]  }
  0x5b   :  { %v3112_v34 = vld [vmem:[%s4471_s0 + $0x384] ss:$8 sps:$4 sm:$0xff]  }
  0x61   :  { %1079 = vmatmul.mubr.bf16.gmra.mrb[16].mxu0 %v3018_v35  ;;  %1367 = vmatmul.mubr.bf16.gmra.mrb[16].mxu1 %v3019_v36  ;;  %v3114_v35 = vld [vmem:[%s4471_s0 + $0x140] ss:$8 sps:$4 sm:$0xff]  }
  0x62   :  { %1086 = vmatprep.mubr.bf16.mxu0 %v3020_v37  ;;  %1374 = vmatprep.mubr.bf16.mxu1 %v3022_v38  ;;  %v3115_v36 = vld [vmem:[%s4471_s0 + $0x380] ss:$8 sps:$4 sm:$0xff]   ;;  %v3116_v37 = vld [vmem:[%s4471_s0 + $0x154] ss:$8 sps:$4 sm:$0xff]  }
  0x63   :  { %v3118_v38 = vld [vmem:[%s4471_s0 + $0x394] ss:$8 sps:$4 sm:$0xff]  }
  0x69   :  { %1087 = vmatmul.mubr.bf16.gmra.mrb[20].mxu0 %v3024_v39  ;;  %1375 = vmatmul.mubr.bf16.gmra.mrb[20].mxu1 %v3025_v40  ;;  %v3120_v39 = vld [vmem:[%s4471_s0 + $0x150] ss:$8 sps:$4 sm:$0xff]  }
  0x6a   :  { %1094 = vmatprep.mubr.bf16.mxu0 %v3026_v41  ;;  %1382 = vmatprep.mubr.bf16.mxu1 %v3028_v42  ;;  %v3121_v40 = vld [vmem:[%s4471_s0 + $0x390] ss:$8 sps:$4 sm:$0xff]   ;;  %v3122_v41 = vld [vmem:[%s4471_s0 + $0x164] ss:$8 sps:$4 sm:$0xff]  }
  0x6b   :  { %v3124_v42 = vld [vmem:[%s4471_s0 + $0x3a4] ss:$8 sps:$4 sm:$0xff]  }
  0x71   :  { %1095 = vmatmul.mubr.bf16.gmra.mrb[24].mxu0 %v3030_v43  ;;  %1383 = vmatmul.mubr.bf16.gmra.mrb[24].mxu1 %v3031_v44  ;;  %v3126_v43 = vld [vmem:[%s4471_s0 + $0x160] ss:$8 sps:$4 sm:$0xff]  }
  0x72   :  { %1102 = vmatprep.mubr.bf16.mxu0 %v3032_v45  ;;  %1390 = vmatprep.mubr.bf16.mxu1 %v3034_v46  ;;  %v3127_v44 = vld [vmem:[%s4471_s0 + $0x3a0] ss:$8 sps:$4 sm:$0xff]   ;;  %v3128_v45 = vld [vmem:[%s4471_s0 + $0x174] ss:$8 sps:$4 sm:$0xff]  }
  0x73   :  { %v3130_v46 = vld [vmem:[%s4471_s0 + $0x3b4] ss:$8 sps:$4 sm:$0xff]  }
  0x79   :  { %1103 = vmatmul.mubr.bf16.gmra.mrb[28].mxu0 %v3036_v47  ;;  %1391 = vmatmul.mubr.bf16.gmra.mrb[28].mxu1 %v3037_v48  ;;  %v3132_v47 = vld [vmem:[%s4471_s0 + $0x170] ss:$8 sps:$4 sm:$0xff]  }
  0x7a   :  { %1110 = vmatprep.mubr.bf16.mxu0 %v3038_v49  ;;  %1398 = vmatprep.mubr.bf16.mxu1 %v3040_v50  ;;  %v3133_v48 = vld [vmem:[%s4471_s0 + $0x3b0] ss:$8 sps:$4 sm:$0xff]   ;;  %v3134_v49 = vld [vmem:[%s4471_s0 + $0x184] ss:$8 sps:$4 sm:$0xff]  }
  0x7b   :  { %v3136_v50 = vld [vmem:[%s4471_s0 + $0x3c4] ss:$8 sps:$4 sm:$0xff]  }
  0x81   :  { %1111 = vmatmul.mubr.bf16.gmra.mrb[32].mxu0 %v3042_v51  ;;  %1399 = vmatmul.mubr.bf16.gmra.mrb[32].mxu1 %v3043_v52  ;;  %v3138_v51 = vld [vmem:[%s4471_s0 + $0x180] ss:$8 sps:$4 sm:$0xff]  }
  0x82   :  { %1118 = vmatprep.mubr.bf16.mxu0 %v3044_v53  ;;  %1406 = vmatprep.mubr.bf16.mxu1 %v3046_v54  ;;  %v3139_v52 = vld [vmem:[%s4471_s0 + $0x3c0] ss:$8 sps:$4 sm:$0xff]   ;;  %v3140_v53 = vld [vmem:[%s4471_s0 + $0x194] ss:$8 sps:$4 sm:$0xff]  }
  0x83   :  { %v3142_v54 = vld [vmem:[%s4471_s0 + $0x3d4] ss:$8 sps:$4 sm:$0xff]  }
  0x89   :  { %1119 = vmatmul.mubr.bf16.gmra.mrb[36].mxu0 %v3048_v55  ;;  %1407 = vmatmul.mubr.bf16.gmra.mrb[36].mxu1 %v3049_v56  ;;  %v3144_v55 = vld [vmem:[%s4471_s0 + $0x190] ss:$8 sps:$4 sm:$0xff]  }
  0x8a   :  { %1126 = vmatprep.mubr.bf16.mxu0 %v3050_v57  ;;  %1414 = vmatprep.mubr.bf16.mxu1 %v3052_v58  ;;  %v3145_v56 = vld [vmem:[%s4471_s0 + $0x3d0] ss:$8 sps:$4 sm:$0xff]   ;;  %v3146_v57 = vld [vmem:[%s4471_s0 + $0x1a4] ss:$8 sps:$4 sm:$0xff]  }
  0x8b   :  { %v3148_v58 = vld [vmem:[%s4471_s0 + $0x3e4] ss:$8 sps:$4 sm:$0xff]  }
  0x91   :  { %1127 = vmatmul.mubr.bf16.gmra.mrb[40].mxu0 %v3054_v59  ;;  %1415 = vmatmul.mubr.bf16.gmra.mrb[40].mxu1 %v3055_v60  ;;  %v3150_v59 = vld [vmem:[%s4471_s0 + $0x1a0] ss:$8 sps:$4 sm:$0xff]  }
  0x92   :  { %1134 = vmatprep.mubr.bf16.mxu0 %v3056_v61  ;;  %1422 = vmatprep.mubr.bf16.mxu1 %v3058_v62  ;;  %v3151_v60 = vld [vmem:[%s4471_s0 + $0x3e0] ss:$8 sps:$4 sm:$0xff]   ;;  %v3152_v61 = vld [vmem:[%s4471_s0 + $0x1b4] ss:$8 sps:$4 sm:$0xff]  }
  0x93   :  { %v3154_v62 = vld [vmem:[%s4471_s0 + $0x3f4] ss:$8 sps:$4 sm:$0xff]  }
  0x99   :  { %1135 = vmatmul.mubr.bf16.gmra.mrb[44].mxu0 %v3060_v63  ;;  %1423 = vmatmul.mubr.bf16.gmra.mrb[44].mxu1 %v3061_v0  ;;  %v3641_v63 = vld [vmem:[%s4472_s2] ss:$0 sm:$0xff] }
  0x9a   :  { %1142 = vmatprep.mubr.bf16.mxu0 %v3062_v1  ;;  %1430 = vmatprep.mubr.bf16.mxu1 %v3064_v2 }
  0xa1   :  { %1143 = vmatmul.mubr.bf16.gmra.mrb[48].mxu0 %v3066_v3  ;;  %1431 = vmatmul.mubr.bf16.gmra.mrb[48].mxu1 %v3067_v4 }
  0xa2   :  { %1150 = vmatprep.mubr.bf16.mxu0 %v3068_v5  ;;  %1438 = vmatprep.mubr.bf16.mxu1 %v3070_v6  ;;  %v3156_v6 = vld [vmem:[%s4471_s0 + $0x1b0] ss:$8 sps:$4 sm:$0xff]  }
  0xa9   :  { %1151 = vmatmul.mubr.bf16.gmra.mrb[52].mxu0 %v3072_v7  ;;  %1439 = vmatmul.mubr.bf16.gmra.mrb[52].mxu1 %v3073_v8  ;;  %v3157_v7 = vld [vmem:[%s4471_s0 + $0x3f0] ss:$8 sps:$4 sm:$0xff]  }
  0xaa   :  { %1158 = vmatprep.mubr.bf16.mxu0 %v3074_v9  ;;  %1446 = vmatprep.mubr.bf16.mxu1 %v3076_v10  ;;  %v3158_v10 = vld [vmem:[%s4471_s0 + $0x1c4] ss:$8 sps:$4 sm:$0xff]  }
  0xb1   :  { %1159 = vmatmul.mubr.bf16.gmra.mrb[56].mxu0 %v3078_v11  ;;  %1447 = vmatmul.mubr.bf16.gmra.mrb[56].mxu1 %v3079_v12  ;;  %v3160_v11 = vld [vmem:[%s4471_s0 + $0x404] ss:$8 sps:$4 sm:$0xff]  }
  0xb2   :  { %1166 = vmatprep.mubr.bf16.mxu0 %v3080_v13  ;;  %1454 = vmatprep.mubr.bf16.mxu1 %v3082_v14 }
  0xb9   :  { %1167 = vmatmul.mubr.bf16.gmra.mrb[60].mxu0 %v3084_v15  ;;  %1455 = vmatmul.mubr.bf16.gmra.mrb[60].mxu1 %v3085_v16 }
  0xba   :  { %1174 = vmatprep.mubr.bf16.mxu0 %v3086_v17  ;;  %1462 = vmatprep.mubr.bf16.mxu1 %v3088_v18 }
  0xc1   :  { %1175 = vmatmul.mubr.bf16.gmra.mrb[64].mxu0 %v3090_v19  ;;  %1463 = vmatmul.mubr.bf16.gmra.mrb[64].mxu1 %v3091_v20 }
  0xc2   :  { %1182 = vmatprep.mubr.bf16.mxu0 %v3092_v21  ;;  %1470 = vmatprep.mubr.bf16.mxu1 %v3094_v22 }
  0xc9   :  { %1183 = vmatmul.mubr.bf16.gmra.mrb[68].mxu0 %v3096_v23  ;;  %1471 = vmatmul.mubr.bf16.gmra.mrb[68].mxu1 %v3097_v24 }
  0xca   :  { %1190 = vmatprep.mubr.bf16.mxu0 %v3098_v25  ;;  %1478 = vmatprep.mubr.bf16.mxu1 %v3100_v26 }
  0xd1   :  { %1191 = vmatmul.mubr.bf16.gmra.mrb[72].mxu0 %v3102_v27  ;;  %1479 = vmatmul.mubr.bf16.gmra.mrb[72].mxu1 %v3103_v28 }
  0xd2   :  { %1198 = vmatprep.mubr.bf16.mxu0 %v3104_v29  ;;  %1486 = vmatprep.mubr.bf16.mxu1 %v3106_v30  ;;  %v3162_v30 = vld [vmem:[%s4471_s0 + $0x1c0] ss:$8 sps:$4 sm:$0xff]  }
  0xd9   :  { %1199 = vmatmul.mubr.bf16.gmra.mrb[76].mxu0 %v3108_v31  ;;  %1487 = vmatmul.mubr.bf16.gmra.mrb[76].mxu1 %v3109_v32  ;;  %v3163_v31 = vld [vmem:[%s4471_s0 + $0x400] ss:$8 sps:$4 sm:$0xff]  }
  0xda   :  { %1206 = vmatprep.mubr.bf16.mxu0 %v3110_v33  ;;  %1494 = vmatprep.mubr.bf16.mxu1 %v3112_v34  ;;  %v3164_v34 = vld [vmem:[%s4471_s0 + $0x1d4] ss:$8 sps:$4 sm:$0xff]  }
  0xe1   :  { %1207 = vmatmul.mubr.bf16.gmra.mrb[80].mxu0 %v3114_v35  ;;  %1495 = vmatmul.mubr.bf16.gmra.mrb[80].mxu1 %v3115_v36  ;;  %v3166_v35 = vld [vmem:[%s4471_s0 + $0x414] ss:$8 sps:$4 sm:$0xff]  }
  0xe2   :  { %1214 = vmatprep.mubr.bf16.mxu0 %v3116_v37  ;;  %1502 = vmatprep.mubr.bf16.mxu1 %v3118_v38 }
  0xe9   :  { %1215 = vmatmul.mubr.bf16.gmra.mrb[84].mxu0 %v3120_v39  ;;  %1503 = vmatmul.mubr.bf16.gmra.mrb[84].mxu1 %v3121_v40 }
  0xea   :  { %1222 = vmatprep.mubr.bf16.mxu0 %v3122_v41  ;;  %1510 = vmatprep.mubr.bf16.mxu1 %v3124_v42 }
  0xf1   :  { %1223 = vmatmul.mubr.bf16.gmra.mrb[88].mxu0 %v3126_v43  ;;  %1511 = vmatmul.mubr.bf16.gmra.mrb[88].mxu1 %v3127_v44 }
  0xf2   :  { %1230 = vmatprep.mubr.bf16.mxu0 %v3128_v45  ;;  %1518 = vmatprep.mubr.bf16.mxu1 %v3130_v46 }
  0xf9   :  { %1231 = vmatmul.mubr.bf16.gmra.mrb[92].mxu0 %v3132_v47  ;;  %1519 = vmatmul.mubr.bf16.gmra.mrb[92].mxu1 %v3133_v48 }
  0xfa   :  { %1238 = vmatprep.mubr.bf16.mxu0 %v3134_v49  ;;  %1526 = vmatprep.mubr.bf16.mxu1 %v3136_v50 }
 0x101   :  { %1239 = vmatmul.mubr.bf16.gmra.mrb[96].mxu0 %v3138_v51  ;;  %1527 = vmatmul.mubr.bf16.gmra.mrb[96].mxu1 %v3139_v52 }
 0x102   :  { %1246 = vmatprep.mubr.bf16.mxu0 %v3140_v53  ;;  %1534 = vmatprep.mubr.bf16.mxu1 %v3142_v54  ;;  %v3168_v54 = vld [vmem:[%s4471_s0 + $0x1d0] ss:$8 sps:$4 sm:$0xff]  }
 0x109   :  { %1247 = vmatmul.mubr.bf16.gmra.mrb[100].mxu0 %v3144_v55  ;;  %1535 = vmatmul.mubr.bf16.gmra.mrb[100].mxu1 %v3145_v56  ;;  %v3169_v55 = vld [vmem:[%s4471_s0 + $0x410] ss:$8 sps:$4 sm:$0xff]  }
 0x10a   :  { %1254 = vmatprep.mubr.bf16.mxu0 %v3146_v57  ;;  %1542 = vmatprep.mubr.bf16.mxu1 %v3148_v58  ;;  %v3170_v58 = vld [vmem:[%s4471_s0 + $0x1e4] ss:$8 sps:$4 sm:$0xff]  }
 0x111   :  { %1255 = vmatmul.mubr.bf16.gmra.mrb[104].mxu0 %v3150_v59  ;;  %1543 = vmatmul.mubr.bf16.gmra.mrb[104].mxu1 %v3151_v60  ;;  %v3172_v59 = vld [vmem:[%s4471_s0 + $0x424] ss:$8 sps:$4 sm:$0xff]  }
 0x112   :  { %1262 = vmatprep.mubr.bf16.mxu0 %v3152_v61  ;;  %1550 = vmatprep.mubr.bf16.mxu1 %v3154_v62 }
 0x114   :  { %v1048_v0 = vpop.f32.mrb[0].mxu0  ;;  %v1336_v1 = vpop.f32.mrb[0].mxu1 }
 0x115   :  { %v1049_v2 = vadd.f32 %v3641_v63, %v1048_v0  ;;  %v1337_v3 = vadd.f32 %v3641_v63, %v1336_v1  ;;  %v1050_v4 = vpop.f32.mrb[1].mxu0  ;;  %v1338_v5 = vpop.f32.mrb[1].mxu1 }
 0x116   :  { %v1051_v8 = vpop.f32.mrb[2].mxu0  ;;  %v1339_v9 = vpop.f32.mrb[2].mxu1 }
 0x117   :  { %v1623_v12 = vmax.f32 %v1049_v2, 0.0  ;;  %v1695_v13 = vmax.f32 %v1337_v3, 0.0  ;;  %v1052_v14 = vadd.f32 %v3641_v63, %v1051_v8  ;;  %v1340_v15 = vadd.f32 %v3641_v63, %v1339_v9  ;;  %v1053_v16 = vpop.f32.mrb[3].mxu0  ;;  %v1341_v17 = vpop.f32.mrb[3].mxu1 }
 0x118   :  { %v3175_v16 = vld [vmem:[%s4471_s0 + $0x420] ss:$8 sps:$4 sm:$0xff]  }
 0x119   :  { %v2797_v18 = vpack.c.bf16 %v1623_v12, %v1623_v12  ;;  %v2869_v19 = vpack.c.bf16 %v1695_v13, %v1695_v13  ;;  %v1624_v20 = vmax.f32 %v1052_v14, 0.0  ;;  %v1696_v21 = vmax.f32 %v1340_v15, 0.0  ;;  %1263 = vmatmul.mubr.bf16.gmra.mrb[108].mxu0 %v3156_v6  ;;  %1551 = vmatmul.mubr.bf16.gmra.mrb[108].mxu1 %v3157_v7  ;;  %v3174_v15 = vld [vmem:[%s4471_s0 + $0x1e0] ss:$8 sps:$4 sm:$0xff]  }
 0x11a   :  { %1270 = vmatprep.mubr.bf16.mxu0 %v3158_v10  ;;  %1558 = vmatprep.mubr.bf16.mxu1 %v3160_v11 }
 0x11b   :  { %2344 = vst.msk [vmem:[%s4473_s3] sm:$0xf] %vm2343_vm0, %v2797_v18  ;;  %2416 = vst.msk [vmem:[%s4473_s3 + $0x120] sm:$0xf] %vm2343_vm0, %v2869_v19  ;;  %v2798_v22 = vpack.c.bf16 %v1624_v20, %v1624_v20  ;;  %v2870_v23 = vpack.c.bf16 %v1696_v21, %v1696_v21  ;;  %v3176_v19 = vld [vmem:[%s4471_s0 + $0x1f4] ss:$8 sps:$4 sm:$0xff]  }
 0x11c   :  { %v1056_v24 = vpop.f32.mrb[4].mxu0  ;;  %v1344_v25 = vpop.f32.mrb[4].mxu1  ;;  %v3178_v20 = vld [vmem:[%s4471_s0 + $0x434] ss:$8 sps:$4 sm:$0xff]  }
 0x11d   :  { %2345 = vst.msk [vmem:[%s4473_s3 + $0x4] sm:$0xf] %vm2343_vm0, %v2798_v22  ;;  %2417 = vst.msk [vmem:[%s4473_s3 + $0x124] sm:$0xf] %vm2343_vm0, %v2870_v23  ;;  %v1057_v26 = vadd.f32 %v3641_v63, %v1056_v24  ;;  %v1345_v27 = vadd.f32 %v3641_v63, %v1344_v25  ;;  %v1058_v28 = vpop.f32.mrb[5].mxu0  ;;  %v1346_v29 = vpop.f32.mrb[5].mxu1 }
 0x11e   :  { %v1059_v32 = vpop.f32.mrb[6].mxu0  ;;  %v1347_v33 = vpop.f32.mrb[6].mxu1 }
 0x11f   :  { %v1625_v36 = vmax.f32 %v1057_v26, 0.0  ;;  %v1697_v37 = vmax.f32 %v1345_v27, 0.0  ;;  %v1060_v38 = vadd.f32 %v3641_v63, %v1059_v32  ;;  %v1348_v39 = vadd.f32 %v3641_v63, %v1347_v33  ;;  %v1061_v40 = vpop.f32.mrb[7].mxu0  ;;  %v1349_v41 = vpop.f32.mrb[7].mxu1 }
 0x120   :  { %v3181_v40 = vld [vmem:[%s4471_s0 + $0x430] ss:$8 sps:$4 sm:$0xff]  }
 0x121   :  { %v2799_v42 = vpack.c.bf16 %v1625_v36, %v1625_v36  ;;  %v2871_v43 = vpack.c.bf16 %v1697_v37, %v1697_v37  ;;  %v1626_v44 = vmax.f32 %v1060_v38, 0.0  ;;  %v1698_v45 = vmax.f32 %v1348_v39, 0.0  ;;  %1271 = vmatmul.mubr.bf16.gmra.mrb[112].mxu0 %v3162_v30  ;;  %1559 = vmatmul.mubr.bf16.gmra.mrb[112].mxu1 %v3163_v31  ;;  %v3180_v39 = vld [vmem:[%s4471_s0 + $0x1f0] ss:$8 sps:$4 sm:$0xff]  }
 0x122   :  { %1278 = vmatprep.mubr.bf16.mxu0 %v3164_v34  ;;  %1566 = vmatprep.mubr.bf16.mxu1 %v3166_v35 }
 0x123   :  { %2346 = vst.msk [vmem:[%s4473_s3 + $0x8] sm:$0xf] %vm2343_vm0, %v2799_v42  ;;  %2418 = vst.msk [vmem:[%s4473_s3 + $0x128] sm:$0xf] %vm2343_vm0, %v2871_v43  ;;  %v2800_v46 = vpack.c.bf16 %v1626_v44, %v1626_v44  ;;  %v2872_v47 = vpack.c.bf16 %v1698_v45, %v1698_v45  ;;  %v3182_v43 = vld [vmem:[%s4471_s0 + $0x204] ss:$8 sps:$4 sm:$0xff]  }
 0x124   :  { %v1064_v48 = vpop.f32.mrb[8].mxu0  ;;  %v1352_v49 = vpop.f32.mrb[8].mxu1  ;;  %v3184_v44 = vld [vmem:[%s4471_s0 + $0x444] ss:$8 sps:$4 sm:$0xff]  }
 0x125   :  { %2347 = vst.msk [vmem:[%s4473_s3 + $0xc] sm:$0xf] %vm2343_vm0, %v2800_v46  ;;  %2419 = vst.msk [vmem:[%s4473_s3 + $0x12c] sm:$0xf] %vm2343_vm0, %v2872_v47  ;;  %v1065_v50 = vadd.f32 %v3641_v63, %v1064_v48  ;;  %v1353_v51 = vadd.f32 %v3641_v63, %v1352_v49  ;;  %v1066_v52 = vpop.f32.mrb[9].mxu0  ;;  %v1354_v53 = vpop.f32.mrb[9].mxu1 }
 0x126   :  { %v1067_v56 = vpop.f32.mrb[10].mxu0  ;;  %v1355_v57 = vpop.f32.mrb[10].mxu1 }
 0x127   :  { %v1627_v60 = vmax.f32 %v1065_v50, 0.0  ;;  %v1699_v61 = vmax.f32 %v1353_v51, 0.0  ;;  %v1068_v62 = vadd.f32 %v3641_v63, %v1067_v56  ;;  %v1356_v0 = vadd.f32 %v3641_v63, %v1355_v57  ;;  %v1069_v1 = vpop.f32.mrb[11].mxu0  ;;  %v1357_v2 = vpop.f32.mrb[11].mxu1 }
 0x128   :  { %v3187_v1 = vld [vmem:[%s4471_s0 + $0x440] ss:$8 sps:$4 sm:$0xff]  }
 0x129   :  { %v2801_v3 = vpack.c.bf16 %v1627_v60, %v1627_v60  ;;  %v2873_v4 = vpack.c.bf16 %v1699_v61, %v1699_v61  ;;  %v1628_v5 = vmax.f32 %v1068_v62, 0.0  ;;  %v1700_v6 = vmax.f32 %v1356_v0, 0.0  ;;  %1279 = vmatmul.mubr.bf16.gmra.mrb[116].mxu0 %v3168_v54  ;;  %1567 = vmatmul.mubr.bf16.gmra.mrb[116].mxu1 %v3169_v55  ;;  %v3186_v0 = vld [vmem:[%s4471_s0 + $0x200] ss:$8 sps:$4 sm:$0xff]  }
 0x12a   :  { %1286 = vmatprep.mubr.bf16.mxu0 %v3170_v58  ;;  %1574 = vmatprep.mubr.bf16.mxu1 %v3172_v59 }
 0x12b   :  { %2348 = vst.msk [vmem:[%s4473_s3 + $0x10] sm:$0xf] %vm2343_vm0, %v2801_v3  ;;  %2420 = vst.msk [vmem:[%s4473_s3 + $0x130] sm:$0xf] %vm2343_vm0, %v2873_v4  ;;  %v2802_v7 = vpack.c.bf16 %v1628_v5, %v1628_v5  ;;  %v2874_v8 = vpack.c.bf16 %v1700_v6, %v1700_v6  ;;  %v3188_v4 = vld [vmem:[%s4471_s0 + $0x214] ss:$8 sps:$4 sm:$0xff]  }
 0x12c   :  { %v1072_v9 = vpop.f32.mrb[12].mxu0  ;;  %v1360_v10 = vpop.f32.mrb[12].mxu1  ;;  %v3190_v5 = vld [vmem:[%s4471_s0 + $0x454] ss:$8 sps:$4 sm:$0xff]  }
 0x12d   :  { %2349 = vst.msk [vmem:[%s4473_s3 + $0x14] sm:$0xf] %vm2343_vm0, %v2802_v7  ;;  %2421 = vst.msk [vmem:[%s4473_s3 + $0x134] sm:$0xf] %vm2343_vm0, %v2874_v8  ;;  %v1073_v11 = vadd.f32 %v3641_v63, %v1072_v9  ;;  %v1361_v12 = vadd.f32 %v3641_v63, %v1360_v10  ;;  %v1074_v13 = vpop.f32.mrb[13].mxu0  ;;  %v1362_v14 = vpop.f32.mrb[13].mxu1 }
 0x12e   :  { %v1075_v17 = vpop.f32.mrb[14].mxu0  ;;  %v1363_v18 = vpop.f32.mrb[14].mxu1 }
 0x12f   :  { %v1629_v21 = vmax.f32 %v1073_v11, 0.0  ;;  %v1701_v22 = vmax.f32 %v1361_v12, 0.0  ;;  %v1076_v23 = vadd.f32 %v3641_v63, %v1075_v17  ;;  %v1364_v24 = vadd.f32 %v3641_v63, %v1363_v18  ;;  %v1077_v25 = vpop.f32.mrb[15].mxu0  ;;  %v1365_v26 = vpop.f32.mrb[15].mxu1 }
 0x130   :  { %v3193_v25 = vld [vmem:[%s4471_s0 + $0x450] ss:$8 sps:$4 sm:$0xff]  }
 0x131   :  { %v2803_v27 = vpack.c.bf16 %v1629_v21, %v1629_v21  ;;  %v2875_v28 = vpack.c.bf16 %v1701_v22, %v1701_v22  ;;  %v1630_v29 = vmax.f32 %v1076_v23, 0.0  ;;  %v1702_v30 = vmax.f32 %v1364_v24, 0.0  ;;  %1287 = vmatmul.mubr.bf16.gmra.mrb[120].mxu0 %v3174_v15  ;;  %1575 = vmatmul.mubr.bf16.gmra.mrb[120].mxu1 %v3175_v16  ;;  %v3192_v24 = vld [vmem:[%s4471_s0 + $0x210] ss:$8 sps:$4 sm:$0xff]  }
 0x132   :  { %1294 = vmatprep.mubr.bf16.mxu0 %v3176_v19  ;;  %1582 = vmatprep.mubr.bf16.mxu1 %v3178_v20 }
 0x133   :  { %2350 = vst.msk [vmem:[%s4473_s3 + $0x18] sm:$0xf] %vm2343_vm0, %v2803_v27  ;;  %2422 = vst.msk [vmem:[%s4473_s3 + $0x138] sm:$0xf] %vm2343_vm0, %v2875_v28  ;;  %v2804_v31 = vpack.c.bf16 %v1630_v29, %v1630_v29  ;;  %v2876_v32 = vpack.c.bf16 %v1702_v30, %v1702_v30  ;;  %v3194_v28 = vld [vmem:[%s4471_s0 + $0x224] ss:$8 sps:$4 sm:$0xff]  }
 0x134   :  { %v1080_v33 = vpop.f32.mrb[16].mxu0  ;;  %v1368_v34 = vpop.f32.mrb[16].mxu1  ;;  %v3196_v29 = vld [vmem:[%s4471_s0 + $0x464] ss:$8 sps:$4 sm:$0xff]  }
 0x135   :  { %2351 = vst.msk [vmem:[%s4473_s3 + $0x1c] sm:$0xf] %vm2343_vm0, %v2804_v31  ;;  %2423 = vst.msk [vmem:[%s4473_s3 + $0x13c] sm:$0xf] %vm2343_vm0, %v2876_v32  ;;  %v1081_v35 = vadd.f32 %v3641_v63, %v1080_v33  ;;  %v1369_v36 = vadd.f32 %v3641_v63, %v1368_v34  ;;  %v1082_v37 = vpop.f32.mrb[17].mxu0  ;;  %v1370_v38 = vpop.f32.mrb[17].mxu1 }
 0x136   :  { %v1083_v41 = vpop.f32.mrb[18].mxu0  ;;  %v1371_v42 = vpop.f32.mrb[18].mxu1 }
 0x137   :  { %v1631_v45 = vmax.f32 %v1081_v35, 0.0  ;;  %v1703_v46 = vmax.f32 %v1369_v36, 0.0  ;;  %v1084_v47 = vadd.f32 %v3641_v63, %v1083_v41  ;;  %v1372_v48 = vadd.f32 %v3641_v63, %v1371_v42  ;;  %v1085_v49 = vpop.f32.mrb[19].mxu0  ;;  %v1373_v50 = vpop.f32.mrb[19].mxu1 }
 0x138   :  { %v3199_v49 = vld [vmem:[%s4471_s0 + $0x460] ss:$8 sps:$4 sm:$0xff]  }
 0x139   :  { %v2805_v51 = vpack.c.bf16 %v1631_v45, %v1631_v45  ;;  %v2877_v52 = vpack.c.bf16 %v1703_v46, %v1703_v46  ;;  %v1632_v53 = vmax.f32 %v1084_v47, 0.0  ;;  %v1704_v54 = vmax.f32 %v1372_v48, 0.0  ;;  %1295 = vmatmul.mubr.bf16.gmra.mrb[124].mxu0 %v3180_v39  ;;  %1583 = vmatmul.mubr.bf16.gmra.mrb[124].mxu1 %v3181_v40  ;;  %v3198_v48 = vld [vmem:[%s4471_s0 + $0x220] ss:$8 sps:$4 sm:$0xff]  }
 0x13a   :  { %1302 = vmatprep.mubr.bf16.mxu0 %v3182_v43  ;;  %1590 = vmatprep.mubr.bf16.mxu1 %v3184_v44 }
 0x13b   :  { %2352 = vst.msk [vmem:[%s4473_s3 + $0x20] sm:$0xf] %vm2343_vm0, %v2805_v51  ;;  %2424 = vst.msk [vmem:[%s4473_s3 + $0x140] sm:$0xf] %vm2343_vm0, %v2877_v52  ;;  %v2806_v55 = vpack.c.bf16 %v1632_v53, %v1632_v53  ;;  %v2878_v56 = vpack.c.bf16 %v1704_v54, %v1704_v54  ;;  %v3200_v52 = vld [vmem:[%s4471_s0 + $0x234] ss:$8 sps:$4 sm:$0xff]  }
 0x13c   :  { %v1088_v57 = vpop.f32.mrb[20].mxu0  ;;  %v1376_v58 = vpop.f32.mrb[20].mxu1  ;;  %v3202_v53 = vld [vmem:[%s4471_s0 + $0x474] ss:$8 sps:$4 sm:$0xff]  }
 0x13d   :  { %2353 = vst.msk [vmem:[%s4473_s3 + $0x24] sm:$0xf] %vm2343_vm0, %v2806_v55  ;;  %2425 = vst.msk [vmem:[%s4473_s3 + $0x144] sm:$0xf] %vm2343_vm0, %v2878_v56  ;;  %v1089_v59 = vadd.f32 %v3641_v63, %v1088_v57  ;;  %v1377_v60 = vadd.f32 %v3641_v63, %v1376_v58  ;;  %v1090_v61 = vpop.f32.mrb[21].mxu0  ;;  %v1378_v62 = vpop.f32.mrb[21].mxu1 }
 0x13e   :  { %v1091_v2 = vpop.f32.mrb[22].mxu0  ;;  %v1379_v3 = vpop.f32.mrb[22].mxu1 }
 0x13f   :  { %v1633_v6 = vmax.f32 %v1089_v59, 0.0  ;;  %v1705_v7 = vmax.f32 %v1377_v60, 0.0  ;;  %v1092_v8 = vadd.f32 %v3641_v63, %v1091_v2  ;;  %v1380_v9 = vadd.f32 %v3641_v63, %v1379_v3  ;;  %v1093_v10 = vpop.f32.mrb[23].mxu0  ;;  %v1381_v11 = vpop.f32.mrb[23].mxu1 }
 0x140   :  { %v3205_v10 = vld [vmem:[%s4471_s0 + $0x470] ss:$8 sps:$4 sm:$0xff]  }
 0x141   :  { %v2807_v12 = vpack.c.bf16 %v1633_v6, %v1633_v6  ;;  %v2879_v13 = vpack.c.bf16 %v1705_v7, %v1705_v7  ;;  %v1634_v14 = vmax.f32 %v1092_v8, 0.0  ;;  %v1706_v15 = vmax.f32 %v1380_v9, 0.0  ;;  %1303 = vmatmul.mubr.bf16.gmra.mrb[128].mxu0 %v3186_v0  ;;  %1591 = vmatmul.mubr.bf16.gmra.mrb[128].mxu1 %v3187_v1  ;;  %v3204_v9 = vld [vmem:[%s4471_s0 + $0x230] ss:$8 sps:$4 sm:$0xff]  }
 0x142   :  { %1310 = vmatprep.mubr.bf16.mxu0 %v3188_v4  ;;  %1598 = vmatprep.mubr.bf16.mxu1 %v3190_v5 }
 0x143   :  { %2354 = vst.msk [vmem:[%s4473_s3 + $0x28] sm:$0xf] %vm2343_vm0, %v2807_v12  ;;  %2426 = vst.msk [vmem:[%s4473_s3 + $0x148] sm:$0xf] %vm2343_vm0, %v2879_v13  ;;  %v2808_v16 = vpack.c.bf16 %v1634_v14, %v1634_v14  ;;  %v2880_v17 = vpack.c.bf16 %v1706_v15, %v1706_v15 }
 0x144   :  { %v1096_v18 = vpop.f32.mrb[24].mxu0  ;;  %v1384_v19 = vpop.f32.mrb[24].mxu1 }
 0x145   :  { %2355 = vst.msk [vmem:[%s4473_s3 + $0x2c] sm:$0xf] %vm2343_vm0, %v2808_v16  ;;  %2427 = vst.msk [vmem:[%s4473_s3 + $0x14c] sm:$0xf] %vm2343_vm0, %v2880_v17  ;;  %v1097_v20 = vadd.f32 %v3641_v63, %v1096_v18  ;;  %v1385_v21 = vadd.f32 %v3641_v63, %v1384_v19  ;;  %v1098_v22 = vpop.f32.mrb[25].mxu0  ;;  %v1386_v23 = vpop.f32.mrb[25].mxu1 }
 0x146   :  { %v1099_v26 = vpop.f32.mrb[26].mxu0  ;;  %v1387_v27 = vpop.f32.mrb[26].mxu1 }
 0x147   :  { %v1635_v30 = vmax.f32 %v1097_v20, 0.0  ;;  %v1707_v31 = vmax.f32 %v1385_v21, 0.0  ;;  %v1100_v32 = vadd.f32 %v3641_v63, %v1099_v26  ;;  %v1388_v33 = vadd.f32 %v3641_v63, %v1387_v27  ;;  %v1101_v34 = vpop.f32.mrb[27].mxu0  ;;  %v1389_v35 = vpop.f32.mrb[27].mxu1 }
 0x149   :  { %v2809_v36 = vpack.c.bf16 %v1635_v30, %v1635_v30  ;;  %v2881_v37 = vpack.c.bf16 %v1707_v31, %v1707_v31  ;;  %v1636_v38 = vmax.f32 %v1100_v32, 0.0  ;;  %v1708_v39 = vmax.f32 %v1388_v33, 0.0  ;;  %1311 = vmatmul.mubr.bf16.gmra.mrb[132].mxu0 %v3192_v24  ;;  %1599 = vmatmul.mubr.bf16.gmra.mrb[132].mxu1 %v3193_v25 }
 0x14a   :  { %1318 = vmatprep.mubr.bf16.mxu0 %v3194_v28  ;;  %1606 = vmatprep.mubr.bf16.mxu1 %v3196_v29 }
 0x14b   :  { %2356 = vst.msk [vmem:[%s4473_s3 + $0x30] sm:$0xf] %vm2343_vm0, %v2809_v36  ;;  %2428 = vst.msk [vmem:[%s4473_s3 + $0x150] sm:$0xf] %vm2343_vm0, %v2881_v37  ;;  %v2810_v40 = vpack.c.bf16 %v1636_v38, %v1636_v38  ;;  %v2882_v41 = vpack.c.bf16 %v1708_v39, %v1708_v39 }
 0x14c   :  { %v1104_v42 = vpop.f32.mrb[28].mxu0  ;;  %v1392_v43 = vpop.f32.mrb[28].mxu1 }
 0x14d   :  { %2357 = vst.msk [vmem:[%s4473_s3 + $0x34] sm:$0xf] %vm2343_vm0, %v2810_v40  ;;  %2429 = vst.msk [vmem:[%s4473_s3 + $0x154] sm:$0xf] %vm2343_vm0, %v2882_v41  ;;  %v1105_v44 = vadd.f32 %v3641_v63, %v1104_v42  ;;  %v1393_v45 = vadd.f32 %v3641_v63, %v1392_v43  ;;  %v1106_v46 = vpop.f32.mrb[29].mxu0  ;;  %v1394_v47 = vpop.f32.mrb[29].mxu1 }
 0x14e   :  { %v1107_v50 = vpop.f32.mrb[30].mxu0  ;;  %v1395_v51 = vpop.f32.mrb[30].mxu1 }
 0x14f   :  { %v1637_v54 = vmax.f32 %v1105_v44, 0.0  ;;  %v1709_v55 = vmax.f32 %v1393_v45, 0.0  ;;  %v1108_v56 = vadd.f32 %v3641_v63, %v1107_v50  ;;  %v1396_v57 = vadd.f32 %v3641_v63, %v1395_v51  ;;  %v1109_v58 = vpop.f32.mrb[31].mxu0  ;;  %v1397_v59 = vpop.f32.mrb[31].mxu1 }
 0x151   :  { %v2811_v60 = vpack.c.bf16 %v1637_v54, %v1637_v54  ;;  %v2883_v61 = vpack.c.bf16 %v1709_v55, %v1709_v55  ;;  %v1638_v62 = vmax.f32 %v1108_v56, 0.0  ;;  %v1710_v0 = vmax.f32 %v1396_v57, 0.0  ;;  %1319 = vmatmul.mubr.bf16.gmra.mrb[136].mxu0 %v3198_v48  ;;  %1607 = vmatmul.mubr.bf16.gmra.mrb[136].mxu1 %v3199_v49 }
 0x152   :  { %1326 = vmatprep.mubr.bf16.mxu0 %v3200_v52  ;;  %1614 = vmatprep.mubr.bf16.mxu1 %v3202_v53 }
 0x153   :  { %2358 = vst.msk [vmem:[%s4473_s3 + $0x38] sm:$0xf] %vm2343_vm0, %v2811_v60  ;;  %2430 = vst.msk [vmem:[%s4473_s3 + $0x158] sm:$0xf] %vm2343_vm0, %v2883_v61  ;;  %v2812_v1 = vpack.c.bf16 %v1638_v62, %v1638_v62  ;;  %v2884_v2 = vpack.c.bf16 %v1710_v0, %v1710_v0 }
 0x154   :  { %v1112_v3 = vpop.f32.mrb[32].mxu0  ;;  %v1400_v4 = vpop.f32.mrb[32].mxu1 }
 0x155   :  { %2359 = vst.msk [vmem:[%s4473_s3 + $0x3c] sm:$0xf] %vm2343_vm0, %v2812_v1  ;;  %2431 = vst.msk [vmem:[%s4473_s3 + $0x15c] sm:$0xf] %vm2343_vm0, %v2884_v2  ;;  %v1113_v5 = vadd.f32 %v3641_v63, %v1112_v3  ;;  %v1401_v6 = vadd.f32 %v3641_v63, %v1400_v4  ;;  %v1114_v7 = vpop.f32.mrb[33].mxu0  ;;  %v1402_v8 = vpop.f32.mrb[33].mxu1 }
 0x156   :  { %v1115_v11 = vpop.f32.mrb[34].mxu0  ;;  %v1403_v12 = vpop.f32.mrb[34].mxu1 }
 0x157   :  { %v1639_v13 = vmax.f32 %v1113_v5, 0.0  ;;  %v1711_v14 = vmax.f32 %v1401_v6, 0.0  ;;  %v1116_v15 = vadd.f32 %v3641_v63, %v1115_v11  ;;  %v1404_v16 = vadd.f32 %v3641_v63, %v1403_v12  ;;  %v1117_v17 = vpop.f32.mrb[35].mxu0  ;;  %v1405_v18 = vpop.f32.mrb[35].mxu1 }
 0x159   :  { %v2813_v19 = vpack.c.bf16 %v1639_v13, %v1639_v13  ;;  %v2885_v20 = vpack.c.bf16 %v1711_v14, %v1711_v14  ;;  %v1640_v21 = vmax.f32 %v1116_v15, 0.0  ;;  %v1712_v22 = vmax.f32 %v1404_v16, 0.0  ;;  %1327 = vmatmul.mubr.bf16.gmra.mrb[140].mxu0 %v3204_v9  ;;  %1615 = vmatmul.mubr.bf16.gmra.mrb[140].mxu1 %v3205_v10 }
 0x15b   :  { %2360 = vst.msk [vmem:[%s4473_s3 + $0x40] sm:$0xf] %vm2343_vm0, %v2813_v19  ;;  %2432 = vst.msk [vmem:[%s4473_s3 + $0x160] sm:$0xf] %vm2343_vm0, %v2885_v20  ;;  %v2814_v23 = vpack.c.bf16 %v1640_v21, %v1640_v21  ;;  %v2886_v24 = vpack.c.bf16 %v1712_v22, %v1712_v22 }
 0x15c   :  { %v1120_v25 = vpop.f32.mrb[36].mxu0  ;;  %v1408_v26 = vpop.f32.mrb[36].mxu1 }
 0x15d   :  { %2361 = vst.msk [vmem:[%s4473_s3 + $0x44] sm:$0xf] %vm2343_vm0, %v2814_v23  ;;  %2433 = vst.msk [vmem:[%s4473_s3 + $0x164] sm:$0xf] %vm2343_vm0, %v2886_v24  ;;  %v1121_v27 = vadd.f32 %v3641_v63, %v1120_v25  ;;  %v1409_v28 = vadd.f32 %v3641_v63, %v1408_v26  ;;  %v1122_v29 = vpop.f32.mrb[37].mxu0  ;;  %v1410_v30 = vpop.f32.mrb[37].mxu1 }
 0x15e   :  { %v1123_v31 = vpop.f32.mrb[38].mxu0  ;;  %v1411_v32 = vpop.f32.mrb[38].mxu1 }
 0x15f   :  { %v1641_v33 = vmax.f32 %v1121_v27, 0.0  ;;  %v1713_v34 = vmax.f32 %v1409_v28, 0.0  ;;  %v1124_v35 = vadd.f32 %v3641_v63, %v1123_v31  ;;  %v1412_v36 = vadd.f32 %v3641_v63, %v1411_v32  ;;  %v1125_v37 = vpop.f32.mrb[39].mxu0  ;;  %v1413_v38 = vpop.f32.mrb[39].mxu1 }
 0x161   :  { %v2815_v39 = vpack.c.bf16 %v1641_v33, %v1641_v33  ;;  %v2887_v40 = vpack.c.bf16 %v1713_v34, %v1713_v34  ;;  %v1642_v41 = vmax.f32 %v1124_v35, 0.0  ;;  %v1714_v42 = vmax.f32 %v1412_v36, 0.0 }
 0x163   :  { %2362 = vst.msk [vmem:[%s4473_s3 + $0x48] sm:$0xf] %vm2343_vm0, %v2815_v39  ;;  %2434 = vst.msk [vmem:[%s4473_s3 + $0x168] sm:$0xf] %vm2343_vm0, %v2887_v40  ;;  %v2816_v43 = vpack.c.bf16 %v1642_v41, %v1642_v41  ;;  %v2888_v44 = vpack.c.bf16 %v1714_v42, %v1714_v42 }
 0x164   :  { %v1128_v45 = vpop.f32.mrb[40].mxu0  ;;  %v1416_v46 = vpop.f32.mrb[40].mxu1 }
 0x165   :  { %2363 = vst.msk [vmem:[%s4473_s3 + $0x4c] sm:$0xf] %vm2343_vm0, %v2816_v43  ;;  %2435 = vst.msk [vmem:[%s4473_s3 + $0x16c] sm:$0xf] %vm2343_vm0, %v2888_v44  ;;  %v1129_v47 = vadd.f32 %v3641_v63, %v1128_v45  ;;  %v1417_v48 = vadd.f32 %v3641_v63, %v1416_v46  ;;  %v1130_v49 = vpop.f32.mrb[41].mxu0  ;;  %v1418_v50 = vpop.f32.mrb[41].mxu1 }
 0x166   :  { %v1131_v51 = vpop.f32.mrb[42].mxu0  ;;  %v1419_v52 = vpop.f32.mrb[42].mxu1 }
 0x167   :  { %v1643_v53 = vmax.f32 %v1129_v47, 0.0  ;;  %v1715_v54 = vmax.f32 %v1417_v48, 0.0  ;;  %v1132_v55 = vadd.f32 %v3641_v63, %v1131_v51  ;;  %v1420_v56 = vadd.f32 %v3641_v63, %v1419_v52  ;;  %v1133_v57 = vpop.f32.mrb[43].mxu0  ;;  %v1421_v58 = vpop.f32.mrb[43].mxu1 }
 0x169   :  { %v2817_v59 = vpack.c.bf16 %v1643_v53, %v1643_v53  ;;  %v2889_v60 = vpack.c.bf16 %v1715_v54, %v1715_v54  ;;  %v1644_v61 = vmax.f32 %v1132_v55, 0.0  ;;  %v1716_v62 = vmax.f32 %v1420_v56, 0.0 }
 0x16b   :  { %2364 = vst.msk [vmem:[%s4473_s3 + $0x50] sm:$0xf] %vm2343_vm0, %v2817_v59  ;;  %2436 = vst.msk [vmem:[%s4473_s3 + $0x170] sm:$0xf] %vm2343_vm0, %v2889_v60  ;;  %v2818_v0 = vpack.c.bf16 %v1644_v61, %v1644_v61  ;;  %v2890_v1 = vpack.c.bf16 %v1716_v62, %v1716_v62 }
 0x16c   :  { %v1136_v2 = vpop.f32.mrb[44].mxu0  ;;  %v1424_v3 = vpop.f32.mrb[44].mxu1 }
 0x16d   :  { %2365 = vst.msk [vmem:[%s4473_s3 + $0x54] sm:$0xf] %vm2343_vm0, %v2818_v0  ;;  %2437 = vst.msk [vmem:[%s4473_s3 + $0x174] sm:$0xf] %vm2343_vm0, %v2890_v1  ;;  %v1137_v4 = vadd.f32 %v3641_v63, %v1136_v2  ;;  %v1425_v5 = vadd.f32 %v3641_v63, %v1424_v3  ;;  %v1138_v6 = vpop.f32.mrb[45].mxu0  ;;  %v1426_v7 = vpop.f32.mrb[45].mxu1 }
 0x16e   :  { %v1139_v8 = vpop.f32.mrb[46].mxu0  ;;  %v1427_v9 = vpop.f32.mrb[46].mxu1 }
 0x16f   :  { %v1645_v10 = vmax.f32 %v1137_v4, 0.0  ;;  %v1717_v11 = vmax.f32 %v1425_v5, 0.0  ;;  %v1140_v12 = vadd.f32 %v3641_v63, %v1139_v8  ;;  %v1428_v13 = vadd.f32 %v3641_v63, %v1427_v9  ;;  %v1141_v14 = vpop.f32.mrb[47].mxu0  ;;  %v1429_v15 = vpop.f32.mrb[47].mxu1 }
 0x171   :  { %v2819_v16 = vpack.c.bf16 %v1645_v10, %v1645_v10  ;;  %v2891_v17 = vpack.c.bf16 %v1717_v11, %v1717_v11  ;;  %v1646_v18 = vmax.f32 %v1140_v12, 0.0  ;;  %v1718_v19 = vmax.f32 %v1428_v13, 0.0 }
 0x173   :  { %2366 = vst.msk [vmem:[%s4473_s3 + $0x58] sm:$0xf] %vm2343_vm0, %v2819_v16  ;;  %2438 = vst.msk [vmem:[%s4473_s3 + $0x178] sm:$0xf] %vm2343_vm0, %v2891_v17  ;;  %v2820_v20 = vpack.c.bf16 %v1646_v18, %v1646_v18  ;;  %v2892_v21 = vpack.c.bf16 %v1718_v19, %v1718_v19 }
 0x174   :  { %v1144_v22 = vpop.f32.mrb[48].mxu0  ;;  %v1432_v23 = vpop.f32.mrb[48].mxu1 }
 0x175   :  { %2367 = vst.msk [vmem:[%s4473_s3 + $0x5c] sm:$0xf] %vm2343_vm0, %v2820_v20  ;;  %2439 = vst.msk [vmem:[%s4473_s3 + $0x17c] sm:$0xf] %vm2343_vm0, %v2892_v21  ;;  %v1145_v24 = vadd.f32 %v3641_v63, %v1144_v22  ;;  %v1433_v25 = vadd.f32 %v3641_v63, %v1432_v23  ;;  %v1146_v26 = vpop.f32.mrb[49].mxu0  ;;  %v1434_v27 = vpop.f32.mrb[49].mxu1 }
 0x176   :  { %v1147_v28 = vpop.f32.mrb[50].mxu0  ;;  %v1435_v29 = vpop.f32.mrb[50].mxu1 }
 0x177   :  { %v1647_v30 = vmax.f32 %v1145_v24, 0.0  ;;  %v1719_v31 = vmax.f32 %v1433_v25, 0.0  ;;  %v1148_v32 = vadd.f32 %v3641_v63, %v1147_v28  ;;  %v1436_v33 = vadd.f32 %v3641_v63, %v1435_v29  ;;  %v1149_v34 = vpop.f32.mrb[51].mxu0  ;;  %v1437_v35 = vpop.f32.mrb[51].mxu1 }
 0x179   :  { %v2821_v36 = vpack.c.bf16 %v1647_v30, %v1647_v30  ;;  %v2893_v37 = vpack.c.bf16 %v1719_v31, %v1719_v31  ;;  %v1648_v38 = vmax.f32 %v1148_v32, 0.0  ;;  %v1720_v39 = vmax.f32 %v1436_v33, 0.0 }
 0x17b   :  { %2368 = vst.msk [vmem:[%s4473_s3 + $0x60] sm:$0xf] %vm2343_vm0, %v2821_v36  ;;  %2440 = vst.msk [vmem:[%s4473_s3 + $0x180] sm:$0xf] %vm2343_vm0, %v2893_v37  ;;  %v2822_v40 = vpack.c.bf16 %v1648_v38, %v1648_v38  ;;  %v2894_v41 = vpack.c.bf16 %v1720_v39, %v1720_v39 }
 0x17c   :  { %v1152_v42 = vpop.f32.mrb[52].mxu0  ;;  %v1440_v43 = vpop.f32.mrb[52].mxu1 }
 0x17d   :  { %2369 = vst.msk [vmem:[%s4473_s3 + $0x64] sm:$0xf] %vm2343_vm0, %v2822_v40  ;;  %2441 = vst.msk [vmem:[%s4473_s3 + $0x184] sm:$0xf] %vm2343_vm0, %v2894_v41  ;;  %v1153_v44 = vadd.f32 %v3641_v63, %v1152_v42  ;;  %v1441_v45 = vadd.f32 %v3641_v63, %v1440_v43  ;;  %v1154_v46 = vpop.f32.mrb[53].mxu0  ;;  %v1442_v47 = vpop.f32.mrb[53].mxu1 }
 0x17e   :  { %v1155_v48 = vpop.f32.mrb[54].mxu0  ;;  %v1443_v49 = vpop.f32.mrb[54].mxu1 }
 0x17f   :  { %v1649_v50 = vmax.f32 %v1153_v44, 0.0  ;;  %v1721_v51 = vmax.f32 %v1441_v45, 0.0  ;;  %v1156_v52 = vadd.f32 %v3641_v63, %v1155_v48  ;;  %v1444_v53 = vadd.f32 %v3641_v63, %v1443_v49  ;;  %v1157_v54 = vpop.f32.mrb[55].mxu0  ;;  %v1445_v55 = vpop.f32.mrb[55].mxu1 }
 0x181   :  { %v2823_v56 = vpack.c.bf16 %v1649_v50, %v1649_v50  ;;  %v2895_v57 = vpack.c.bf16 %v1721_v51, %v1721_v51  ;;  %v1650_v58 = vmax.f32 %v1156_v52, 0.0  ;;  %v1722_v59 = vmax.f32 %v1444_v53, 0.0 }
 0x183   :  { %2370 = vst.msk [vmem:[%s4473_s3 + $0x68] sm:$0xf] %vm2343_vm0, %v2823_v56  ;;  %2442 = vst.msk [vmem:[%s4473_s3 + $0x188] sm:$0xf] %vm2343_vm0, %v2895_v57  ;;  %v2824_v60 = vpack.c.bf16 %v1650_v58, %v1650_v58  ;;  %v2896_v61 = vpack.c.bf16 %v1722_v59, %v1722_v59 }
 0x184   :  { %v1160_v62 = vpop.f32.mrb[56].mxu0  ;;  %v1448_v0 = vpop.f32.mrb[56].mxu1 }
 0x185   :  { %2371 = vst.msk [vmem:[%s4473_s3 + $0x6c] sm:$0xf] %vm2343_vm0, %v2824_v60  ;;  %2443 = vst.msk [vmem:[%s4473_s3 + $0x18c] sm:$0xf] %vm2343_vm0, %v2896_v61  ;;  %v1161_v1 = vadd.f32 %v3641_v63, %v1160_v62  ;;  %v1449_v2 = vadd.f32 %v3641_v63, %v1448_v0  ;;  %v1162_v3 = vpop.f32.mrb[57].mxu0  ;;  %v1450_v4 = vpop.f32.mrb[57].mxu1 }
 0x186   :  { %v1163_v5 = vpop.f32.mrb[58].mxu0  ;;  %v1451_v6 = vpop.f32.mrb[58].mxu1 }
 0x187   :  { %v1651_v7 = vmax.f32 %v1161_v1, 0.0  ;;  %v1723_v8 = vmax.f32 %v1449_v2, 0.0  ;;  %v1164_v9 = vadd.f32 %v3641_v63, %v1163_v5  ;;  %v1452_v10 = vadd.f32 %v3641_v63, %v1451_v6  ;;  %v1165_v11 = vpop.f32.mrb[59].mxu0  ;;  %v1453_v12 = vpop.f32.mrb[59].mxu1 }
 0x189   :  { %v2825_v13 = vpack.c.bf16 %v1651_v7, %v1651_v7  ;;  %v2897_v14 = vpack.c.bf16 %v1723_v8, %v1723_v8  ;;  %v1652_v15 = vmax.f32 %v1164_v9, 0.0  ;;  %v1724_v16 = vmax.f32 %v1452_v10, 0.0 }
 0x18b   :  { %2372 = vst.msk [vmem:[%s4473_s3 + $0x70] sm:$0xf] %vm2343_vm0, %v2825_v13  ;;  %2444 = vst.msk [vmem:[%s4473_s3 + $0x190] sm:$0xf] %vm2343_vm0, %v2897_v14  ;;  %v2826_v17 = vpack.c.bf16 %v1652_v15, %v1652_v15  ;;  %v2898_v18 = vpack.c.bf16 %v1724_v16, %v1724_v16 }
 0x18c   :  { %v1168_v19 = vpop.f32.mrb[60].mxu0  ;;  %v1456_v20 = vpop.f32.mrb[60].mxu1 }
 0x18d   :  { %2373 = vst.msk [vmem:[%s4473_s3 + $0x74] sm:$0xf] %vm2343_vm0, %v2826_v17  ;;  %2445 = vst.msk [vmem:[%s4473_s3 + $0x194] sm:$0xf] %vm2343_vm0, %v2898_v18  ;;  %v1169_v21 = vadd.f32 %v3641_v63, %v1168_v19  ;;  %v1457_v22 = vadd.f32 %v3641_v63, %v1456_v20  ;;  %v1170_v23 = vpop.f32.mrb[61].mxu0  ;;  %v1458_v24 = vpop.f32.mrb[61].mxu1 }
 0x18e   :  { %v1171_v25 = vpop.f32.mrb[62].mxu0  ;;  %v1459_v26 = vpop.f32.mrb[62].mxu1 }
 0x18f   :  { %v1653_v27 = vmax.f32 %v1169_v21, 0.0  ;;  %v1725_v28 = vmax.f32 %v1457_v22, 0.0  ;;  %v1172_v29 = vadd.f32 %v3641_v63, %v1171_v25  ;;  %v1460_v30 = vadd.f32 %v3641_v63, %v1459_v26  ;;  %v1173_v31 = vpop.f32.mrb[63].mxu0  ;;  %v1461_v32 = vpop.f32.mrb[63].mxu1  ;;  %v4110_v26 = vld [vmem:[%s4472_s2] ss:$0 sm:$0xff] }
 0x191   :  { %v2827_v33 = vpack.c.bf16 %v1653_v27, %v1653_v27  ;;  %v2899_v34 = vpack.c.bf16 %v1725_v28, %v1725_v28  ;;  %v1654_v35 = vmax.f32 %v1172_v29, 0.0  ;;  %v1726_v36 = vmax.f32 %v1460_v30, 0.0 }
 0x193   :  { %2374 = vst.msk [vmem:[%s4473_s3 + $0x78] sm:$0xf] %vm2343_vm0, %v2827_v33  ;;  %2446 = vst.msk [vmem:[%s4473_s3 + $0x198] sm:$0xf] %vm2343_vm0, %v2899_v34  ;;  %v2828_v37 = vpack.c.bf16 %v1654_v35, %v1654_v35  ;;  %v2900_v38 = vpack.c.bf16 %v1726_v36, %v1726_v36 }
 0x194   :  { %v1176_v39 = vpop.f32.mrb[64].mxu0  ;;  %v1464_v40 = vpop.f32.mrb[64].mxu1 }
 0x195   :  { %2375 = vst.msk [vmem:[%s4473_s3 + $0x7c] sm:$0xf] %vm2343_vm0, %v2828_v37  ;;  %2447 = vst.msk [vmem:[%s4473_s3 + $0x19c] sm:$0xf] %vm2343_vm0, %v2900_v38  ;;  %v1177_v41 = vadd.f32 %v3641_v63, %v1176_v39  ;;  %v1465_v42 = vadd.f32 %v3641_v63, %v1464_v40  ;;  %v1178_v43 = vpop.f32.mrb[65].mxu0  ;;  %v1466_v44 = vpop.f32.mrb[65].mxu1 }
 0x196   :  { %v1179_v45 = vpop.f32.mrb[66].mxu0  ;;  %v1467_v46 = vpop.f32.mrb[66].mxu1 }
 0x197   :  { %v1655_v47 = vmax.f32 %v1177_v41, 0.0  ;;  %v1727_v48 = vmax.f32 %v1465_v42, 0.0  ;;  %v1180_v49 = vadd.f32 %v3641_v63, %v1179_v45  ;;  %v1468_v50 = vadd.f32 %v3641_v63, %v1467_v46  ;;  %v1181_v51 = vpop.f32.mrb[67].mxu0  ;;  %v1469_v52 = vpop.f32.mrb[67].mxu1 }
 0x199   :  { %v2829_v53 = vpack.c.bf16 %v1655_v47, %v1655_v47  ;;  %v2901_v54 = vpack.c.bf16 %v1727_v48, %v1727_v48  ;;  %v1656_v55 = vmax.f32 %v1180_v49, 0.0  ;;  %v1728_v56 = vmax.f32 %v1468_v50, 0.0 }
 0x19b   :  { %2376 = vst.msk [vmem:[%s4473_s3 + $0x80] sm:$0xf] %vm2343_vm0, %v2829_v53  ;;  %2448 = vst.msk [vmem:[%s4473_s3 + $0x1a0] sm:$0xf] %vm2343_vm0, %v2901_v54  ;;  %v2830_v57 = vpack.c.bf16 %v1656_v55, %v1656_v55  ;;  %v2902_v58 = vpack.c.bf16 %v1728_v56, %v1728_v56 }
 0x19c   :  { %v1184_v59 = vpop.f32.mrb[68].mxu0  ;;  %v1472_v60 = vpop.f32.mrb[68].mxu1 }
 0x19d   :  { %2377 = vst.msk [vmem:[%s4473_s3 + $0x84] sm:$0xf] %vm2343_vm0, %v2830_v57  ;;  %2449 = vst.msk [vmem:[%s4473_s3 + $0x1a4] sm:$0xf] %vm2343_vm0, %v2902_v58  ;;  %v1185_v61 = vadd.f32 %v3641_v63, %v1184_v59  ;;  %v1473_v62 = vadd.f32 %v3641_v63, %v1472_v60  ;;  %v1186_v0 = vpop.f32.mrb[69].mxu0  ;;  %v1474_v1 = vpop.f32.mrb[69].mxu1 }
 0x19e   :  { %v1187_v2 = vpop.f32.mrb[70].mxu0  ;;  %v1475_v3 = vpop.f32.mrb[70].mxu1 }
 0x19f   :  { %v1657_v4 = vmax.f32 %v1185_v61, 0.0  ;;  %v1729_v5 = vmax.f32 %v1473_v62, 0.0  ;;  %v1188_v6 = vadd.f32 %v3641_v63, %v1187_v2  ;;  %v1476_v7 = vadd.f32 %v3641_v63, %v1475_v3  ;;  %v1189_v8 = vpop.f32.mrb[71].mxu0  ;;  %v1477_v9 = vpop.f32.mrb[71].mxu1 }
 0x1a1   :  { %v2831_v10 = vpack.c.bf16 %v1657_v4, %v1657_v4  ;;  %v2903_v11 = vpack.c.bf16 %v1729_v5, %v1729_v5  ;;  %v1658_v12 = vmax.f32 %v1188_v6, 0.0  ;;  %v1730_v13 = vmax.f32 %v1476_v7, 0.0 }
 0x1a3   :  { %2378 = vst.msk [vmem:[%s4473_s3 + $0x88] sm:$0xf] %vm2343_vm0, %v2831_v10  ;;  %2450 = vst.msk [vmem:[%s4473_s3 + $0x1a8] sm:$0xf] %vm2343_vm0, %v2903_v11  ;;  %v2832_v14 = vpack.c.bf16 %v1658_v12, %v1658_v12  ;;  %v2904_v15 = vpack.c.bf16 %v1730_v13, %v1730_v13 }
 0x1a4   :  { %v1192_v16 = vpop.f32.mrb[72].mxu0  ;;  %v1480_v17 = vpop.f32.mrb[72].mxu1 }
 0x1a5   :  { %2379 = vst.msk [vmem:[%s4473_s3 + $0x8c] sm:$0xf] %vm2343_vm0, %v2832_v14  ;;  %2451 = vst.msk [vmem:[%s4473_s3 + $0x1ac] sm:$0xf] %vm2343_vm0, %v2904_v15  ;;  %v1193_v18 = vadd.f32 %v3641_v63, %v1192_v16  ;;  %v1481_v19 = vadd.f32 %v3641_v63, %v1480_v17  ;;  %v1194_v20 = vpop.f32.mrb[73].mxu0  ;;  %v1482_v21 = vpop.f32.mrb[73].mxu1 }
 0x1a6   :  { %v1195_v22 = vpop.f32.mrb[74].mxu0  ;;  %v1483_v23 = vpop.f32.mrb[74].mxu1 }
 0x1a7   :  { %v1659_v24 = vmax.f32 %v1193_v18, 0.0  ;;  %v1731_v25 = vmax.f32 %v1481_v19, 0.0  ;;  %v1196_v27 = vadd.f32 %v4110_v26, %v1195_v22  ;;  %v1484_v28 = vadd.f32 %v4110_v26, %v1483_v23  ;;  %v1197_v29 = vpop.f32.mrb[75].mxu0  ;;  %v1485_v30 = vpop.f32.mrb[75].mxu1 }
 0x1a9   :  { %v2833_v31 = vpack.c.bf16 %v1659_v24, %v1659_v24  ;;  %v2905_v32 = vpack.c.bf16 %v1731_v25, %v1731_v25  ;;  %v1660_v63 = vmax.f32 %v1196_v27, 0.0  ;;  %v1732_v33 = vmax.f32 %v1484_v28, 0.0 }
 0x1ab   :  { %2380 = vst.msk [vmem:[%s4473_s3 + $0x90] sm:$0xf] %vm2343_vm0, %v2833_v31  ;;  %2452 = vst.msk [vmem:[%s4473_s3 + $0x1b0] sm:$0xf] %vm2343_vm0, %v2905_v32  ;;  %v2834_v34 = vpack.c.bf16 %v1660_v63, %v1660_v63  ;;  %v2906_v35 = vpack.c.bf16 %v1732_v33, %v1732_v33 }
 0x1ac   :  { %v1200_v36 = vpop.f32.mrb[76].mxu0  ;;  %v1488_v37 = vpop.f32.mrb[76].mxu1 }
 0x1ad   :  { %2381 = vst.msk [vmem:[%s4473_s3 + $0x94] sm:$0xf] %vm2343_vm0, %v2834_v34  ;;  %2453 = vst.msk [vmem:[%s4473_s3 + $0x1b4] sm:$0xf] %vm2343_vm0, %v2906_v35  ;;  %v1201_v38 = vadd.f32 %v4110_v26, %v1200_v36  ;;  %v1489_v39 = vadd.f32 %v4110_v26, %v1488_v37  ;;  %v1202_v40 = vpop.f32.mrb[77].mxu0  ;;  %v1490_v41 = vpop.f32.mrb[77].mxu1 }
 0x1ae   :  { %v1203_v42 = vpop.f32.mrb[78].mxu0  ;;  %v1491_v43 = vpop.f32.mrb[78].mxu1 }
 0x1af   :  { %v1661_v44 = vmax.f32 %v1201_v38, 0.0  ;;  %v1733_v45 = vmax.f32 %v1489_v39, 0.0  ;;  %v1204_v46 = vadd.f32 %v4110_v26, %v1203_v42  ;;  %v1492_v47 = vadd.f32 %v4110_v26, %v1491_v43  ;;  %v1205_v48 = vpop.f32.mrb[79].mxu0  ;;  %v1493_v49 = vpop.f32.mrb[79].mxu1 }
 0x1b1   :  { %v2835_v50 = vpack.c.bf16 %v1661_v44, %v1661_v44  ;;  %v2907_v51 = vpack.c.bf16 %v1733_v45, %v1733_v45  ;;  %v1662_v52 = vmax.f32 %v1204_v46, 0.0  ;;  %v1734_v53 = vmax.f32 %v1492_v47, 0.0 }
 0x1b3   :  { %2382 = vst.msk [vmem:[%s4473_s3 + $0x98] sm:$0xf] %vm2343_vm0, %v2835_v50  ;;  %2454 = vst.msk [vmem:[%s4473_s3 + $0x1b8] sm:$0xf] %vm2343_vm0, %v2907_v51  ;;  %v2836_v54 = vpack.c.bf16 %v1662_v52, %v1662_v52  ;;  %v2908_v55 = vpack.c.bf16 %v1734_v53, %v1734_v53 }
 0x1b4   :  { %v1208_v56 = vpop.f32.mrb[80].mxu0  ;;  %v1496_v57 = vpop.f32.mrb[80].mxu1 }
 0x1b5   :  { %2383 = vst.msk [vmem:[%s4473_s3 + $0x9c] sm:$0xf] %vm2343_vm0, %v2836_v54  ;;  %2455 = vst.msk [vmem:[%s4473_s3 + $0x1bc] sm:$0xf] %vm2343_vm0, %v2908_v55  ;;  %v1209_v58 = vadd.f32 %v4110_v26, %v1208_v56  ;;  %v1497_v59 = vadd.f32 %v4110_v26, %v1496_v57  ;;  %v1210_v60 = vpop.f32.mrb[81].mxu0  ;;  %v1498_v61 = vpop.f32.mrb[81].mxu1 }
 0x1b6   :  { %v1211_v62 = vpop.f32.mrb[82].mxu0  ;;  %v1499_v0 = vpop.f32.mrb[82].mxu1 }
 0x1b7   :  { %v1663_v1 = vmax.f32 %v1209_v58, 0.0  ;;  %v1735_v2 = vmax.f32 %v1497_v59, 0.0  ;;  %v1212_v3 = vadd.f32 %v4110_v26, %v1211_v62  ;;  %v1500_v4 = vadd.f32 %v4110_v26, %v1499_v0  ;;  %v1213_v5 = vpop.f32.mrb[83].mxu0  ;;  %v1501_v6 = vpop.f32.mrb[83].mxu1 }
 0x1b9   :  { %v2837_v7 = vpack.c.bf16 %v1663_v1, %v1663_v1  ;;  %v2909_v8 = vpack.c.bf16 %v1735_v2, %v1735_v2  ;;  %v1664_v9 = vmax.f32 %v1212_v3, 0.0  ;;  %v1736_v10 = vmax.f32 %v1500_v4, 0.0 }
 0x1bb   :  { %2384 = vst.msk [vmem:[%s4473_s3 + $0xa0] sm:$0xf] %vm2343_vm0, %v2837_v7  ;;  %2456 = vst.msk [vmem:[%s4473_s3 + $0x1c0] sm:$0xf] %vm2343_vm0, %v2909_v8  ;;  %v2838_v11 = vpack.c.bf16 %v1664_v9, %v1664_v9  ;;  %v2910_v12 = vpack.c.bf16 %v1736_v10, %v1736_v10 }
 0x1bc   :  { %v1216_v13 = vpop.f32.mrb[84].mxu0  ;;  %v1504_v14 = vpop.f32.mrb[84].mxu1 }
 0x1bd   :  { %2385 = vst.msk [vmem:[%s4473_s3 + $0xa4] sm:$0xf] %vm2343_vm0, %v2838_v11  ;;  %2457 = vst.msk [vmem:[%s4473_s3 + $0x1c4] sm:$0xf] %vm2343_vm0, %v2910_v12  ;;  %v1217_v15 = vadd.f32 %v4110_v26, %v1216_v13  ;;  %v1505_v16 = vadd.f32 %v4110_v26, %v1504_v14  ;;  %v1218_v17 = vpop.f32.mrb[85].mxu0  ;;  %v1506_v18 = vpop.f32.mrb[85].mxu1 }
 0x1be   :  { %v1219_v19 = vpop.f32.mrb[86].mxu0  ;;  %v1507_v20 = vpop.f32.mrb[86].mxu1 }
 0x1bf   :  { %v1665_v21 = vmax.f32 %v1217_v15, 0.0  ;;  %v1737_v22 = vmax.f32 %v1505_v16, 0.0  ;;  %v1220_v23 = vadd.f32 %v4110_v26, %v1219_v19  ;;  %v1508_v24 = vadd.f32 %v4110_v26, %v1507_v20  ;;  %v1221_v25 = vpop.f32.mrb[87].mxu0  ;;  %v1509_v27 = vpop.f32.mrb[87].mxu1 }
 0x1c1   :  { %v2839_v28 = vpack.c.bf16 %v1665_v21, %v1665_v21  ;;  %v2911_v29 = vpack.c.bf16 %v1737_v22, %v1737_v22  ;;  %v1666_v30 = vmax.f32 %v1220_v23, 0.0  ;;  %v1738_v31 = vmax.f32 %v1508_v24, 0.0 }
 0x1c3   :  { %2386 = vst.msk [vmem:[%s4473_s3 + $0xa8] sm:$0xf] %vm2343_vm0, %v2839_v28  ;;  %2458 = vst.msk [vmem:[%s4473_s3 + $0x1c8] sm:$0xf] %vm2343_vm0, %v2911_v29  ;;  %v2840_v32 = vpack.c.bf16 %v1666_v30, %v1666_v30  ;;  %v2912_v63 = vpack.c.bf16 %v1738_v31, %v1738_v31 }
 0x1c4   :  { %v1224_v33 = vpop.f32.mrb[88].mxu0  ;;  %v1512_v34 = vpop.f32.mrb[88].mxu1 }
 0x1c5   :  { %2387 = vst.msk [vmem:[%s4473_s3 + $0xac] sm:$0xf] %vm2343_vm0, %v2840_v32  ;;  %2459 = vst.msk [vmem:[%s4473_s3 + $0x1cc] sm:$0xf] %vm2343_vm0, %v2912_v63  ;;  %v1225_v35 = vadd.f32 %v4110_v26, %v1224_v33  ;;  %v1513_v36 = vadd.f32 %v4110_v26, %v1512_v34  ;;  %v1226_v37 = vpop.f32.mrb[89].mxu0  ;;  %v1514_v38 = vpop.f32.mrb[89].mxu1 }
 0x1c6   :  { %v1227_v39 = vpop.f32.mrb[90].mxu0  ;;  %v1515_v40 = vpop.f32.mrb[90].mxu1 }
 0x1c7   :  { %v1667_v41 = vmax.f32 %v1225_v35, 0.0  ;;  %v1739_v42 = vmax.f32 %v1513_v36, 0.0  ;;  %v1228_v43 = vadd.f32 %v4110_v26, %v1227_v39  ;;  %v1516_v44 = vadd.f32 %v4110_v26, %v1515_v40  ;;  %v1229_v45 = vpop.f32.mrb[91].mxu0  ;;  %v1517_v46 = vpop.f32.mrb[91].mxu1 }
 0x1c9   :  { %v2841_v47 = vpack.c.bf16 %v1667_v41, %v1667_v41  ;;  %v2913_v48 = vpack.c.bf16 %v1739_v42, %v1739_v42  ;;  %v1668_v49 = vmax.f32 %v1228_v43, 0.0  ;;  %v1740_v50 = vmax.f32 %v1516_v44, 0.0 }
 0x1cb   :  { %2388 = vst.msk [vmem:[%s4473_s3 + $0xb0] sm:$0xf] %vm2343_vm0, %v2841_v47  ;;  %2460 = vst.msk [vmem:[%s4473_s3 + $0x1d0] sm:$0xf] %vm2343_vm0, %v2913_v48  ;;  %v2842_v51 = vpack.c.bf16 %v1668_v49, %v1668_v49  ;;  %v2914_v52 = vpack.c.bf16 %v1740_v50, %v1740_v50 }
 0x1cc   :  { %v1232_v53 = vpop.f32.mrb[92].mxu0  ;;  %v1520_v54 = vpop.f32.mrb[92].mxu1 }
 0x1cd   :  { %2389 = vst.msk [vmem:[%s4473_s3 + $0xb4] sm:$0xf] %vm2343_vm0, %v2842_v51  ;;  %2461 = vst.msk [vmem:[%s4473_s3 + $0x1d4] sm:$0xf] %vm2343_vm0, %v2914_v52  ;;  %v1233_v55 = vadd.f32 %v4110_v26, %v1232_v53  ;;  %v1521_v56 = vadd.f32 %v4110_v26, %v1520_v54  ;;  %v1234_v57 = vpop.f32.mrb[93].mxu0  ;;  %v1522_v58 = vpop.f32.mrb[93].mxu1 }
 0x1ce   :  { %v1235_v59 = vpop.f32.mrb[94].mxu0  ;;  %v1523_v60 = vpop.f32.mrb[94].mxu1 }
 0x1cf   :  { %v1669_v61 = vmax.f32 %v1233_v55, 0.0  ;;  %v1741_v62 = vmax.f32 %v1521_v56, 0.0  ;;  %v1236_v0 = vadd.f32 %v4110_v26, %v1235_v59  ;;  %v1524_v1 = vadd.f32 %v4110_v26, %v1523_v60  ;;  %v1237_v2 = vpop.f32.mrb[95].mxu0  ;;  %v1525_v3 = vpop.f32.mrb[95].mxu1 }
 0x1d1   :  { %v2843_v4 = vpack.c.bf16 %v1669_v61, %v1669_v61  ;;  %v2915_v5 = vpack.c.bf16 %v1741_v62, %v1741_v62  ;;  %v1670_v6 = vmax.f32 %v1236_v0, 0.0  ;;  %v1742_v7 = vmax.f32 %v1524_v1, 0.0 }
 0x1d3   :  { %2390 = vst.msk [vmem:[%s4473_s3 + $0xb8] sm:$0xf] %vm2343_vm0, %v2843_v4  ;;  %2462 = vst.msk [vmem:[%s4473_s3 + $0x1d8] sm:$0xf] %vm2343_vm0, %v2915_v5  ;;  %v2844_v8 = vpack.c.bf16 %v1670_v6, %v1670_v6  ;;  %v2916_v9 = vpack.c.bf16 %v1742_v7, %v1742_v7 }
 0x1d4   :  { %v1240_v10 = vpop.f32.mrb[96].mxu0  ;;  %v1528_v11 = vpop.f32.mrb[96].mxu1 }
 0x1d5   :  { %2391 = vst.msk [vmem:[%s4473_s3 + $0xbc] sm:$0xf] %vm2343_vm0, %v2844_v8  ;;  %2463 = vst.msk [vmem:[%s4473_s3 + $0x1dc] sm:$0xf] %vm2343_vm0, %v2916_v9  ;;  %v1241_v12 = vadd.f32 %v4110_v26, %v1240_v10  ;;  %v1529_v13 = vadd.f32 %v4110_v26, %v1528_v11  ;;  %v1242_v14 = vpop.f32.mrb[97].mxu0  ;;  %v1530_v15 = vpop.f32.mrb[97].mxu1 }
 0x1d6   :  { %v1243_v16 = vpop.f32.mrb[98].mxu0  ;;  %v1531_v17 = vpop.f32.mrb[98].mxu1 }
 0x1d7   :  { %v1671_v18 = vmax.f32 %v1241_v12, 0.0  ;;  %v1743_v19 = vmax.f32 %v1529_v13, 0.0  ;;  %v1244_v20 = vadd.f32 %v4110_v26, %v1243_v16  ;;  %v1532_v21 = vadd.f32 %v4110_v26, %v1531_v17  ;;  %v1245_v22 = vpop.f32.mrb[99].mxu0  ;;  %v1533_v23 = vpop.f32.mrb[99].mxu1 }
 0x1d9   :  { %v2845_v24 = vpack.c.bf16 %v1671_v18, %v1671_v18  ;;  %v2917_v25 = vpack.c.bf16 %v1743_v19, %v1743_v19  ;;  %v1672_v27 = vmax.f32 %v1244_v20, 0.0  ;;  %v1744_v28 = vmax.f32 %v1532_v21, 0.0 }
 0x1db   :  { %2392 = vst.msk [vmem:[%s4473_s3 + $0xc0] sm:$0xf] %vm2343_vm0, %v2845_v24  ;;  %2464 = vst.msk [vmem:[%s4473_s3 + $0x1e0] sm:$0xf] %vm2343_vm0, %v2917_v25  ;;  %v2846_v29 = vpack.c.bf16 %v1672_v27, %v1672_v27  ;;  %v2918_v30 = vpack.c.bf16 %v1744_v28, %v1744_v28 }
 0x1dc   :  { %v1248_v31 = vpop.f32.mrb[100].mxu0  ;;  %v1536_v32 = vpop.f32.mrb[100].mxu1 }
 0x1dd   :  { %2393 = vst.msk [vmem:[%s4473_s3 + $0xc4] sm:$0xf] %vm2343_vm0, %v2846_v29  ;;  %2465 = vst.msk [vmem:[%s4473_s3 + $0x1e4] sm:$0xf] %vm2343_vm0, %v2918_v30  ;;  %v1249_v63 = vadd.f32 %v4110_v26, %v1248_v31  ;;  %v1537_v33 = vadd.f32 %v4110_v26, %v1536_v32  ;;  %v1250_v34 = vpop.f32.mrb[101].mxu0  ;;  %v1538_v35 = vpop.f32.mrb[101].mxu1 }
 0x1de   :  { %v1251_v36 = vpop.f32.mrb[102].mxu0  ;;  %v1539_v37 = vpop.f32.mrb[102].mxu1 }
 0x1df   :  { %v1673_v38 = vmax.f32 %v1249_v63, 0.0  ;;  %v1745_v39 = vmax.f32 %v1537_v33, 0.0  ;;  %v1252_v40 = vadd.f32 %v4110_v26, %v1251_v36  ;;  %v1540_v41 = vadd.f32 %v4110_v26, %v1539_v37  ;;  %v1253_v42 = vpop.f32.mrb[103].mxu0  ;;  %v1541_v43 = vpop.f32.mrb[103].mxu1 }
 0x1e1   :  { %v2847_v44 = vpack.c.bf16 %v1673_v38, %v1673_v38  ;;  %v2919_v45 = vpack.c.bf16 %v1745_v39, %v1745_v39  ;;  %v1674_v46 = vmax.f32 %v1252_v40, 0.0  ;;  %v1746_v47 = vmax.f32 %v1540_v41, 0.0 }
 0x1e3   :  { %2394 = vst.msk [vmem:[%s4473_s3 + $0xc8] sm:$0xf] %vm2343_vm0, %v2847_v44  ;;  %2466 = vst.msk [vmem:[%s4473_s3 + $0x1e8] sm:$0xf] %vm2343_vm0, %v2919_v45  ;;  %v2848_v48 = vpack.c.bf16 %v1674_v46, %v1674_v46  ;;  %v2920_v49 = vpack.c.bf16 %v1746_v47, %v1746_v47 }
 0x1e4   :  { %v1256_v50 = vpop.f32.mrb[104].mxu0  ;;  %v1544_v51 = vpop.f32.mrb[104].mxu1 }
 0x1e5   :  { %2395 = vst.msk [vmem:[%s4473_s3 + $0xcc] sm:$0xf] %vm2343_vm0, %v2848_v48  ;;  %2467 = vst.msk [vmem:[%s4473_s3 + $0x1ec] sm:$0xf] %vm2343_vm0, %v2920_v49  ;;  %v1257_v52 = vadd.f32 %v4110_v26, %v1256_v50  ;;  %v1545_v53 = vadd.f32 %v4110_v26, %v1544_v51  ;;  %v1258_v54 = vpop.f32.mrb[105].mxu0  ;;  %v1546_v55 = vpop.f32.mrb[105].mxu1 }
 0x1e6   :  { %v1259_v56 = vpop.f32.mrb[106].mxu0  ;;  %v1547_v57 = vpop.f32.mrb[106].mxu1 }
 0x1e7   :  { %v1675_v58 = vmax.f32 %v1257_v52, 0.0  ;;  %v1747_v59 = vmax.f32 %v1545_v53, 0.0  ;;  %v1260_v60 = vadd.f32 %v4110_v26, %v1259_v56  ;;  %v1548_v61 = vadd.f32 %v4110_v26, %v1547_v57  ;;  %v1261_v62 = vpop.f32.mrb[107].mxu0  ;;  %v1549_v0 = vpop.f32.mrb[107].mxu1 }
 0x1e9   :  { %v2849_v1 = vpack.c.bf16 %v1675_v58, %v1675_v58  ;;  %v2921_v2 = vpack.c.bf16 %v1747_v59, %v1747_v59  ;;  %v1676_v3 = vmax.f32 %v1260_v60, 0.0  ;;  %v1748_v4 = vmax.f32 %v1548_v61, 0.0 }
 0x1eb   :  { %2396 = vst.msk [vmem:[%s4473_s3 + $0xd0] sm:$0xf] %vm2343_vm0, %v2849_v1  ;;  %2468 = vst.msk [vmem:[%s4473_s3 + $0x1f0] sm:$0xf] %vm2343_vm0, %v2921_v2  ;;  %v2850_v5 = vpack.c.bf16 %v1676_v3, %v1676_v3  ;;  %v2922_v6 = vpack.c.bf16 %v1748_v4, %v1748_v4 }
 0x1ec   :  { %v1264_v7 = vpop.f32.mrb[108].mxu0  ;;  %v1552_v8 = vpop.f32.mrb[108].mxu1 }
 0x1ed   :  { %2397 = vst.msk [vmem:[%s4473_s3 + $0xd4] sm:$0xf] %vm2343_vm0, %v2850_v5  ;;  %2469 = vst.msk [vmem:[%s4473_s3 + $0x1f4] sm:$0xf] %vm2343_vm0, %v2922_v6  ;;  %v1265_v9 = vadd.f32 %v4110_v26, %v1264_v7  ;;  %v1553_v10 = vadd.f32 %v4110_v26, %v1552_v8  ;;  %v1266_v11 = vpop.f32.mrb[109].mxu0  ;;  %v1554_v12 = vpop.f32.mrb[109].mxu1 }
 0x1ee   :  { %v1267_v13 = vpop.f32.mrb[110].mxu0  ;;  %v1555_v14 = vpop.f32.mrb[110].mxu1 }
 0x1ef   :  { %v1677_v15 = vmax.f32 %v1265_v9, 0.0  ;;  %v1749_v16 = vmax.f32 %v1553_v10, 0.0  ;;  %v1268_v17 = vadd.f32 %v4110_v26, %v1267_v13  ;;  %v1556_v18 = vadd.f32 %v4110_v26, %v1555_v14  ;;  %v1269_v19 = vpop.f32.mrb[111].mxu0  ;;  %v1557_v20 = vpop.f32.mrb[111].mxu1 }
 0x1f1   :  { %v2851_v21 = vpack.c.bf16 %v1677_v15, %v1677_v15  ;;  %v2923_v22 = vpack.c.bf16 %v1749_v16, %v1749_v16  ;;  %v1678_v23 = vmax.f32 %v1268_v17, 0.0  ;;  %v1750_v24 = vmax.f32 %v1556_v18, 0.0 }
 0x1f3   :  { %2398 = vst.msk [vmem:[%s4473_s3 + $0xd8] sm:$0xf] %vm2343_vm0, %v2851_v21  ;;  %2470 = vst.msk [vmem:[%s4473_s3 + $0x1f8] sm:$0xf] %vm2343_vm0, %v2923_v22  ;;  %v2852_v25 = vpack.c.bf16 %v1678_v23, %v1678_v23  ;;  %v2924_v27 = vpack.c.bf16 %v1750_v24, %v1750_v24 }
 0x1f4   :  { %v1272_v28 = vpop.f32.mrb[112].mxu0  ;;  %v1560_v29 = vpop.f32.mrb[112].mxu1 }
 0x1f5   :  { %2399 = vst.msk [vmem:[%s4473_s3 + $0xdc] sm:$0xf] %vm2343_vm0, %v2852_v25  ;;  %2471 = vst.msk [vmem:[%s4473_s3 + $0x1fc] sm:$0xf] %vm2343_vm0, %v2924_v27  ;;  %v1273_v30 = vadd.f32 %v4110_v26, %v1272_v28  ;;  %v1561_v31 = vadd.f32 %v4110_v26, %v1560_v29  ;;  %v1274_v32 = vpop.f32.mrb[113].mxu0  ;;  %v1562_v63 = vpop.f32.mrb[113].mxu1 }
 0x1f6   :  { %v1275_v33 = vpop.f32.mrb[114].mxu0  ;;  %v1563_v34 = vpop.f32.mrb[114].mxu1 }
 0x1f7   :  { %v1679_v35 = vmax.f32 %v1273_v30, 0.0  ;;  %v1751_v36 = vmax.f32 %v1561_v31, 0.0  ;;  %v1276_v37 = vadd.f32 %v4110_v26, %v1275_v33  ;;  %v1564_v38 = vadd.f32 %v4110_v26, %v1563_v34  ;;  %v1277_v39 = vpop.f32.mrb[115].mxu0  ;;  %v1565_v40 = vpop.f32.mrb[115].mxu1 }
 0x1f9   :  { %v2853_v41 = vpack.c.bf16 %v1679_v35, %v1679_v35  ;;  %v2925_v42 = vpack.c.bf16 %v1751_v36, %v1751_v36  ;;  %v1680_v43 = vmax.f32 %v1276_v37, 0.0  ;;  %v1752_v44 = vmax.f32 %v1564_v38, 0.0 }
 0x1fb   :  { %2400 = vst.msk [vmem:[%s4473_s3 + $0xe0] sm:$0xf] %vm2343_vm0, %v2853_v41  ;;  %2472 = vst.msk [vmem:[%s4473_s3 + $0x200] sm:$0xf] %vm2343_vm0, %v2925_v42  ;;  %v2854_v45 = vpack.c.bf16 %v1680_v43, %v1680_v43  ;;  %v2926_v46 = vpack.c.bf16 %v1752_v44, %v1752_v44 }
 0x1fc   :  { %v1280_v47 = vpop.f32.mrb[116].mxu0  ;;  %v1568_v48 = vpop.f32.mrb[116].mxu1 }
 0x1fd   :  { %2401 = vst.msk [vmem:[%s4473_s3 + $0xe4] sm:$0xf] %vm2343_vm0, %v2854_v45  ;;  %2473 = vst.msk [vmem:[%s4473_s3 + $0x204] sm:$0xf] %vm2343_vm0, %v2926_v46  ;;  %v1281_v49 = vadd.f32 %v4110_v26, %v1280_v47  ;;  %v1569_v50 = vadd.f32 %v4110_v26, %v1568_v48  ;;  %v1282_v51 = vpop.f32.mrb[117].mxu0  ;;  %v1570_v52 = vpop.f32.mrb[117].mxu1 }
 0x1fe   :  { %v1283_v53 = vpop.f32.mrb[118].mxu0  ;;  %v1571_v54 = vpop.f32.mrb[118].mxu1 }
 0x1ff   :  { %v1681_v55 = vmax.f32 %v1281_v49, 0.0  ;;  %v1753_v56 = vmax.f32 %v1569_v50, 0.0  ;;  %v1284_v57 = vadd.f32 %v4110_v26, %v1283_v53  ;;  %v1572_v58 = vadd.f32 %v4110_v26, %v1571_v54  ;;  %v1285_v59 = vpop.f32.mrb[119].mxu0  ;;  %v1573_v60 = vpop.f32.mrb[119].mxu1 }
 0x201   :  { %v2855_v61 = vpack.c.bf16 %v1681_v55, %v1681_v55  ;;  %v2927_v62 = vpack.c.bf16 %v1753_v56, %v1753_v56  ;;  %v1682_v0 = vmax.f32 %v1284_v57, 0.0  ;;  %v1754_v1 = vmax.f32 %v1572_v58, 0.0 }
 0x203   :  { %2402 = vst.msk [vmem:[%s4473_s3 + $0xe8] sm:$0xf] %vm2343_vm0, %v2855_v61  ;;  %2474 = vst.msk [vmem:[%s4473_s3 + $0x208] sm:$0xf] %vm2343_vm0, %v2927_v62  ;;  %v2856_v2 = vpack.c.bf16 %v1682_v0, %v1682_v0  ;;  %v2928_v3 = vpack.c.bf16 %v1754_v1, %v1754_v1 }
 0x204   :  { %v1288_v4 = vpop.f32.mrb[120].mxu0  ;;  %v1576_v5 = vpop.f32.mrb[120].mxu1 }
 0x205   :  { %2403 = vst.msk [vmem:[%s4473_s3 + $0xec] sm:$0xf] %vm2343_vm0, %v2856_v2  ;;  %2475 = vst.msk [vmem:[%s4473_s3 + $0x20c] sm:$0xf] %vm2343_vm0, %v2928_v3  ;;  %v1289_v6 = vadd.f32 %v4110_v26, %v1288_v4  ;;  %v1577_v7 = vadd.f32 %v4110_v26, %v1576_v5  ;;  %v1290_v8 = vpop.f32.mrb[121].mxu0  ;;  %v1578_v9 = vpop.f32.mrb[121].mxu1 }
 0x206   :  { %v1291_v10 = vpop.f32.mrb[122].mxu0  ;;  %v1579_v11 = vpop.f32.mrb[122].mxu1 }
 0x207   :  { %v1683_v12 = vmax.f32 %v1289_v6, 0.0  ;;  %v1755_v13 = vmax.f32 %v1577_v7, 0.0  ;;  %v1292_v14 = vadd.f32 %v4110_v26, %v1291_v10  ;;  %v1580_v15 = vadd.f32 %v4110_v26, %v1579_v11  ;;  %v1293_v16 = vpop.f32.mrb[123].mxu0  ;;  %v1581_v17 = vpop.f32.mrb[123].mxu1 }
 0x209   :  { %v2857_v18 = vpack.c.bf16 %v1683_v12, %v1683_v12  ;;  %v2929_v19 = vpack.c.bf16 %v1755_v13, %v1755_v13  ;;  %v1684_v20 = vmax.f32 %v1292_v14, 0.0  ;;  %v1756_v21 = vmax.f32 %v1580_v15, 0.0 }
 0x20b   :  { %2404 = vst.msk [vmem:[%s4473_s3 + $0xf0] sm:$0xf] %vm2343_vm0, %v2857_v18  ;;  %2476 = vst.msk [vmem:[%s4473_s3 + $0x210] sm:$0xf] %vm2343_vm0, %v2929_v19  ;;  %v2858_v22 = vpack.c.bf16 %v1684_v20, %v1684_v20  ;;  %v2930_v23 = vpack.c.bf16 %v1756_v21, %v1756_v21 }
 0x20c   :  { %v1296_v24 = vpop.f32.mrb[124].mxu0  ;;  %v1584_v25 = vpop.f32.mrb[124].mxu1 }
 0x20d   :  { %2405 = vst.msk [vmem:[%s4473_s3 + $0xf4] sm:$0xf] %vm2343_vm0, %v2858_v22  ;;  %2477 = vst.msk [vmem:[%s4473_s3 + $0x214] sm:$0xf] %vm2343_vm0, %v2930_v23  ;;  %v1297_v27 = vadd.f32 %v4110_v26, %v1296_v24  ;;  %v1585_v28 = vadd.f32 %v4110_v26, %v1584_v25  ;;  %v1298_v29 = vpop.f32.mrb[125].mxu0  ;;  %v1586_v30 = vpop.f32.mrb[125].mxu1 }
 0x20e   :  { %v1299_v31 = vpop.f32.mrb[126].mxu0  ;;  %v1587_v32 = vpop.f32.mrb[126].mxu1 }
 0x20f   :  { %v1685_v63 = vmax.f32 %v1297_v27, 0.0  ;;  %v1757_v33 = vmax.f32 %v1585_v28, 0.0  ;;  %v1300_v34 = vadd.f32 %v4110_v26, %v1299_v31  ;;  %v1588_v35 = vadd.f32 %v4110_v26, %v1587_v32  ;;  %v1301_v36 = vpop.f32.mrb[127].mxu0  ;;  %v1589_v37 = vpop.f32.mrb[127].mxu1 }
 0x211   :  { %v2859_v38 = vpack.c.bf16 %v1685_v63, %v1685_v63  ;;  %v2931_v39 = vpack.c.bf16 %v1757_v33, %v1757_v33  ;;  %v1686_v40 = vmax.f32 %v1300_v34, 0.0  ;;  %v1758_v41 = vmax.f32 %v1588_v35, 0.0 }
 0x213   :  { %2406 = vst.msk [vmem:[%s4473_s3 + $0xf8] sm:$0xf] %vm2343_vm0, %v2859_v38  ;;  %2478 = vst.msk [vmem:[%s4473_s3 + $0x218] sm:$0xf] %vm2343_vm0, %v2931_v39  ;;  %v2860_v42 = vpack.c.bf16 %v1686_v40, %v1686_v40  ;;  %v2932_v43 = vpack.c.bf16 %v1758_v41, %v1758_v41 }
 0x214   :  { %v1304_v44 = vpop.f32.mrb[128].mxu0  ;;  %v1592_v45 = vpop.f32.mrb[128].mxu1 }
 0x215   :  { %2407 = vst.msk [vmem:[%s4473_s3 + $0xfc] sm:$0xf] %vm2343_vm0, %v2860_v42  ;;  %2479 = vst.msk [vmem:[%s4473_s3 + $0x21c] sm:$0xf] %vm2343_vm0, %v2932_v43  ;;  %v1305_v46 = vadd.f32 %v4110_v26, %v1304_v44  ;;  %v1593_v47 = vadd.f32 %v4110_v26, %v1592_v45  ;;  %v1306_v48 = vpop.f32.mrb[129].mxu0  ;;  %v1594_v49 = vpop.f32.mrb[129].mxu1 }
 0x216   :  { %v1307_v50 = vpop.f32.mrb[130].mxu0  ;;  %v1595_v51 = vpop.f32.mrb[130].mxu1 }
 0x217   :  { %v1687_v52 = vmax.f32 %v1305_v46, 0.0  ;;  %v1759_v53 = vmax.f32 %v1593_v47, 0.0  ;;  %v1308_v54 = vadd.f32 %v4110_v26, %v1307_v50  ;;  %v1596_v55 = vadd.f32 %v4110_v26, %v1595_v51  ;;  %v1309_v56 = vpop.f32.mrb[131].mxu0  ;;  %v1597_v57 = vpop.f32.mrb[131].mxu1 }
 0x219   :  { %v2861_v58 = vpack.c.bf16 %v1687_v52, %v1687_v52  ;;  %v2933_v59 = vpack.c.bf16 %v1759_v53, %v1759_v53  ;;  %v1688_v60 = vmax.f32 %v1308_v54, 0.0  ;;  %v1760_v61 = vmax.f32 %v1596_v55, 0.0 }
 0x21b   :  { %2408 = vst.msk [vmem:[%s4473_s3 + $0x100] sm:$0xf] %vm2343_vm0, %v2861_v58  ;;  %2480 = vst.msk [vmem:[%s4473_s3 + $0x220] sm:$0xf] %vm2343_vm0, %v2933_v59  ;;  %v2862_v62 = vpack.c.bf16 %v1688_v60, %v1688_v60  ;;  %v2934_v0 = vpack.c.bf16 %v1760_v61, %v1760_v61 }
 0x21c   :  { %v1312_v1 = vpop.f32.mrb[132].mxu0  ;;  %v1600_v2 = vpop.f32.mrb[132].mxu1 }
 0x21d   :  { %2409 = vst.msk [vmem:[%s4473_s3 + $0x104] sm:$0xf] %vm2343_vm0, %v2862_v62  ;;  %2481 = vst.msk [vmem:[%s4473_s3 + $0x224] sm:$0xf] %vm2343_vm0, %v2934_v0  ;;  %v1313_v3 = vadd.f32 %v4110_v26, %v1312_v1  ;;  %v1601_v4 = vadd.f32 %v4110_v26, %v1600_v2  ;;  %v1314_v5 = vpop.f32.mrb[133].mxu0  ;;  %v1602_v6 = vpop.f32.mrb[133].mxu1 }
 0x21e   :  { %v1315_v7 = vpop.f32.mrb[134].mxu0  ;;  %v1603_v8 = vpop.f32.mrb[134].mxu1 }
 0x21f   :  { %v1689_v9 = vmax.f32 %v1313_v3, 0.0  ;;  %v1761_v10 = vmax.f32 %v1601_v4, 0.0  ;;  %v1316_v11 = vadd.f32 %v4110_v26, %v1315_v7  ;;  %v1604_v12 = vadd.f32 %v4110_v26, %v1603_v8  ;;  %v1317_v13 = vpop.f32.mrb[135].mxu0  ;;  %v1605_v14 = vpop.f32.mrb[135].mxu1 }
 0x221   :  { %v2863_v15 = vpack.c.bf16 %v1689_v9, %v1689_v9  ;;  %v2935_v16 = vpack.c.bf16 %v1761_v10, %v1761_v10  ;;  %v1690_v17 = vmax.f32 %v1316_v11, 0.0  ;;  %v1762_v18 = vmax.f32 %v1604_v12, 0.0 }
 0x223   :  { %2410 = vst.msk [vmem:[%s4473_s3 + $0x108] sm:$0xf] %vm2343_vm0, %v2863_v15  ;;  %2482 = vst.msk [vmem:[%s4473_s3 + $0x228] sm:$0xf] %vm2343_vm0, %v2935_v16  ;;  %v2864_v19 = vpack.c.bf16 %v1690_v17, %v1690_v17  ;;  %v2936_v20 = vpack.c.bf16 %v1762_v18, %v1762_v18 }
 0x224   :  { %v1320_v21 = vpop.f32.mrb[136].mxu0  ;;  %v1608_v22 = vpop.f32.mrb[136].mxu1 }
 0x225   :  { %2411 = vst.msk [vmem:[%s4473_s3 + $0x10c] sm:$0xf] %vm2343_vm0, %v2864_v19  ;;  %2483 = vst.msk [vmem:[%s4473_s3 + $0x22c] sm:$0xf] %vm2343_vm0, %v2936_v20  ;;  %v1321_v23 = vadd.f32 %v4110_v26, %v1320_v21  ;;  %v1609_v24 = vadd.f32 %v4110_v26, %v1608_v22  ;;  %v1322_v25 = vpop.f32.mrb[137].mxu0  ;;  %v1610_v27 = vpop.f32.mrb[137].mxu1 }
 0x226   :  { %v1323_v28 = vpop.f32.mrb[138].mxu0  ;;  %v1611_v29 = vpop.f32.mrb[138].mxu1 }
 0x227   :  { %v1691_v30 = vmax.f32 %v1321_v23, 0.0  ;;  %v1763_v31 = vmax.f32 %v1609_v24, 0.0  ;;  %v1324_v32 = vadd.f32 %v4110_v26, %v1323_v28  ;;  %v1612_v63 = vadd.f32 %v4110_v26, %v1611_v29  ;;  %v1325_v33 = vpop.f32.mrb[139].mxu0  ;;  %v1613_v34 = vpop.f32.mrb[139].mxu1 }
 0x229   :  { %v2865_v35 = vpack.c.bf16 %v1691_v30, %v1691_v30  ;;  %v2937_v36 = vpack.c.bf16 %v1763_v31, %v1763_v31  ;;  %v1692_v37 = vmax.f32 %v1324_v32, 0.0  ;;  %v1764_v38 = vmax.f32 %v1612_v63, 0.0 }
 0x22b   :  { %2412 = vst.msk [vmem:[%s4473_s3 + $0x110] sm:$0xf] %vm2343_vm0, %v2865_v35  ;;  %2484 = vst.msk [vmem:[%s4473_s3 + $0x230] sm:$0xf] %vm2343_vm0, %v2937_v36  ;;  %v2866_v39 = vpack.c.bf16 %v1692_v37, %v1692_v37  ;;  %v2938_v40 = vpack.c.bf16 %v1764_v38, %v1764_v38 }
 0x22c   :  { %v1328_v41 = vpop.f32.mrb[140].mxu0  ;;  %v1616_v42 = vpop.f32.mrb[140].mxu1 }
 0x22d   :  { %2413 = vst.msk [vmem:[%s4473_s3 + $0x114] sm:$0xf] %vm2343_vm0, %v2866_v39  ;;  %2485 = vst.msk [vmem:[%s4473_s3 + $0x234] sm:$0xf] %vm2343_vm0, %v2938_v40  ;;  %v1329_v43 = vadd.f32 %v4110_v26, %v1328_v41  ;;  %v1617_v44 = vadd.f32 %v4110_v26, %v1616_v42  ;;  %v1330_v45 = vpop.f32.mrb[141].mxu0  ;;  %v1618_v46 = vpop.f32.mrb[141].mxu1 }
 0x22e   :  { %v1331_v47 = vpop.f32.mrb[142].mxu0  ;;  %v1619_v48 = vpop.f32.mrb[142].mxu1 }
 0x22f   :  { %v1693_v49 = vmax.f32 %v1329_v43, 0.0  ;;  %v1765_v50 = vmax.f32 %v1617_v44, 0.0  ;;  %v1332_v51 = vadd.f32 %v4110_v26, %v1331_v47  ;;  %v1620_v52 = vadd.f32 %v4110_v26, %v1619_v48  ;;  %v1333_v53 = vpop.f32.mrb[143].mxu0  ;;  %v1621_v54 = vpop.f32.mrb[143].mxu1 }
 0x231   :  { %v2867_v55 = vpack.c.bf16 %v1693_v49, %v1693_v49  ;;  %v2939_v56 = vpack.c.bf16 %v1765_v50, %v1765_v50  ;;  %v1694_v57 = vmax.f32 %v1332_v51, 0.0  ;;  %v1766_v58 = vmax.f32 %v1620_v52, 0.0 }
 0x233   :  { %2414 = vst.msk [vmem:[%s4473_s3 + $0x118] sm:$0xf] %vm2343_vm0, %v2867_v55  ;;  %2486 = vst.msk [vmem:[%s4473_s3 + $0x238] sm:$0xf] %vm2343_vm0, %v2939_v56  ;;  %v2868_v59 = vpack.c.bf16 %v1694_v57, %v1694_v57  ;;  %v2940_v60 = vpack.c.bf16 %v1766_v58, %v1766_v58 }
 0x235   :  { %2415 = vst.msk [vmem:[%s4473_s3 + $0x11c] sm:$0xf] %vm2343_vm0, %v2868_v59  ;;  %2487 = vst.msk [vmem:[%s4473_s3 + $0x23c] sm:$0xf] %vm2343_vm0, %v2940_v60 }

// kernel: qfunc_forward.5
= control target key start
LH: loop header
LB: loop body
LE: loop exit
PB: predicated region body
PF: predicated region fallthrough
CT: control target
= control target key end

     0   :  { %vm654_vm0 = vcmask 257024   ;;  %vm685_vm1 = vcmask 253952   ;;  %s1313_s1 = inlined_call_operand.vmem [shape: bf16[256,32], index: 1, kind: input, shape index: {}]   ;;  %s1314_s0 = inlined_call_operand.vmem [shape: bf16[242,256], index: 0, kind: input, shape index: {}]   ;;  %s1315_s2 = inlined_call_operand.vmem [shape: f32[1,32], index: 2, kind: input, shape index: {}]   ;;  %s1316_s3 = inlined_call_operand.vmem [shape: bf16[242,32], index: 3, kind: output, shape index: {}]  }
   0x1   :  { %v930_v0 = vld [vmem:[%s1313_s1 + $0x40] sm:$0xff]   ;;  %v932_v2 = vld [vmem:[%s1313_s1 + $0x48] sm:$0xff]   ;;  %v934_v4 = vld [vmem:[%s1313_s1 + $0x50] sm:$0xff]  }
   0x2   :  { %v931_v1 = vld [vmem:[%s1313_s1] sm:$0xff]   ;;  %802 = vmatprep.subr.bf16.mxu0 %v930_v0  ;;  %914 = vmatprep.subr.bf16.mxu1 %v930_v0  ;;  %v933_v3 = vld [vmem:[%s1313_s1 + $0x8] sm:$0xff]   ;;  %v935_v5 = vld [vmem:[%s1313_s1 + $0x10] sm:$0xff]  }
   0x3   :  { %803 = vmatpush3.bf16.msra.mxu0 %v931_v1  ;;  %922 = vmatpush3.bf16.msra.mxu1 %v931_v1  ;;  %v936_v6 = vld [vmem:[%s1313_s1 + $0x58] sm:$0xff]   ;;  %v938_v8 = vld [vmem:[%s1313_s1 + $0x60] sm:$0xff]   ;;  %v940_v10 = vld [vmem:[%s1313_s1 + $0x68] sm:$0xff]  }
   0x4   :  { %804 = vmatprep.subr.bf16.mxu0 %v932_v2  ;;  %915 = vmatprep.subr.bf16.mxu1 %v932_v2  ;;  %v937_v7 = vld [vmem:[%s1313_s1 + $0x18] sm:$0xff]   ;;  %v939_v9 = vld [vmem:[%s1313_s1 + $0x20] sm:$0xff]   ;;  %v941_v13 = vld [vmem:[%s1313_s1 + $0x28] sm:$0xff]  }
   0x5   :  { %v948_v11 = vld [vmem:[%s1314_s0 + $0x4] ss:$8 sps:$4 sm:$0xff]   ;;  %v942_v14 = vld [vmem:[%s1313_s1 + $0x70] sm:$0xff]   ;;  %v944_v16 = vld [vmem:[%s1313_s1 + $0x78] sm:$0xff]  }
   0x6   :  { %v951_v12 = vld [vmem:[%s1314_s0 + $0x84] ss:$8 sps:$4 sm:$0xff]   ;;  %370 = vmatprep.mubr.bf16.mxu0 %v948_v11  ;;  %v943_v15 = vld [vmem:[%s1313_s1 + $0x30] sm:$0xff]   ;;  %v945_v17 = vld [vmem:[%s1313_s1 + $0x38] sm:$0xff]  }
   0x7   :  { %805 = vmatpush3.bf16.msra.mxu0 %v933_v3  ;;  %923 = vmatpush3.bf16.msra.mxu1 %v933_v3  ;;  %v946_v18 = vld [vmem:[%s1314_s0] ss:$8 sps:$4 sm:$0xff]   ;;  %v952_v20 = vld [vmem:[%s1314_s0 + $0x14] ss:$8 sps:$4 sm:$0xff]   ;;  %v956_v22 = vld [vmem:[%s1314_s0 + $0x10] ss:$8 sps:$4 sm:$0xff]  }
   0x8   :  { %806 = vmatprep.subr.bf16.mxu0 %v934_v4  ;;  %916 = vmatprep.subr.bf16.mxu1 %v934_v4  ;;  %v949_v19 = vld [vmem:[%s1314_s0 + $0x80] ss:$8 sps:$4 sm:$0xff]   ;;  %v954_v21 = vld [vmem:[%s1314_s0 + $0x94] ss:$8 sps:$4 sm:$0xff]   ;;  %v957_v23 = vld [vmem:[%s1314_s0 + $0x90] ss:$8 sps:$4 sm:$0xff]  }
   0x9   :  { %434 = vmatprep.mubr.bf16.mxu1 %v951_v12  ;;  %v958_v24 = vld [vmem:[%s1314_s0 + $0x24] ss:$8 sps:$4 sm:$0xff]   ;;  %v962_v26 = vld [vmem:[%s1314_s0 + $0x20] ss:$8 sps:$4 sm:$0xff]   ;;  %v964_v28 = vld [vmem:[%s1314_s0 + $0x34] ss:$8 sps:$4 sm:$0xff]  }
   0xa   :  { %v960_v25 = vld [vmem:[%s1314_s0 + $0xa4] ss:$8 sps:$4 sm:$0xff]   ;;  %v963_v27 = vld [vmem:[%s1314_s0 + $0xa0] ss:$8 sps:$4 sm:$0xff]   ;;  %v966_v29 = vld [vmem:[%s1314_s0 + $0xb4] ss:$8 sps:$4 sm:$0xff]  }
   0xb   :  { %807 = vmatpush3.bf16.msra.mxu0 %v935_v5  ;;  %924 = vmatpush3.bf16.msra.mxu1 %v935_v5  ;;  %v968_v30 = vld [vmem:[%s1314_s0 + $0x30] ss:$8 sps:$4 sm:$0xff]   ;;  %v970_v32 = vld [vmem:[%s1314_s0 + $0x44] ss:$8 sps:$4 sm:$0xff]   ;;  %v974_v34 = vld [vmem:[%s1314_s0 + $0x40] ss:$8 sps:$4 sm:$0xff]  }
   0xc   :  { %808 = vmatprep.subr.bf16.mxu0 %v936_v6  ;;  %917 = vmatprep.subr.bf16.mxu1 %v936_v6  ;;  %v969_v31 = vld [vmem:[%s1314_s0 + $0xb0] ss:$8 sps:$4 sm:$0xff]   ;;  %v972_v33 = vld [vmem:[%s1314_s0 + $0xc4] ss:$8 sps:$4 sm:$0xff]   ;;  %v975_v35 = vld [vmem:[%s1314_s0 + $0xc0] ss:$8 sps:$4 sm:$0xff]  }
   0xd   :  { %v976_v36 = vld [vmem:[%s1314_s0 + $0x54] ss:$8 sps:$4 sm:$0xff]   ;;  %v980_v38 = vld [vmem:[%s1314_s0 + $0x50] ss:$8 sps:$4 sm:$0xff]   ;;  %v982_v40 = vld [vmem:[%s1314_s0 + $0x64] ss:$8 sps:$4 sm:$0xff]  }
   0xe   :  { %v978_v37 = vld [vmem:[%s1314_s0 + $0xd4] ss:$8 sps:$4 sm:$0xff]   ;;  %v981_v39 = vld [vmem:[%s1314_s0 + $0xd0] ss:$8 sps:$4 sm:$0xff]   ;;  %v984_v41 = vld [vmem:[%s1314_s0 + $0xe4] ss:$8 sps:$4 sm:$0xff]  }
   0xf   :  { %809 = vmatpush3.bf16.msra.mxu0 %v937_v7  ;;  %925 = vmatpush3.bf16.msra.mxu1 %v937_v7  ;;  %v45_v42 = vld [vmem:[%s1314_s0 + $0xf0] sm:$0x11]  ;;  %v986_v43 = vld [vmem:[%s1314_s0 + $0x60] ss:$8 sps:$4 sm:$0xff]  }
  0x10   :  { %810 = vmatprep.subr.bf16.mxu0 %v938_v8  ;;  %918 = vmatprep.subr.bf16.mxu1 %v938_v8  ;;  %v987_v44 = vld [vmem:[%s1314_s0 + $0xe0] ss:$8 sps:$4 sm:$0xff]   ;;  %v988_v45 = vld [vmem:[%s1314_s0 + $0x74] ss:$8 sps:$4 sm:$0xff]   ;;  %v723_v46 = vcombine.high %v45_v42, %v45_v42  ;;  %v991_v47 = vld [vmem:[%s1314_s0 + $0x70] ss:$8 sps:$4 sm:$0xff]   ;;  %v722_v48 = vcombine.low %v45_v42, %v45_v42 }
  0x11   :  { %v1157_v51 = vld [vmem:[%s1315_s2] ss:$0 sm:$0xff] }
  0x13   :  { %811 = vmatpush3.bf16.msra.mxu0 %v939_v9  ;;  %926 = vmatpush3.bf16.msra.mxu1 %v939_v9 }
  0x14   :  { %812 = vmatprep.subr.bf16.mxu0 %v940_v10  ;;  %919 = vmatprep.subr.bf16.mxu1 %v940_v10 }
  0x17   :  { %813 = vmatpush3.bf16.msra.mxu0 %v941_v13  ;;  %927 = vmatpush3.bf16.msra.mxu1 %v941_v13 }
  0x18   :  { %814 = vmatprep.subr.bf16.mxu0 %v942_v14  ;;  %920 = vmatprep.subr.bf16.mxu1 %v942_v14 }
  0x1b   :  { %815 = vmatpush3.bf16.msra.mxu0 %v943_v15  ;;  %928 = vmatpush3.bf16.msra.mxu1 %v943_v15 }
  0x1c   :  { %816 = vmatprep.subr.bf16.mxu0 %v944_v16  ;;  %921 = vmatprep.subr.bf16.mxu1 %v944_v16 }
  0x1f   :  { %817 = vmatpush3.bf16.msra.mxu0 %v945_v17  ;;  %929 = vmatpush3.bf16.msra.mxu1 %v945_v17 }
  0x22   :  { %371 = vmatmul.mubr.bf16.vlgmr.msra.gmra.mrb[0].mxu0 %v946_v18  ;;  %435 = vmatmul.mubr.bf16.vlgmr.msra.gmra.mrb[0].mxu1 %v949_v19 }
  0x23   :  { %378 = vmatprep.mubr.bf16.mxu0 %v952_v20  ;;  %442 = vmatprep.mubr.bf16.mxu1 %v954_v21 }
  0x2a   :  { %379 = vmatmul.mubr.bf16.gmra.mrb[4].mxu0 %v956_v22  ;;  %443 = vmatmul.mubr.bf16.gmra.mrb[4].mxu1 %v957_v23 }
  0x2b   :  { %386 = vmatprep.mubr.bf16.mxu0 %v958_v24  ;;  %450 = vmatprep.mubr.bf16.mxu1 %v960_v25 }
  0x32   :  { %387 = vmatmul.mubr.bf16.gmra.mrb[8].mxu0 %v962_v26  ;;  %451 = vmatmul.mubr.bf16.gmra.mrb[8].mxu1 %v963_v27 }
  0x33   :  { %394 = vmatprep.mubr.bf16.mxu0 %v964_v28  ;;  %458 = vmatprep.mubr.bf16.mxu1 %v966_v29 }
  0x3a   :  { %395 = vmatmul.mubr.bf16.gmra.mrb[12].mxu0 %v968_v30  ;;  %459 = vmatmul.mubr.bf16.gmra.mrb[12].mxu1 %v969_v31 }
  0x3b   :  { %402 = vmatprep.mubr.bf16.mxu0 %v970_v32  ;;  %466 = vmatprep.mubr.bf16.mxu1 %v972_v33 }
  0x42   :  { %403 = vmatmul.mubr.bf16.gmra.mrb[16].mxu0 %v974_v34  ;;  %467 = vmatmul.mubr.bf16.gmra.mrb[16].mxu1 %v975_v35 }
  0x43   :  { %410 = vmatprep.mubr.bf16.mxu0 %v976_v36  ;;  %474 = vmatprep.mubr.bf16.mxu1 %v978_v37 }
  0x4a   :  { %411 = vmatmul.mubr.bf16.gmra.mrb[20].mxu0 %v980_v38  ;;  %475 = vmatmul.mubr.bf16.gmra.mrb[20].mxu1 %v981_v39 }
  0x4b   :  { %418 = vmatprep.mubr.bf16.mxu0 %v982_v40  ;;  %482 = vmatprep.mubr.bf16.mxu1 %v984_v41 }
  0x52   :  { %419 = vmatmul.mubr.bf16.gmra.mrb[24].mxu0 %v986_v43  ;;  %483 = vmatmul.mubr.bf16.gmra.mrb[24].mxu1 %v987_v44 }
  0x53   :  { %426 = vmatprep.mubr.bf16.mxu0 %v988_v45  ;;  %490 = vmatprep.mubr.bf16.mxu1 %v723_v46 }
  0x5a   :  { %427 = vmatmul.mubr.bf16.gmra.mrb[28].mxu0 %v991_v47  ;;  %491 = vmatmul.mubr.bf16.gmra.mrb[28].mxu1 %v722_v48 }
  0xf5   :  { %v818_v49 = vpop.f32.mrb[0].mxu0  ;;  %v866_v50 = vpop.f32.mrb[0].mxu1 }
  0xf6   :  { %v819_v52 = vpop.f32.mrb[1].mxu0  ;;  %v867_v53 = vpop.f32.mrb[1].mxu1 }
  0xf7   :  { %v820_v54 = vadd.f32 %v819_v52, %v818_v49  ;;  %v868_v55 = vadd.f32 %v867_v53, %v866_v50  ;;  %v821_v56 = vpop.f32.mrb[2].mxu0  ;;  %v869_v57 = vpop.f32.mrb[2].mxu1 }
  0xf8   :  { %v822_v58 = vpop.f32.mrb[3].mxu0  ;;  %v870_v59 = vpop.f32.mrb[3].mxu1 }
  0xf9   :  { %v373_v60 = vadd.f32 %v820_v54, %v1157_v51  ;;  %v437_v61 = vadd.f32 %v868_v55, %v1157_v51  ;;  %v823_v62 = vadd.f32 %v822_v58, %v821_v56  ;;  %v871_v63 = vadd.f32 %v870_v59, %v869_v57 }
  0xfb   :  { %v498_v0 = vmax.f32 %v373_v60, 0.0  ;;  %v514_v1 = vmax.f32 %v437_v61, 0.0  ;;  %v376_v2 = vadd.f32 %v823_v62, %v1157_v51  ;;  %v440_v3 = vadd.f32 %v871_v63, %v1157_v51 }
  0xfd   :  { %v771_v4 = vpack.c.bf16 %v498_v0, %v498_v0  ;;  %v787_v5 = vpack.c.bf16 %v514_v1, %v514_v1  ;;  %v499_v6 = vmax.f32 %v376_v2, 0.0  ;;  %v515_v7 = vmax.f32 %v440_v3, 0.0  ;;  %v824_v8 = vpop.f32.mrb[4].mxu0  ;;  %v872_v9 = vpop.f32.mrb[4].mxu1 }
  0xfe   :  { %v825_v10 = vpop.f32.mrb[5].mxu0  ;;  %v873_v11 = vpop.f32.mrb[5].mxu1 }
  0xff   :  { %655 = vst.msk [vmem:[%s1316_s3] sm:$0xf] %vm654_vm0, %v771_v4  ;;  %671 = vst.msk [vmem:[%s1316_s3 + $0x40] sm:$0xf] %vm654_vm0, %v787_v5  ;;  %v772_v12 = vpack.c.bf16 %v499_v6, %v499_v6  ;;  %v788_v13 = vpack.c.bf16 %v515_v7, %v515_v7  ;;  %v826_v14 = vadd.f32 %v825_v10, %v824_v8  ;;  %v827_v16 = vpop.f32.mrb[6].mxu0  ;;  %v875_v17 = vpop.f32.mrb[6].mxu1 }
 0x100   :  { %v874_v15 = vadd.f32 %v873_v11, %v872_v9  ;;  %v828_v18 = vpop.f32.mrb[7].mxu0  ;;  %v876_v19 = vpop.f32.mrb[7].mxu1 }
 0x101   :  { %656 = vst.msk [vmem:[%s1316_s3 + $0x4] sm:$0xf] %vm654_vm0, %v772_v12  ;;  %672 = vst.msk [vmem:[%s1316_s3 + $0x44] sm:$0xf] %vm654_vm0, %v788_v13  ;;  %v381_v20 = vadd.f32 %v826_v14, %v1157_v51  ;;  %v829_v22 = vadd.f32 %v828_v18, %v827_v16  ;;  %v877_v23 = vadd.f32 %v876_v19, %v875_v17 }
 0x102   :  { %v445_v21 = vadd.f32 %v874_v15, %v1157_v51 }
 0x103   :  { %v500_v24 = vmax.f32 %v381_v20, 0.0  ;;  %v384_v26 = vadd.f32 %v829_v22, %v1157_v51  ;;  %v448_v27 = vadd.f32 %v877_v23, %v1157_v51 }
 0x104   :  { %v516_v25 = vmax.f32 %v445_v21, 0.0 }
 0x105   :  { %v773_v28 = vpack.c.bf16 %v500_v24, %v500_v24  ;;  %v501_v30 = vmax.f32 %v384_v26, 0.0  ;;  %v517_v31 = vmax.f32 %v448_v27, 0.0  ;;  %v830_v32 = vpop.f32.mrb[8].mxu0  ;;  %v878_v33 = vpop.f32.mrb[8].mxu1 }
 0x106   :  { %v789_v29 = vpack.c.bf16 %v516_v25, %v516_v25  ;;  %v831_v34 = vpop.f32.mrb[9].mxu0  ;;  %v879_v35 = vpop.f32.mrb[9].mxu1 }
 0x107   :  { %657 = vst.msk [vmem:[%s1316_s3 + $0x8] sm:$0xf] %vm654_vm0, %v773_v28  ;;  %v774_v36 = vpack.c.bf16 %v501_v30, %v501_v30  ;;  %v790_v37 = vpack.c.bf16 %v517_v31, %v517_v31  ;;  %v832_v38 = vadd.f32 %v831_v34, %v830_v32  ;;  %v880_v39 = vadd.f32 %v879_v35, %v878_v33  ;;  %v833_v40 = vpop.f32.mrb[10].mxu0  ;;  %v881_v41 = vpop.f32.mrb[10].mxu1 }
 0x108   :  { %673 = vst.msk [vmem:[%s1316_s3 + $0x48] sm:$0xf] %vm654_vm0, %v789_v29  ;;  %v834_v42 = vpop.f32.mrb[11].mxu0  ;;  %v882_v43 = vpop.f32.mrb[11].mxu1 }
 0x109   :  { %658 = vst.msk [vmem:[%s1316_s3 + $0xc] sm:$0xf] %vm654_vm0, %v774_v36  ;;  %674 = vst.msk [vmem:[%s1316_s3 + $0x4c] sm:$0xf] %vm654_vm0, %v790_v37  ;;  %v389_v44 = vadd.f32 %v832_v38, %v1157_v51  ;;  %v453_v45 = vadd.f32 %v880_v39, %v1157_v51  ;;  %v835_v46 = vadd.f32 %v834_v42, %v833_v40 }
 0x10a   :  { %v883_v47 = vadd.f32 %v882_v43, %v881_v41 }
 0x10b   :  { %v502_v48 = vmax.f32 %v389_v44, 0.0  ;;  %v518_v49 = vmax.f32 %v453_v45, 0.0  ;;  %v392_v50 = vadd.f32 %v835_v46, %v1157_v51 }
 0x10c   :  { %v456_v52 = vadd.f32 %v883_v47, %v1157_v51 }
 0x10d   :  { %v775_v53 = vpack.c.bf16 %v502_v48, %v502_v48  ;;  %v791_v54 = vpack.c.bf16 %v518_v49, %v518_v49  ;;  %v503_v55 = vmax.f32 %v392_v50, 0.0  ;;  %v836_v57 = vpop.f32.mrb[12].mxu0  ;;  %v884_v58 = vpop.f32.mrb[12].mxu1 }
 0x10e   :  { %v519_v56 = vmax.f32 %v456_v52, 0.0  ;;  %v837_v59 = vpop.f32.mrb[13].mxu0  ;;  %v885_v60 = vpop.f32.mrb[13].mxu1 }
 0x10f   :  { %659 = vst.msk [vmem:[%s1316_s3 + $0x10] sm:$0xf] %vm654_vm0, %v775_v53  ;;  %675 = vst.msk [vmem:[%s1316_s3 + $0x50] sm:$0xf] %vm654_vm0, %v791_v54  ;;  %v776_v61 = vpack.c.bf16 %v503_v55, %v503_v55  ;;  %v838_v63 = vadd.f32 %v837_v59, %v836_v57  ;;  %v886_v0 = vadd.f32 %v885_v60, %v884_v58  ;;  %v839_v1 = vpop.f32.mrb[14].mxu0  ;;  %v887_v2 = vpop.f32.mrb[14].mxu1 }
 0x110   :  { %v792_v62 = vpack.c.bf16 %v519_v56, %v519_v56  ;;  %v840_v3 = vpop.f32.mrb[15].mxu0  ;;  %v888_v4 = vpop.f32.mrb[15].mxu1 }
 0x111   :  { %660 = vst.msk [vmem:[%s1316_s3 + $0x14] sm:$0xf] %vm654_vm0, %v776_v61  ;;  %v397_v5 = vadd.f32 %v838_v63, %v1157_v51  ;;  %v461_v6 = vadd.f32 %v886_v0, %v1157_v51  ;;  %v841_v7 = vadd.f32 %v840_v3, %v839_v1  ;;  %v889_v8 = vadd.f32 %v888_v4, %v887_v2 }
 0x112   :  { %676 = vst.msk [vmem:[%s1316_s3 + $0x54] sm:$0xf] %vm654_vm0, %v792_v62 }
 0x113   :  { %v504_v9 = vmax.f32 %v397_v5, 0.0  ;;  %v520_v10 = vmax.f32 %v461_v6, 0.0  ;;  %v400_v11 = vadd.f32 %v841_v7, %v1157_v51  ;;  %v464_v12 = vadd.f32 %v889_v8, %v1157_v51 }
 0x115   :  { %v777_v13 = vpack.c.bf16 %v504_v9, %v504_v9  ;;  %v793_v14 = vpack.c.bf16 %v520_v10, %v520_v10  ;;  %v505_v15 = vmax.f32 %v400_v11, 0.0  ;;  %v521_v16 = vmax.f32 %v464_v12, 0.0  ;;  %v842_v17 = vpop.f32.mrb[16].mxu0  ;;  %v890_v18 = vpop.f32.mrb[16].mxu1 }
 0x116   :  { %v843_v19 = vpop.f32.mrb[17].mxu0  ;;  %v891_v20 = vpop.f32.mrb[17].mxu1 }
 0x117   :  { %661 = vst.msk [vmem:[%s1316_s3 + $0x18] sm:$0xf] %vm654_vm0, %v777_v13  ;;  %677 = vst.msk [vmem:[%s1316_s3 + $0x58] sm:$0xf] %vm654_vm0, %v793_v14  ;;  %v778_v21 = vpack.c.bf16 %v505_v15, %v505_v15  ;;  %v794_v22 = vpack.c.bf16 %v521_v16, %v521_v16  ;;  %v844_v23 = vadd.f32 %v843_v19, %v842_v17  ;;  %v845_v25 = vpop.f32.mrb[18].mxu0  ;;  %v893_v26 = vpop.f32.mrb[18].mxu1 }
 0x118   :  { %v892_v24 = vadd.f32 %v891_v20, %v890_v18  ;;  %v846_v27 = vpop.f32.mrb[19].mxu0  ;;  %v894_v28 = vpop.f32.mrb[19].mxu1 }
 0x119   :  { %662 = vst.msk [vmem:[%s1316_s3 + $0x1c] sm:$0xf] %vm654_vm0, %v778_v21  ;;  %678 = vst.msk [vmem:[%s1316_s3 + $0x5c] sm:$0xf] %vm654_vm0, %v794_v22  ;;  %v405_v29 = vadd.f32 %v844_v23, %v1157_v51  ;;  %v847_v31 = vadd.f32 %v846_v27, %v845_v25  ;;  %v895_v32 = vadd.f32 %v894_v28, %v893_v26 }
 0x11a   :  { %v469_v30 = vadd.f32 %v892_v24, %v1157_v51 }
 0x11b   :  { %v506_v33 = vmax.f32 %v405_v29, 0.0  ;;  %v408_v35 = vadd.f32 %v847_v31, %v1157_v51  ;;  %v472_v36 = vadd.f32 %v895_v32, %v1157_v51 }
 0x11c   :  { %v522_v34 = vmax.f32 %v469_v30, 0.0 }
 0x11d   :  { %v779_v37 = vpack.c.bf16 %v506_v33, %v506_v33  ;;  %v507_v39 = vmax.f32 %v408_v35, 0.0  ;;  %v523_v40 = vmax.f32 %v472_v36, 0.0  ;;  %v848_v41 = vpop.f32.mrb[20].mxu0  ;;  %v896_v42 = vpop.f32.mrb[20].mxu1 }
 0x11e   :  { %v795_v38 = vpack.c.bf16 %v522_v34, %v522_v34  ;;  %v849_v43 = vpop.f32.mrb[21].mxu0  ;;  %v897_v44 = vpop.f32.mrb[21].mxu1 }
 0x11f   :  { %663 = vst.msk [vmem:[%s1316_s3 + $0x20] sm:$0xf] %vm654_vm0, %v779_v37  ;;  %v780_v45 = vpack.c.bf16 %v507_v39, %v507_v39  ;;  %v796_v46 = vpack.c.bf16 %v523_v40, %v523_v40  ;;  %v850_v47 = vadd.f32 %v849_v43, %v848_v41  ;;  %v898_v48 = vadd.f32 %v897_v44, %v896_v42  ;;  %v851_v49 = vpop.f32.mrb[22].mxu0  ;;  %v899_v50 = vpop.f32.mrb[22].mxu1 }
 0x120   :  { %679 = vst.msk [vmem:[%s1316_s3 + $0x60] sm:$0xf] %vm654_vm0, %v795_v38  ;;  %v852_v52 = vpop.f32.mrb[23].mxu0  ;;  %v900_v53 = vpop.f32.mrb[23].mxu1 }
 0x121   :  { %664 = vst.msk [vmem:[%s1316_s3 + $0x24] sm:$0xf] %vm654_vm0, %v780_v45  ;;  %680 = vst.msk [vmem:[%s1316_s3 + $0x64] sm:$0xf] %vm654_vm0, %v796_v46  ;;  %v413_v54 = vadd.f32 %v850_v47, %v1157_v51  ;;  %v477_v55 = vadd.f32 %v898_v48, %v1157_v51  ;;  %v853_v56 = vadd.f32 %v852_v52, %v851_v49 }
 0x122   :  { %v901_v57 = vadd.f32 %v900_v53, %v899_v50 }
 0x123   :  { %v508_v58 = vmax.f32 %v413_v54, 0.0  ;;  %v524_v59 = vmax.f32 %v477_v55, 0.0  ;;  %v416_v60 = vadd.f32 %v853_v56, %v1157_v51 }
 0x124   :  { %v480_v61 = vadd.f32 %v901_v57, %v1157_v51 }
 0x125   :  { %v781_v62 = vpack.c.bf16 %v508_v58, %v508_v58  ;;  %v797_v63 = vpack.c.bf16 %v524_v59, %v524_v59  ;;  %v509_v0 = vmax.f32 %v416_v60, 0.0  ;;  %v854_v2 = vpop.f32.mrb[24].mxu0  ;;  %v902_v3 = vpop.f32.mrb[24].mxu1 }
 0x126   :  { %v525_v1 = vmax.f32 %v480_v61, 0.0  ;;  %v855_v4 = vpop.f32.mrb[25].mxu0  ;;  %v903_v5 = vpop.f32.mrb[25].mxu1 }
 0x127   :  { %665 = vst.msk [vmem:[%s1316_s3 + $0x28] sm:$0xf] %vm654_vm0, %v781_v62  ;;  %681 = vst.msk [vmem:[%s1316_s3 + $0x68] sm:$0xf] %vm654_vm0, %v797_v63  ;;  %v782_v6 = vpack.c.bf16 %v509_v0, %v509_v0  ;;  %v856_v8 = vadd.f32 %v855_v4, %v854_v2  ;;  %v904_v9 = vadd.f32 %v903_v5, %v902_v3  ;;  %v857_v10 = vpop.f32.mrb[26].mxu0  ;;  %v905_v11 = vpop.f32.mrb[26].mxu1 }
 0x128   :  { %v798_v7 = vpack.c.bf16 %v525_v1, %v525_v1  ;;  %v858_v12 = vpop.f32.mrb[27].mxu0  ;;  %v906_v13 = vpop.f32.mrb[27].mxu1 }
 0x129   :  { %666 = vst.msk [vmem:[%s1316_s3 + $0x2c] sm:$0xf] %vm654_vm0, %v782_v6  ;;  %v421_v14 = vadd.f32 %v856_v8, %v1157_v51  ;;  %v485_v15 = vadd.f32 %v904_v9, %v1157_v51  ;;  %v859_v16 = vadd.f32 %v858_v12, %v857_v10  ;;  %v907_v17 = vadd.f32 %v906_v13, %v905_v11 }
 0x12a   :  { %682 = vst.msk [vmem:[%s1316_s3 + $0x6c] sm:$0xf] %vm654_vm0, %v798_v7 }
 0x12b   :  { %v510_v18 = vmax.f32 %v421_v14, 0.0  ;;  %v526_v19 = vmax.f32 %v485_v15, 0.0  ;;  %v424_v20 = vadd.f32 %v859_v16, %v1157_v51  ;;  %v488_v21 = vadd.f32 %v907_v17, %v1157_v51 }
 0x12d   :  { %v783_v22 = vpack.c.bf16 %v510_v18, %v510_v18  ;;  %v799_v23 = vpack.c.bf16 %v526_v19, %v526_v19  ;;  %v511_v24 = vmax.f32 %v424_v20, 0.0  ;;  %v527_v25 = vmax.f32 %v488_v21, 0.0  ;;  %v860_v26 = vpop.f32.mrb[28].mxu0  ;;  %v908_v27 = vpop.f32.mrb[28].mxu1 }
 0x12e   :  { %v861_v28 = vpop.f32.mrb[29].mxu0  ;;  %v909_v29 = vpop.f32.mrb[29].mxu1 }
 0x12f   :  { %667 = vst.msk [vmem:[%s1316_s3 + $0x30] sm:$0xf] %vm654_vm0, %v783_v22  ;;  %683 = vst.msk [vmem:[%s1316_s3 + $0x70] sm:$0xf] %vm654_vm0, %v799_v23  ;;  %v784_v30 = vpack.c.bf16 %v511_v24, %v511_v24  ;;  %v800_v31 = vpack.c.bf16 %v527_v25, %v527_v25  ;;  %v862_v32 = vadd.f32 %v861_v28, %v860_v26  ;;  %v863_v34 = vpop.f32.mrb[30].mxu0  ;;  %v911_v35 = vpop.f32.mrb[30].mxu1 }
 0x130   :  { %v910_v33 = vadd.f32 %v909_v29, %v908_v27  ;;  %v864_v36 = vpop.f32.mrb[31].mxu0  ;;  %v912_v37 = vpop.f32.mrb[31].mxu1 }
 0x131   :  { %668 = vst.msk [vmem:[%s1316_s3 + $0x34] sm:$0xf] %vm654_vm0, %v784_v30  ;;  %684 = vst.msk [vmem:[%s1316_s3 + $0x74] sm:$0xf] %vm654_vm0, %v800_v31  ;;  %v429_v38 = vadd.f32 %v862_v32, %v1157_v51  ;;  %v865_v40 = vadd.f32 %v864_v36, %v863_v34 }
 0x132   :  { %v493_v39 = vadd.f32 %v910_v33, %v1157_v51 }
 0x133   :  { %v512_v41 = vmax.f32 %v429_v38, 0.0  ;;  %v432_v43 = vadd.f32 %v865_v40, %v1157_v51 }
 0x134   :  { %v528_v42 = vmax.f32 %v493_v39, 0.0 }
 0x135   :  { %v785_v44 = vpack.c.bf16 %v512_v41, %v512_v41  ;;  %v513_v46 = vmax.f32 %v432_v43, 0.0 }
 0x136   :  { %v801_v45 = vpack.c.bf16 %v528_v42, %v528_v42 }
 0x137   :  { %669 = vst.msk [vmem:[%s1316_s3 + $0x38] sm:$0xf] %vm654_vm0, %v785_v44  ;;  %v786_v47 = vpack.c.bf16 %v513_v46, %v513_v46 }
 0x138   :  { %686 = vst.msk [vmem:[%s1316_s3 + $0x78] sm:$0x1] %vm685_vm1, %v801_v45 }
 0x139   :  { %670 = vst.msk [vmem:[%s1316_s3 + $0x3c] sm:$0xf] %vm654_vm0, %v786_v47 }

// kernel: qfunc_forward.6
= control target key start
LH: loop header
LB: loop body
LE: loop exit
PB: predicated region body
PF: predicated region fallthrough
CT: control target
= control target key end

     0   :  { %vm241_vm0 = vcmask 261120   ;;  %vm432_vm1 = vcmask 523264   ;;  %vm545_vm2 = vcmask 257024   ;;  %vm552_vm3 = vcmask 253952   ;;  %s905_s1 = inlined_call_operand.vmem [shape: bf16[288,64], index: 1, kind: input, shape index: {}]   ;;  %s906_s0 = inlined_call_operand.vmem [shape: bf16[50,288], index: 0, kind: input, shape index: {}]   ;;  %s907_s3 = inlined_call_operand.vmem [shape: bf16[64,32], index: 3, kind: input, shape index: {}]   ;;  %s908_s2 = inlined_call_operand.vmem [shape: f32[1,64], index: 2, kind: input, shape index: {}]   ;;  %s909_s4 = inlined_call_operand.vmem [shape: f32[1,32], index: 4, kind: input, shape index: {}]   ;;  %s910_s5 = inlined_call_operand.vmem [shape: bf16[50,32], index: 5, kind: output, shape index: {}]  }
   0x1   :  { %v698_v0 = vld [vmem:[%s905_s1 + $0x40] sm:$0xff]   ;;  %v700_v2 = vld [vmem:[%s905_s1 + $0x48] sm:$0xff]   ;;  %v702_v4 = vld [vmem:[%s905_s1 + $0x50] sm:$0xff]  }
   0x2   :  { %v699_v1 = vld [vmem:[%s905_s1] sm:$0xff]   ;;  %616 = vmatprep.subr.bf16.mxu0 %v698_v0  ;;  %v701_v3 = vld [vmem:[%s905_s1 + $0x8] sm:$0xff]   ;;  %v703_v5 = vld [vmem:[%s905_s1 + $0x10] sm:$0xff]  }
   0x3   :  { %617 = vmatpush3.bf16.msra.mxu0 %v699_v1  ;;  %v704_v6 = vld [vmem:[%s905_s1 + $0x58] sm:$0xff]   ;;  %v706_v8 = vld [vmem:[%s905_s1 + $0x60] sm:$0xff]   ;;  %v708_v11 = vld [vmem:[%s905_s1 + $0x68] sm:$0xff]  }
   0x4   :  { %618 = vmatprep.subr.bf16.mxu0 %v700_v2  ;;  %v705_v7 = vld [vmem:[%s905_s1 + $0x18] sm:$0xff]   ;;  %v707_v9 = vld [vmem:[%s905_s1 + $0x20] sm:$0xff]   ;;  %v709_v12 = vld [vmem:[%s905_s1 + $0x28] sm:$0xff]  }
   0x5   :  { %v713_v10 = vld [vmem:[%s905_s1 + $0x80] sm:$0xff]   ;;  %v710_v13 = vld [vmem:[%s905_s1 + $0x70] sm:$0xff]   ;;  %v718_v15 = vld [vmem:[%s905_s1 + $0x88] sm:$0xff]  }
   0x6   :  { %670 = vmatprep.subr.bf16.mxu1 %v713_v10  ;;  %v717_v14 = vld [vmem:[%s906_s0 + $0x4] ss:$12 sps:$4 sm:$0xff]   ;;  %v719_v16 = vld [vmem:[%s906_s0 + $0x8] ss:$12 sps:$4 sm:$0xff]   ;;  %v720_v17 = vld [vmem:[%s906_s0 + $0x20] ss:$12 sps:$4 sm:$0xff]  }
   0x7   :  { %619 = vmatpush3.bf16.msra.mxu0 %v701_v3  ;;  %671 = vmatpush3.bf16.msra.mxu1 %v713_v10  ;;  %v711_v18 = vld [vmem:[%s905_s1 + $0x30] sm:$0xff]   ;;  %v712_v19 = vld [vmem:[%s905_s1 + $0x78] sm:$0xff]   ;;  %v715_v23 = vld [vmem:[%s906_s0] ss:$12 sps:$4 sm:$0xff]  }
   0x8   :  { %620 = vmatprep.subr.bf16.mxu0 %v702_v4  ;;  %286 = vmatprep.mubr.bf16.mxu0 %v717_v14  ;;  %v727_v20 = vld [vmem:[%s906_s0 + $0x38] ss:$12 sps:$4 sm:$0xff]   ;;  %v728_v22 = vld [vmem:[%s906_s0 + $0x50] ss:$0 sps:$4 sm:$0x11]   ;;  %v732_v32 = vld [vmem:[%s907_s3 + $0x8] sm:$0xff]  }
   0x9   :  { %672 = vmatprep.subr.bf16.mxu1 %v718_v15  ;;  %674 = vmatprep.mubr.msk.bf16.mxu1 %vm241_vm0, %v719_v16  ;;  %v714_v21 = vld [vmem:[%s905_s1 + $0x38] sm:$0xff]   ;;  %v724_v26 = vld [vmem:[%s906_s0 + $0x34] ss:$12 sps:$4 sm:$0xff]   ;;  %v33_v27 = vld [vmem:[%s906_s0 + $0x48] sm:$0x11] }
   0xa   :  { %v721_v24 = vld [vmem:[%s906_s0 + $0x1c] ss:$12 sps:$4 sm:$0xff]   ;;  %v723_v25 = vld [vmem:[%s906_s0 + $0x18] ss:$12 sps:$4 sm:$0xff]   ;;  %v569_v29 = vcombine.high %v33_v27, %v33_v27  ;;  %v568_v30 = vcombine.low %v33_v27, %v33_v27  ;;  %v733_v33 = vld [vmem:[%s907_s3 + $0x10] sm:$0xff]  }
   0xb   :  { %621 = vmatpush3.bf16.msra.mxu0 %v703_v5  ;;  %673 = vmatpush3.bf16.msra.mxu1 %v718_v15  ;;  %v726_v28 = vld [vmem:[%s906_s0 + $0x30] ss:$12 sps:$4 sm:$0xff]   ;;  %v731_v31 = vld [vmem:[%s907_s3] sm:$0xff]  }
   0xc   :  { %622 = vmatprep.subr.bf16.mxu0 %v704_v6  ;;  %682 = vmatprep.subr.bf16.mxu1 %v731_v31  ;;  %v734_v34 = vld [vmem:[%s907_s3 + $0x18] sm:$0xff]   ;;  %v558_v43 = vld [vmem:[%s908_s2] ss:$0 sm:$0xff] }
   0xe   :  { %675 = vmatmul.mubr.msk.bf16.vlgmr.msra.gmra.mrb[0].mxu1 %vm241_vm0, %v720_v17 }
   0xf   :  { %623 = vmatpush3.bf16.msra.mxu0 %v705_v7  ;;  %678 = vmatprep.mubr.msk.bf16.mxu1 %vm241_vm0, %v727_v20 }
  0x10   :  { %624 = vmatprep.subr.bf16.mxu0 %v706_v8  ;;  %683 = vmatpush3.bf16.msra.mxu1 %v731_v31 }
  0x11   :  { %684 = vmatprep.subr.bf16.mxu1 %v732_v32 }
  0x13   :  { %625 = vmatpush3.bf16.msra.mxu0 %v707_v9 }
  0x14   :  { %626 = vmatprep.subr.bf16.mxu0 %v708_v11  ;;  %685 = vmatpush3.bf16.msra.mxu1 %v732_v32 }
  0x15   :  { %686 = vmatprep.subr.bf16.mxu1 %v733_v33 }
  0x16   :  { %679 = vmatmul.mubr.msk.bf16.gmra.mrb[4].mxu1 %vm241_vm0, %v728_v22 }
  0x17   :  { %627 = vmatpush3.bf16.msra.mxu0 %v709_v12 }
  0x18   :  { %628 = vmatprep.subr.bf16.mxu0 %v710_v13  ;;  %687 = vmatpush3.bf16.msra.mxu1 %v733_v33 }
  0x19   :  { %688 = vmatprep.subr.bf16.mxu1 %v734_v34 }
  0x1b   :  { %629 = vmatpush3.bf16.msra.mxu0 %v711_v18 }
  0x1c   :  { %630 = vmatprep.subr.bf16.mxu0 %v712_v19  ;;  %689 = vmatpush3.bf16.msra.mxu1 %v734_v34 }
  0x1f   :  { %631 = vmatpush3.bf16.msra.mxu0 %v714_v21 }
  0x22   :  { %287 = vmatmul.mubr.bf16.vlgmr.msra.gmra.mrb[0].mxu0 %v715_v23 }
  0x23   :  { %294 = vmatprep.mubr.bf16.mxu0 %v721_v24 }
  0x2a   :  { %295 = vmatmul.mubr.bf16.gmra.mrb[4].mxu0 %v723_v25 }
  0x2b   :  { %302 = vmatprep.mubr.bf16.mxu0 %v724_v26 }
  0x32   :  { %303 = vmatmul.mubr.bf16.gmra.mrb[8].mxu0 %v726_v28  ;;  %v593_v28 = vld [vmem:[%s909_s4] ss:$0 sm:$0xff] }
  0x33   :  { %310 = vmatprep.mubr.bf16.mxu0 %v569_v29 }
  0x3a   :  { %311 = vmatmul.mubr.bf16.gmra.mrb[12].mxu0 %v568_v30 }
  0xe1   :  { %v676_v35 = vpop.f32.mrb[0].mxu1 }
  0xe2   :  { %v352_v36 = vpop.f32.mrb[1].mxu1 }
  0xe3   :  { %v677_v37 = vpop.f32.mrb[2].mxu1 }
  0xe4   :  { %v355_v38 = vpop.f32.mrb[3].mxu1 }
  0xe9   :  { %v680_v39 = vpop.f32.mrb[4].mxu1 }
  0xea   :  { %v368_v41 = vpop.f32.mrb[5].mxu1 }
  0xeb   :  { %v681_v44 = vpop.f32.mrb[6].mxu1 }
  0xec   :  { %v371_v47 = vpop.f32.mrb[7].mxu1 }
  0xf5   :  { %v632_v40 = vpop.f32.mrb[0].mxu0 }
  0xf6   :  { %v633_v42 = vpop.f32.mrb[1].mxu0 }
  0xf7   :  { %v634_v45 = vadd.f32 %v633_v42, %v632_v40  ;;  %v635_v46 = vpop.f32.mrb[2].mxu0 }
  0xf8   :  { %v636_v48 = vpop.f32.mrb[3].mxu0 }
  0xf9   :  { %v637_v49 = vadd.f32 %v636_v48, %v635_v46  ;;  %v289_v50 = vadd.f32 %v634_v45, %v558_v43 }
  0xfb   :  { %v353_v51 = vadd.f32 %v352_v36, %v289_v50  ;;  %v292_v52 = vadd.f32 %v637_v49, %v558_v43 }
  0xfd   :  { %v356_v53 = vadd.f32 %v355_v38, %v292_v52  ;;  %v638_v54 = vpop.f32.mrb[4].mxu0  ;;  %v382_v56 = vmax.f32 %v353_v51, 0.0 }
  0xfe   :  { %v639_v55 = vpop.f32.mrb[5].mxu0 }
  0xff   :  { %v383_v57 = vmax.f32 %v356_v53, 0.0  ;;  %v640_v58 = vadd.f32 %v639_v55, %v638_v54  ;;  %v641_v59 = vpop.f32.mrb[6].mxu0 }
 0x100   :  { %v642_v60 = vpop.f32.mrb[7].mxu0 }
 0x101   :  { %v389_v61 = vpack.c.bf16 %v383_v57, %v382_v56  ;;  %v297_v62 = vadd.f32 %v640_v58, %v558_v43  ;;  %v643_v63 = vadd.f32 %v642_v60, %v641_v59 }
 0x103   :  { %v361_v0 = vadd.f32 %v676_v35, %v297_v62  ;;  %v300_v1 = vadd.f32 %v643_v63, %v558_v43  ;;  %690 = vmatprep.mubr.msk.bf16.mxu1 %vm432_vm1, %v389_v61 }
 0x105   :  { %v364_v2 = vadd.f32 %v677_v37, %v300_v1  ;;  %v644_v3 = vpop.f32.mrb[8].mxu0  ;;  %v384_v5 = vmax.f32 %v361_v0, 0.0 }
 0x106   :  { %v645_v4 = vpop.f32.mrb[9].mxu0 }
 0x107   :  { %v385_v6 = vmax.f32 %v364_v2, 0.0  ;;  %v646_v7 = vadd.f32 %v645_v4, %v644_v3  ;;  %v647_v8 = vpop.f32.mrb[10].mxu0 }
 0x108   :  { %v648_v9 = vpop.f32.mrb[11].mxu0 }
 0x109   :  { %v390_v10 = vpack.c.bf16 %v385_v6, %v384_v5  ;;  %v649_v11 = vadd.f32 %v648_v9, %v647_v8  ;;  %v305_v12 = vadd.f32 %v646_v7, %v558_v43 }
 0x10b   :  { %v369_v13 = vadd.f32 %v368_v41, %v305_v12  ;;  %691 = vmatmul.mubr.msk.bf16.vlgmr.msra.gmra.mrb[8].mxu1 %vm432_vm1, %v390_v10  ;;  %v308_v14 = vadd.f32 %v649_v11, %v558_v43 }
 0x10d   :  { %v372_v15 = vadd.f32 %v371_v47, %v308_v14  ;;  %v650_v16 = vpop.f32.mrb[12].mxu0  ;;  %v386_v18 = vmax.f32 %v369_v13, 0.0 }
 0x10e   :  { %v651_v17 = vpop.f32.mrb[13].mxu0 }
 0x10f   :  { %v387_v19 = vmax.f32 %v372_v15, 0.0  ;;  %v652_v20 = vadd.f32 %v651_v17, %v650_v16  ;;  %v653_v21 = vpop.f32.mrb[14].mxu0 }
 0x110   :  { %v654_v22 = vpop.f32.mrb[15].mxu0 }
 0x111   :  { %v391_v23 = vpack.c.bf16 %v387_v19, %v386_v18  ;;  %v313_v24 = vadd.f32 %v652_v20, %v558_v43 }
 0x113   :  { %v377_v25 = vadd.f32 %v680_v39, %v313_v24  ;;  %694 = vmatprep.mubr.msk.bf16.mxu1 %vm432_vm1, %v391_v23 }
 0x115   :  { %v388_v26 = vmax.f32 %v377_v25, 0.0 }
 0x117   :  { %v392_v27 = vpack.c.bf16 %v388_v26, %v388_v26 }
 0x119   :  { %695 = vmatmul.mubr.msk.bf16.gmra.mrb[12].mxu1 %vm432_vm1, %v392_v27 }
 0x1de   :  { %v692_v29 = vpop.f32.mrb[8].mxu1 }
 0x1df   :  { %v488_v30 = vadd.f32 %v692_v29, %v593_v28  ;;  %v479_v31 = vpop.f32.mrb[9].mxu1 }
 0x1e0   :  { %v480_v32 = vadd.f32 %v593_v28, %v479_v31  ;;  %v693_v33 = vpop.f32.mrb[10].mxu1 }
 0x1e1   :  { %v511_v34 = vmax.f32 %v488_v30, 0.0  ;;  %v491_v35 = vadd.f32 %v693_v33, %v593_v28  ;;  %v482_v36 = vpop.f32.mrb[11].mxu1 }
 0x1e2   :  { %v509_v37 = vmax.f32 %v480_v32, 0.0  ;;  %v483_v38 = vadd.f32 %v593_v28, %v482_v36 }
 0x1e3   :  { %v611_v39 = vpack.c.bf16 %v511_v34, %v511_v34  ;;  %v512_v40 = vmax.f32 %v491_v35, 0.0 }
 0x1e4   :  { %v609_v41 = vpack.c.bf16 %v509_v37, %v509_v37  ;;  %v510_v42 = vmax.f32 %v483_v38, 0.0 }
 0x1e5   :  { %548 = vst.msk [vmem:[%s910_s5 + $0x8] sm:$0xf] %vm545_vm2, %v611_v39  ;;  %v612_v43 = vpack.c.bf16 %v512_v40, %v512_v40 }
 0x1e6   :  { %546 = vst.msk [vmem:[%s910_s5] sm:$0xf] %vm545_vm2, %v609_v41  ;;  %v610_v44 = vpack.c.bf16 %v510_v42, %v510_v42 }
 0x1e7   :  { %549 = vst.msk [vmem:[%s910_s5 + $0xc] sm:$0xf] %vm545_vm2, %v612_v43 }
 0x1e8   :  { %547 = vst.msk [vmem:[%s910_s5 + $0x4] sm:$0xf] %vm545_vm2, %v610_v44 }
 0x1ec   :  { %v696_v45 = vpop.f32.mrb[12].mxu1 }
 0x1ed   :  { %v504_v46 = vadd.f32 %v696_v45, %v593_v28  ;;  %v495_v47 = vpop.f32.mrb[13].mxu1 }
 0x1ee   :  { %v496_v48 = vadd.f32 %v593_v28, %v495_v47  ;;  %v697_v49 = vpop.f32.mrb[14].mxu1 }
 0x1ef   :  { %v515_v50 = vmax.f32 %v504_v46, 0.0  ;;  %v498_v51 = vpop.f32.mrb[15].mxu1 }
 0x1f0   :  { %v513_v52 = vmax.f32 %v496_v48, 0.0  ;;  %v499_v53 = vadd.f32 %v593_v28, %v498_v51 }
 0x1f1   :  { %v615_v54 = vpack.c.bf16 %v515_v50, %v515_v50 }
 0x1f2   :  { %v613_v55 = vpack.c.bf16 %v513_v52, %v513_v52  ;;  %v514_v56 = vmax.f32 %v499_v53, 0.0 }
 0x1f3   :  { %553 = vst.msk [vmem:[%s910_s5 + $0x18] sm:$0x1] %vm552_vm3, %v615_v54 }
 0x1f4   :  { %550 = vst.msk [vmem:[%s910_s5 + $0x10] sm:$0xf] %vm545_vm2, %v613_v55  ;;  %v614_v57 = vpack.c.bf16 %v514_v56, %v514_v56 }
 0x1f6   :  { %551 = vst.msk [vmem:[%s910_s5 + $0x14] sm:$0xf] %vm545_vm2, %v614_v57 }

// kernel: qfunc_forward.7
= control target key start
LH: loop header
LB: loop body
LE: loop exit
PB: predicated region body
PF: predicated region fallthrough
CT: control target
= control target key end

     0   :  { %vm147_vm0 = vcmask 1042432   ;;  %vm148_vm1 = vcmask 1043456   ;;  %v1206_v0 = vmov 0.0   ;;  %v1207_v2 = vmov 65535   ;;  %s1497_s3 = inlined_call_operand.vmem [shape: bf16[800,64], index: 3, kind: input, shape index: {}]   ;;  %s1498_s4 = inlined_call_operand.vmem [shape: bf16[7,64], index: 4, kind: input, shape index: {}]   ;;  %s1499_s1 = inlined_call_operand.vmem [shape: f32[2,7], index: 1, kind: input, shape index: {}]   ;;  %s1500_s0 = inlined_call_operand.vmem [shape: bf16[2,800], index: 0, kind: input, shape index: {}]   ;;  %s1501_s7 = inlined_call_operand.vmem [shape: bf16[3,64], index: 7, kind: input, shape index: {}]   ;;  %s1502_s2 = inlined_call_operand.vmem [shape: f32[2,3], index: 2, kind: input, shape index: {}]   ;;  %s1503_s6 = inlined_call_operand.vmem [shape: bf16[64,64], index: 6, kind: input, shape index: {}]   ;;  %s1504_s9 = inlined_call_operand.vmem [shape: bf16[64,128], index: 9, kind: input, shape index: {}]   ;;  %s1505_s5 = inlined_call_operand.vmem [shape: f32[1,64], index: 5, kind: input, shape index: {}]   ;;  %s1506_s8 = inlined_call_operand.vmem [shape: f32[1,64], index: 8, kind: input, shape index: {}]   ;;  %s1507_s10 = inlined_call_operand.vmem [shape: f32[1,128], index: 10, kind: input, shape index: {}]   ;;  %s1508_s11 = inlined_call_operand.vmem [shape: f32[2,128], index: 11, kind: output, shape index: {}]  }
   0x1   :  { %1099 = vmatprep.subr.bf16.mxu0 %v1206_v0  ;;  %v1147_v1 = vld [vmem:[%s1497_s3 + $0x40] sm:$0xff]   ;;  %v149_v3 = vsel %vm147_vm0, 4294967295, %v1207_v2  ;;  %vm1208_vm2 = vmmov 0   ;;  %v1149_v8 = vld [vmem:[%s1497_s3 + $0x48] sm:$0xff]   ;;  %vm143_vm3 = vcmask 56320   ;;  %v1153_v14 = vld [vmem:[%s1497_s3 + $0x50] sm:$0xff]   ;;  %v199_v33 = vlaneseq }
   0x2   :  { %v142_v4 = vld [vmem:[%s1498_s4] sm:$0xf]  ;;  %v150_v5 = vsel %vm148_vm1, %v149_v3, 0  ;;  %1018 = vmatprep.subr.bf16.mxu1 %v1147_v1  ;;  %1101 = vmatprep.mubr.msk.bf16.mxu0 %vm1208_vm2, %v1206_v0  ;;  %v1151_v12 = vld [vmem:[%s1497_s3 + $0x8] sm:$0xff]   ;;  %v1155_v16 = vld [vmem:[%s1497_s3 + $0x10] sm:$0xff]   ;;  %vm549_vm4 = vcmask 261120  }
   0x3   :  { %v1148_v6 = vld [vmem:[%s1497_s3] sm:$0xff]   ;;  %v152_v7 = vand.u32 %v150_v5, %v142_v4  ;;  %v1154_v15 = vld [vmem:[%s1497_s3 + $0xc8] sm:$0xff]   ;;  %v1157_v18 = vld [vmem:[%s1497_s3 + $0x58] sm:$0xff]   ;;  %v200_v38 = vshrl.u32 %v199_v33, 7  ;;  %v1209_v42 = vmov 1966171168  }
   0x4   :  { %1019 = vmatpush3.bf16.msra.mxu1 %v1148_v6  ;;  %v1150_v9 = vld [vmem:[%s1497_s3 + $0xc0] sm:$0xff]   ;;  %v1156_v17 = vld [vmem:[%s1497_s3 + $0x88] sm:$0xff]   ;;  %v1158_v19 = vld [vmem:[%s1497_s3 + $0xd0] sm:$0xff]   ;;  %v197_v43 = vunpack.c.l.s4 %v1209_v42  ;;  %vm738_vm5 = vcmask 1040384   ;;  %vm739_vm6 = vcmask 1041408   ;;  %vm734_vm7 = vcmask 23552  }
   0x5   :  { %1100 = vmatpush3.bf16.msra.mxu0 %v152_v7  ;;  %1020 = vmatprep.subr.bf16.mxu1 %v1149_v8  ;;  %v140_v10 = vld [vmem:[%s1499_s1] sm:$0x3]  ;;  %v1159_v20 = vld [vmem:[%s1497_s3 + $0x18] sm:$0xff]   ;;  %v1160_v21 = vld [vmem:[%s1497_s3 + $0x90] sm:$0xff]   ;;  %vm809_vm8 = vcmask 523264  }
   0x6   :  { %1040 = vmatprep.subr.bf16.mxu0 %v1150_v9  ;;  %v141_v11 = vpack.c.bf16 %v140_v10, %v140_v10  ;;  %v1152_v13 = vld [vmem:[%s1497_s3 + $0x80] sm:$0xff]   ;;  %v1162_v23 = vld [vmem:[%s1497_s3 + $0xd8] sm:$0xff]   ;;  %v1165_v26 = vld [vmem:[%s1497_s3 + $0x68] sm:$0xff]   ;;  %v198_v46 = vunpack.c.0.s8 %v197_v43 }
   0x7   :  { %v1161_v22 = vld [vmem:[%s1497_s3 + $0x60] sm:$0xff]   ;;  %v1164_v25 = vld [vmem:[%s1497_s3 + $0x98] sm:$0xff]   ;;  %v1167_v28 = vld [vmem:[%s1497_s3 + $0x28] sm:$0xff]  }
   0x8   :  { %1102 = vmatmul.mubr.msk.bf16.vlgmr.msra.gmra.mrb[0].mxu0 %vm143_vm3, %v141_v11  ;;  %1021 = vmatpush3.bf16.msra.mxu1 %v1151_v12  ;;  %v1163_v24 = vld [vmem:[%s1497_s3 + $0x20] sm:$0xff]   ;;  %v1169_v30 = vld [vmem:[%s1497_s3 + $0x70] sm:$0xff]   ;;  %v1170_v31 = vld [vmem:[%s1497_s3 + $0xe8] sm:$0xff]   ;;  %v201_v48 = vsub.s32 %v198_v46, %v200_v38 }
   0x9   :  { %1041 = vmatpush3.bf16.msra.mxu0 %v1152_v13  ;;  %1022 = vmatprep.subr.bf16.mxu1 %v1153_v14  ;;  %v1166_v27 = vld [vmem:[%s1497_s3 + $0xe0] sm:$0xff]   ;;  %v1171_v32 = vld [vmem:[%s1497_s3 + $0x30] sm:$0xff]   ;;  %v1172_v34 = vld [vmem:[%s1497_s3 + $0xa8] sm:$0xff]  }
   0xa   :  { %1042 = vmatprep.subr.bf16.mxu0 %v1154_v15  ;;  %v1168_v29 = vld [vmem:[%s1497_s3 + $0xa0] sm:$0xff]   ;;  %v1173_v35 = vld [vmem:[%s1497_s3 + $0x78] sm:$0xff]   ;;  %v1174_v36 = vld [vmem:[%s1497_s3 + $0xf0] sm:$0xff]   ;;  %v740_v15 = vsel %vm738_vm5, 4294967295, %v1207_v2 }
   0xb   :  { %v1175_v37 = vld [vmem:[%s1497_s3 + $0x38] sm:$0xff]   ;;  %v1176_v39 = vld [vmem:[%s1497_s3 + $0xb0] sm:$0xff]   ;;  %v39_v40 = vld [vmem:[%s1500_s0] sm:$0x7f] }
   0xc   :  { %1023 = vmatpush3.bf16.msra.mxu1 %v1155_v16  ;;  %v1178_v41 = vld [vmem:[%s1497_s3 + $0xf8] sm:$0xff]   ;;  %v1179_v44 = vld [vmem:[%s1497_s3 + $0x140] sm:$0xff]   ;;  %v195_v45 = vcombine.high %v39_v40, %v39_v40  ;;  %v202_v49 = vrot.slane %v39_v40, %v201_v48  ;;  %v1182_v57 = vld [vmem:[%s1497_s3 + $0x148] sm:$0xff]   ;;  %v741_v16 = vsel %vm739_vm6, %v740_v15, 0 }
   0xd   :  { %1043 = vmatpush3.bf16.msra.mxu0 %v1156_v17  ;;  %1024 = vmatprep.subr.bf16.mxu1 %v1157_v18  ;;  %v1180_v47 = vld [vmem:[%s1497_s3 + $0xb8] sm:$0xff]   ;;  %v1181_v55 = vld [vmem:[%s1497_s3 + $0x100] sm:$0xff]   ;;  %v1183_v60 = vld [vmem:[%s1497_s3 + $0x108] sm:$0xff]  }
   0xe   :  { %1044 = vmatprep.subr.bf16.mxu0 %v1158_v19  ;;  %v209_v50 = vrot.slane %v195_v45, %v201_v48  ;;  %v210_v51 = vcombine.high %v202_v49, %v202_v49  ;;  %v218_v53 = vrot.slane %v202_v49, %v201_v48  ;;  %v1184_v61 = vld [vmem:[%s1497_s3 + $0x150] sm:$0xff]   ;;  %v1194_v62 = vld [vmem:[%s1497_s3 + $0x180] sm:$0xff]   ;;  %v1186_v3 = vld [vmem:[%s1497_s3 + $0x158] sm:$0xff]  }
   0xf   :  { %v1185_v1 = vld [vmem:[%s1497_s3 + $0x110] sm:$0xff]   ;;  %v1197_v4 = vld [vmem:[%s1497_s3 + $0x188] sm:$0xff]   ;;  %v1187_v6 = vld [vmem:[%s1497_s3 + $0x118] sm:$0xff]  }
  0x10   :  { %1025 = vmatpush3.bf16.msra.mxu1 %v1159_v20  ;;  %v211_v52 = vcombine.high %v209_v50, %v209_v50  ;;  %v232_v54 = vrot.slane %v210_v51, %v201_v48  ;;  %v240_v56 = vcombine.high %v218_v53, %v218_v53  ;;  %v225_v63 = vrot.slane %v209_v50, %v201_v48  ;;  %v1188_v7 = vld [vmem:[%s1497_s3 + $0x160] sm:$0xff]   ;;  %v1190_v9 = vld [vmem:[%s1497_s3 + $0x168] sm:$0xff]   ;;  %v1192_v11 = vld [vmem:[%s1497_s3 + $0x170] sm:$0xff]  }
  0x11   :  { %1045 = vmatpush3.bf16.msra.mxu0 %v1160_v21  ;;  %1026 = vmatprep.subr.bf16.mxu1 %v1161_v22  ;;  %v1189_v8 = vld [vmem:[%s1497_s3 + $0x120] sm:$0xff]   ;;  %v1191_v10 = vld [vmem:[%s1497_s3 + $0x128] sm:$0xff]   ;;  %v1193_v12 = vld [vmem:[%s1497_s3 + $0x130] sm:$0xff]  }
  0x12   :  { %1046 = vmatprep.subr.bf16.mxu0 %v1162_v23  ;;  %v242_v58 = vcombine.high %v232_v54, %v232_v54  ;;  %585 = vmatprep.mubr.bf16.mxu1 %v232_v54  ;;  %v239_v59 = vrot.slane %v211_v52, %v201_v48  ;;  %v241_v5 = vcombine.high %v225_v63, %v225_v63  ;;  %v1195_v13 = vld [vmem:[%s1497_s3 + $0x178] sm:$0xff]   ;;  %v733_v17 = vld [vmem:[%s1501_s7] sm:$0x3]  ;;  %v1199_v2 = vld [vmem:[%s1503_s6 + $0x8] sm:$0xff]  }
  0x13   :  { %v1196_v14 = vld [vmem:[%s1497_s3 + $0x138] sm:$0xff]   ;;  %v731_v18 = vld [vmem:[%s1502_s2] sm:$0x3]  ;;  %v743_v19 = vand.u32 %v741_v16, %v733_v17  ;;  %v1200_v22 = vld [vmem:[%s1503_s6 + $0x10] sm:$0xff]  }
  0x14   :  { %1027 = vmatpush3.bf16.msra.mxu1 %v1163_v24  ;;  %625 = vmatprep.mubr.bf16.mxu0 %v242_v58  ;;  %v732_v20 = vpack.c.bf16 %v731_v18, %v731_v18  ;;  %v1198_v21 = vld [vmem:[%s1503_s6] sm:$0xff]   ;;  %v1201_v23 = vld [vmem:[%s1503_s6 + $0x18] sm:$0xff]  }
  0x15   :  { %1047 = vmatpush3.bf16.msra.mxu0 %v1164_v25  ;;  %1028 = vmatprep.subr.bf16.mxu1 %v1165_v26  ;;  %v1002_v52 = vld [vmem:[%s1505_s5] ss:$0 sm:$0xff] }
  0x16   :  { %1048 = vmatprep.subr.bf16.mxu0 %v1166_v27 }
  0x18   :  { %1029 = vmatpush3.bf16.msra.mxu1 %v1167_v28  ;;  %v1202_v28 = vld [vmem:[%s1504_s9] sm:$0xff]  }
  0x19   :  { %1049 = vmatpush3.bf16.msra.mxu0 %v1168_v29  ;;  %1030 = vmatprep.subr.bf16.mxu1 %v1169_v30  ;;  %v1203_v29 = vld [vmem:[%s1504_s9 + $0x8] sm:$0xff]  }
  0x1a   :  { %1050 = vmatprep.subr.bf16.mxu0 %v1170_v31 }
  0x1c   :  { %1031 = vmatpush3.bf16.msra.mxu1 %v1171_v32 }
  0x1d   :  { %1051 = vmatpush3.bf16.msra.mxu0 %v1172_v34  ;;  %1032 = vmatprep.subr.bf16.mxu1 %v1173_v35 }
  0x1e   :  { %1052 = vmatprep.subr.bf16.mxu0 %v1174_v36 }
  0x20   :  { %1033 = vmatpush3.bf16.msra.mxu1 %v1175_v37 }
  0x21   :  { %1053 = vmatpush3.bf16.msra.mxu0 %v1176_v39  ;;  %1062 = vmatprep.subr.bf16.mxu1 %v1179_v44 }
  0x22   :  { %1054 = vmatprep.subr.bf16.mxu0 %v1178_v41 }
  0x23   :  { %586 = vmatmul.mubr.bf16.vlgmr.msra.gmra.mrb[0].mxu1 %v218_v53 }
  0x24   :  { %1063 = vmatpush3.bf16.msra.mxu1 %v1181_v55  ;;  %665 = vmatprep.mubr.bf16.mxu1 %v239_v59 }
  0x25   :  { %1055 = vmatpush3.bf16.msra.mxu0 %v1180_v47  ;;  %1064 = vmatprep.subr.bf16.mxu1 %v1182_v57 }
  0x26   :  { %1105 = vmatprep.subr.bf16.mxu0 %v1206_v0 }
  0x28   :  { %626 = vmatmul.mubr.bf16.vlgmr.msra.gmra.mrb[4].mxu0 %v240_v56  ;;  %1065 = vmatpush3.bf16.msra.mxu1 %v1183_v60 }
  0x29   :  { %1109 = vmatprep.mubr.msk.bf16.mxu0 %vm1208_vm2, %v1206_v0  ;;  %1106 = vmatpush3.bf16.msra.mxu0 %v1194_v62  ;;  %v1205_v62 = vld [vmem:[%s1504_s9 + $0x18] sm:$0xff]  }
  0x2a   :  { %1066 = vmatprep.subr.bf16.mxu1 %v1184_v61  ;;  %1107 = vmatprep.subr.bf16.mxu0 %v1206_v0  ;;  %v1204_v61 = vld [vmem:[%s1504_s9 + $0x10] sm:$0xff]  }
  0x2c   :  { %1067 = vmatpush3.bf16.msra.mxu1 %v1185_v1  ;;  %v1009_v1 = vld [vmem:[%s1506_s8] ss:$0 sm:$0xff] }
  0x2d   :  { %1108 = vmatpush3.bf16.msra.mxu0 %v1197_v4  ;;  %1068 = vmatprep.subr.bf16.mxu1 %v1186_v3 }
  0x2e   :  { %1113 = vmatprep.subr.bf16.mxu0 %v1206_v0 }
  0x30   :  { %1110 = vmatmul.mubr.msk.bf16.vlgmr.msra.gmra.mrb[8].mxu0 %vm549_vm4, %v241_v5  ;;  %1069 = vmatpush3.bf16.msra.mxu1 %v1187_v6 }
  0x31   :  { %1115 = vmatprep.mubr.msk.bf16.mxu0 %vm1208_vm2, %v1206_v0  ;;  %1070 = vmatprep.subr.bf16.mxu1 %v1188_v7 }
  0x32   :  { %1114 = vmatpush3.bf16.msra.mxu0 %v743_v19 }
  0x33   :  { %1119 = vmatprep.subr.bf16.mxu0 %v1206_v0 }
  0x34   :  { %1071 = vmatpush3.bf16.msra.mxu1 %v1189_v8 }
  0x35   :  { %1072 = vmatprep.subr.bf16.mxu1 %v1190_v9 }
  0x38   :  { %1073 = vmatpush3.bf16.msra.mxu1 %v1191_v10  ;;  %1116 = vmatmul.mubr.msk.bf16.vlgmr.msra.gmra.mrb[12].mxu0 %vm734_vm7, %v732_v20 }
  0x39   :  { %1074 = vmatprep.subr.bf16.mxu1 %v1192_v11  ;;  %1120 = vmatpush3.bf16.msra.mxu0 %v1198_v21 }
  0x3a   :  { %1127 = vmatprep.mubr.msk.bf16.mxu0 %vm1208_vm2, %v1206_v0  ;;  %1121 = vmatprep.subr.bf16.mxu0 %v1206_v0 }
  0x3c   :  { %1075 = vmatpush3.bf16.msra.mxu1 %v1193_v12 }
  0x3d   :  { %1076 = vmatprep.subr.bf16.mxu1 %v1195_v13  ;;  %1122 = vmatpush3.bf16.msra.mxu0 %v1199_v2 }
  0x3e   :  { %1123 = vmatprep.subr.bf16.mxu0 %v1206_v0 }
  0x40   :  { %1077 = vmatpush3.bf16.msra.mxu1 %v1196_v14 }
  0x41   :  { %1131 = vmatprep.subr.bf16.mxu1 %v1206_v0  ;;  %1124 = vmatpush3.bf16.msra.mxu0 %v1200_v22 }
  0x42   :  { %1125 = vmatprep.subr.bf16.mxu0 %v1206_v0 }
  0x43   :  { %666 = vmatmul.mubr.bf16.vlgmr.msra.gmra.mrb[4].mxu1 %v225_v63 }
  0x44   :  { %1139 = vmatprep.mubr.msk.bf16.mxu1 %vm1208_vm2, %v1206_v0  ;;  %1132 = vmatpush3.bf16.msra.mxu1 %v1202_v28 }
  0x45   :  { %1126 = vmatpush3.bf16.msra.mxu0 %v1201_v23  ;;  %1133 = vmatprep.subr.bf16.mxu1 %v1206_v0 }
  0x48   :  { %1134 = vmatpush3.bf16.msra.mxu1 %v1203_v29 }
  0x49   :  { %1135 = vmatprep.subr.bf16.mxu1 %v1206_v0 }
  0x4c   :  { %1136 = vmatpush3.bf16.msra.mxu1 %v1204_v61 }
  0x4d   :  { %1137 = vmatprep.subr.bf16.mxu1 %v1206_v0  ;;  %v1010_v0 = vld [vmem:[%s1507_s10] ss:$0 sm:$0xff] }
  0x50   :  { %1138 = vmatpush3.bf16.msra.mxu1 %v1205_v62 }
  0xdb   :  { %v188_v24 = vpop.f32.mrb[0].mxu0 }
  0xdc   :  { %v1103_v25 = vpop.f32.mrb[1].mxu0 }
  0xdd   :  { %v191_v26 = vpop.f32.mrb[2].mxu0 }
  0xde   :  { %v1104_v27 = vpop.f32.mrb[3].mxu0 }
  0xf6   :  { %v1034_v30 = vpop.f32.mrb[0].mxu1 }
  0xf7   :  { %v1035_v31 = vpop.f32.mrb[1].mxu1 }
  0xf8   :  { %v1036_v32 = vadd.f32 %v1035_v31, %v1034_v30  ;;  %v1037_v33 = vpop.f32.mrb[2].mxu1 }
  0xf9   :  { %v1038_v35 = vpop.f32.mrb[3].mxu1 }
  0xfa   :  { %v588_v37 = vadd.f32 %v1036_v32, %v188_v24 }
  0xfb   :  { %v1056_v34 = vpop.f32.mrb[4].mxu0 }
  0xfc   :  { %v1057_v36 = vpop.f32.mrb[5].mxu0 }
  0xfd   :  { %v1058_v38 = vadd.f32 %v1057_v36, %v1056_v34  ;;  %v1059_v39 = vpop.f32.mrb[6].mxu0 }
  0xfe   :  { %v1060_v40 = vpop.f32.mrb[7].mxu0 }
  0xff   :  { %v628_v41 = vadd.f32 %v1058_v38, %v588_v37 }
 0x103   :  { %v707_v42 = vpop.f32.mrb[8].mxu0 }
 0x104   :  { %v1111_v43 = vpop.f32.mrb[9].mxu0 }
 0x105   :  { %v710_v44 = vpop.f32.mrb[10].mxu0 }
 0x106   :  { %v1112_v45 = vpop.f32.mrb[11].mxu0 }
 0x10b   :  { %v779_v57 = vpop.f32.mrb[12].mxu0 }
 0x10c   :  { %v1117_v58 = vpop.f32.mrb[13].mxu0 }
 0x10d   :  { %v782_v59 = vpop.f32.mrb[14].mxu0 }
 0x10e   :  { %v1118_v60 = vpop.f32.mrb[15].mxu0 }
 0x116   :  { %v1078_v46 = vpop.f32.mrb[4].mxu1 }
 0x117   :  { %v1079_v47 = vpop.f32.mrb[5].mxu1 }
 0x118   :  { %v1080_v48 = vadd.f32 %v1079_v47, %v1078_v46  ;;  %v1081_v49 = vpop.f32.mrb[6].mxu1 }
 0x119   :  { %v1082_v50 = vpop.f32.mrb[7].mxu1 }
 0x11a   :  { %v668_v51 = vadd.f32 %v1080_v48, %v628_v41 }
 0x11c   :  { %v708_v53 = vadd.f32 %v707_v42, %v668_v51 }
 0x11e   :  { %v720_v54 = vadd.f32 %v1002_v52, %v708_v53 }
 0x120   :  { %v721_v55 = vmax.f32 %v720_v54, 0.0 }
 0x122   :  { %v722_v56 = vpack.c.bf16 %v721_v55, %v721_v55 }
 0x124   :  { %1128 = vmatmul.mubr.msk.bf16.vlgmr.msra.gmra.mrb[16].mxu0 %vm809_vm8, %v722_v56 }
 0x1f7   :  { %v847_v63 = vpop.f32.mrb[16].mxu0 }
 0x1f8   :  { %v848_v3 = vadd.f32 %v847_v63, %v779_v57  ;;  %v1129_v4 = vpop.f32.mrb[17].mxu0 }
 0x1f9   :  { %v850_v5 = vpop.f32.mrb[18].mxu0 }
 0x1fa   :  { %v860_v6 = vadd.f32 %v1009_v1, %v848_v3  ;;  %v1130_v7 = vpop.f32.mrb[19].mxu0 }
 0x1fc   :  { %v861_v8 = vmax.f32 %v860_v6, 0.0 }
 0x1fe   :  { %v862_v9 = vpack.c.bf16 %v861_v8, %v861_v8 }
 0x200   :  { %1140 = vmatmul.mubr.msk.bf16.vlgmr.msra.gmra.mrb[8].mxu1 %vm809_vm8, %v862_v9 }
 0x2d3   :  { %v939_v10 = vpop.f32.mrb[8].mxu1 }
 0x2d4   :  { %v940_v11 = vadd.f32 %v1010_v0, %v939_v10  ;;  %v1141_v12 = vpop.f32.mrb[9].mxu1 }
 0x2d5   :  { %v942_v13 = vpop.f32.mrb[10].mxu1 }
 0x2d6   :  { %945 = vst [vmem:[%s1508_s11] sm:$0x3] %v940_v11  ;;  %v1142_v14 = vpop.f32.mrb[11].mxu1 }

</bundles_post_ra>
